<compile_context>
chip_gen: v5e
topology: v5e:2x2
jax: 0.10.0
libtpu: 0.0.40
codegen_flags: <defaults>
</compile_context>

<pallas_src>
import functools

import numpy as np
import jax
import jax.numpy as jnp
from jax import lax
from jax.experimental import pallas as pl
from jax.experimental.pallas import tpu as pltpu

EPS = 1e-5
LANE = 128
VMEM_LIMIT = 48 * 1024 * 1024      # scoped limit: safe on v5e/v6e/v7x
VMEM_BUDGET = 32 * 1024 * 1024     # per-tile working-set target


def _round_up(x, m):
    return (x + m - 1) // m * m


def _choose_tm(m, kp, cop, target_rows=1024, budget=VMEM_BUDGET):
    """Row-tile size: as large as the VMEM budget allows, multiple of 8."""
    tm = min(target_rows, _round_up(m, 8))
    tm = max(_round_up(tm, 8), 8)

    def working_set(t):
        # double-buffered bf16 in/out tiles + weights + f32 accumulator headroom
        return 2 * t * (kp + cop) * 2 + kp * cop * 2 + t * cop * 4

    while tm > 8 and working_set(tm) > budget:
        tm = max(_round_up(tm // 2, 8), 8)
    return tm


# ----------------------------------------------------------------------------
# Bilinear 2x upsample (align_corners=False), matching F.interpolate exactly.
# ----------------------------------------------------------------------------
def _up2x_axis(a, axis):
    n = a.shape[axis]
    first = lax.slice_in_dim(a, 0, 1, axis=axis)
    last = lax.slice_in_dim(a, n - 1, n, axis=axis)
    prev = jnp.concatenate([first, lax.slice_in_dim(a, 0, n - 1, axis=axis)], axis=axis)
    nxt = jnp.concatenate([lax.slice_in_dim(a, 1, n, axis=axis), last], axis=axis)
    even = 0.75 * a + 0.25 * prev          # output 2i   <- src i - 0.25
    odd = 0.75 * a + 0.25 * nxt            # output 2i+1 <- src i + 0.25
    out = jnp.stack([even, odd], axis=axis + 1)
    new_shape = list(a.shape)
    new_shape[axis] = 2 * n
    return out.reshape(new_shape)


def _bilinear_up2x_nhwc(x):
    return _up2x_axis(_up2x_axis(x, 1), 2)


# ----------------------------------------------------------------------------
# Tap-packed im2col (XLA glue): (N,H,W,C) -> (N,H,W,9C), K layout = tap*C + ci
# with tap = ky*3 + kx and zero spatial padding.
# ----------------------------------------------------------------------------
def _im2col_3x3(x_nhwc):
    N, H, W, C = x_nhwc.shape
    xp = jnp.pad(x_nhwc, ((0, 0), (1, 1), (1, 1), (0, 0)))
    taps = [xp[:, dy:dy + H, dx:dx + W, :] for dy in range(3) for dx in range(3)]
    return jnp.concatenate(taps, axis=-1)


# ----------------------------------------------------------------------------
# Phase 1 kernel: tap-packed conv GEMM + centered per-tile BN partial stats.
# ----------------------------------------------------------------------------
def _conv_stats_kernel(x_ref, w_ref, conv_ref, sum_ref, m2_ref, *, m_real, tm):
    cop = conv_ref.shape[-1]
    # One (TM, Kp) @ (Kp, Cop) MXU matmul; accumulate / stats in f32.
    acc = jnp.dot(x_ref[...], w_ref[...], preferred_element_type=jnp.float32)
    conv_ref[...] = acc.astype(conv_ref.dtype)

    # Centered per-tile stats (chunk/Welford merge on the host side) computed
    # from the f32 accumulator; padded rows (beyond m_real) are masked out.
    row0 = pl.program_id(0) * tm
    n_valid = jnp.maximum(jnp.minimum(m_real - row0, tm), 1).astype(jnp.float32)
    rows = lax.broadcasted_iota(jnp.int32, acc.shape, 0)
    mask = rows < (m_real - row0)
    xm = jnp.where(mask, acc, 0.0)
    s = jnp.sum(xm, axis=0, keepdims=True)                 # (1, cop)
    mean_t = s / n_valid
    d = jnp.where(mask, acc - mean_t, 0.0)
    m2 = jnp.sum(d * d, axis=0, keepdims=True)             # (1, cop)
    sum_ref[...] = jnp.broadcast_to(s, (8, cop))
    m2_ref[...] = jnp.broadcast_to(m2, (8, cop))


# ----------------------------------------------------------------------------
# Phase 2 kernel (final block only): normalize + ReLU, write only real cout
# channels (lane-masked narrow store; far fewer HBM bytes than a padded slab).
# ----------------------------------------------------------------------------
def _bn_relu_kernel(conv_ref, scale_ref, shift_ref, o_ref):
    cout = o_ref.shape[-1]
    y = conv_ref[...].astype(jnp.float32) * scale_ref[...] + shift_ref[...]
    y = jnp.maximum(y, 0.0)
    o_ref[...] = y[:, :cout].astype(o_ref.dtype)


# ----------------------------------------------------------------------------
# 3x3 conv (no bias) as a tap-packed GEMM + BN batch statistics.
# Returns (conv_flat bf16 (Mpad, Cop), mean, var, meta).
# ----------------------------------------------------------------------------
def _conv3x3_batch_stats(x_nhwc, w_oihw, *, target_rows=1024):
    N, H, W, cin = x_nhwc.shape
    cout = w_oihw.shape[0]
    assert w_oihw.shape[1] == cin, (w_oihw.shape, cin)

    k_real = 9 * cin
    kp = _round_up(k_real, LANE)
    cop = _round_up(cout, LANE)
    m = N * H * W
    tm = _choose_tm(m, kp, cop, target_rows)
    mpad = _round_up(m, tm)
    nt = mpad // tm

    # Tap-packed input columns (zero row padding is stats-safe: it is masked
    # out inside the kernel) and matching (Kp, Cop) weight matrix, both bf16.
    cols = _im2col_3x3(x_nhwc).reshape(m, k_real)
    cols = jnp.pad(cols, ((0, mpad - m), (0, kp - k_real))).astype(jnp.bfloat16)
    w = jnp.transpose(w_oihw, (2, 3, 1, 0)).reshape(k_real, cout)
    w = jnp.pad(w, ((0, kp - k_real), (0, cop - cout))).astype(jnp.bfloat16)

    conv, s_part, m2_part = pl.pallas_call(
        functools.partial(_conv_stats_kernel, m_real=m, tm=tm),
        grid=(nt,),
        out_shape=(
            jax.ShapeDtypeStruct((mpad, cop), jnp.bfloat16),
            jax.ShapeDtypeStruct((nt * 8, cop), jnp.float32),
            jax.ShapeDtypeStruct((nt * 8, cop), jnp.float32),
        ),
        in_specs=[pl.BlockSpec((tm, kp), lambda i: (i, 0)),
                  pl.BlockSpec((kp, cop), lambda i: (0, 0))],
        out_specs=(pl.BlockSpec((tm, cop), lambda i: (i, 0)),
                   pl.BlockSpec((8, cop), lambda i: (i, 0)),
                   pl.BlockSpec((8, cop), lambda i: (i, 0))),
        compiler_params=pltpu.CompilerParams(
            dimension_semantics=("parallel",),
            vmem_limit_bytes=VMEM_LIMIT),
    )(cols, w)

    # Tiny chunk-merge of the per-tile (sum, centered M2) partials in f32.
    counts = jnp.asarray(
        np.minimum(tm, m - tm * np.arange(nt)).astype(np.float32))   # (nt,)
    tile_sum = s_part[::8, :]                                        # (nt, cop)
    tile_m2 = m2_part[::8, :]
    mean = jnp.sum(tile_sum, axis=0) / float(m)
    tile_mean = tile_sum / counts[:, None]
    m2 = jnp.sum(tile_m2, axis=0) + jnp.sum(
        counts[:, None] * (tile_mean - mean[None, :]) ** 2, axis=0)
    var = jnp.maximum(m2 / float(m), 0.0)
    return conv, mean, var, (m, cop, tm, nt, mpad)


def _bn_scale_shift(mean, var, gamma, beta, cop):
    cout = gamma.shape[0]
    g = jnp.pad(gamma.astype(jnp.float32), (0, cop - cout))
    b = jnp.pad(beta.astype(jnp.float32), (0, cop - cout))
    scale = g * lax.rsqrt(var + EPS)
    shift = b - mean * scale
    return scale, shift


# ----------------------------------------------------------------------------
# UpsampleBlock.forward (non-parametric path; NCHW in / NCHW out).
# ----------------------------------------------------------------------------
def upsample_block_forward(x_nchw, skip_nchw, params):
    w1, g1, b1 = params["w1"], params["g1"], params["b1"]
    w2, g2, b2 = params["w2"], params["g2"], params["b2"]
    ch1 = w1.shape[0]
    ch_out = w2.shape[0]

    # bf16 layout glue (tiny channel counts; matmul operands are bf16 anyway).
    x = jnp.transpose(x_nchw, (0, 2, 3, 1)).astype(jnp.bfloat16)
    x = _bilinear_up2x_nhwc(x)
    if skip_nchw is not None:
        skip = jnp.transpose(skip_nchw, (0, 2, 3, 1)).astype(jnp.bfloat16)
        x = jnp.concatenate([x, skip], axis=-1)
    N, H, W, _ = x.shape

    # ---- block 1: conv1 -> BN1(batch stats) -> ReLU --------------------------
    conv1, mean1, var1, (m, cop1, _, _, _) = _conv3x3_batch_stats(x, w1)
    scale1, shift1 = _bn_scale_shift(mean1, var1, g1, b1, cop1)
    # BN1 + ReLU fused into the XLA glue building block-2's tap-packed input
    # (elementwise fma + relu fuse with the im2col pad/concat; no standalone
    # full-activation HBM round trip).
    h1 = jnp.maximum(
        conv1[:m, :ch1].astype(jnp.float32) * scale1[:ch1] + shift1[:ch1], 0.0)
    h1 = h1.astype(jnp.bfloat16).reshape(N, H, W, ch1)

    # ---- block 2: conv2 -> BN2(batch stats) -> ReLU --------------------------
    conv2, mean2, var2, (m2, cop2, tm2, nt2, mpad2) = _conv3x3_batch_stats(h1, w2)
    scale2, shift2 = _bn_scale_shift(mean2, var2, g2, b2, cop2)

    y = pl.pallas_call(
        _bn_relu_kernel,
        grid=(nt2,),
        out_shape=jax.ShapeDtypeStruct((mpad2, ch_out), jnp.float32),
        in_specs=[pl.BlockSpec((tm2, cop2), lambda i: (i, 0)),
                  pl.BlockSpec((1, cop2), lambda i: (0, 0)),
                  pl.BlockSpec((1, cop2), lambda i: (0, 0))],
        out_specs=pl.BlockSpec((tm2, ch_out), lambda i: (i, 0)),
        compiler_params=pltpu.CompilerParams(
            dimension_semantics=("parallel",),
            vmem_limit_bytes=VMEM_LIMIT),
    )(conv2, scale2.reshape(1, cop2), shift2.reshape(1, cop2))

    y = y[:m2].reshape(N, H, W, ch_out)
    return jnp.transpose(y, (0, 3, 1, 2))                 # NHWC -> NCHW


def init_params(key, ch_in, ch_out, skip_in=0):
    k1, k2 = jax.random.split(key)
    cin1 = ch_in + skip_in
    w1 = jax.random.normal(k1, (ch_out, cin1, 3, 3), jnp.float32) / np.sqrt(9 * cin1)
    w2 = jax.random.normal(k2, (ch_out, ch_out, 3, 3), jnp.float32) / np.sqrt(9 * ch_out)
    return dict(
        w1=w1, g1=jnp.ones((ch_out,), jnp.float32), b1=jnp.zeros((ch_out,), jnp.float32),
        w2=w2, g2=jnp.ones((ch_out,), jnp.float32), b2=jnp.zeros((ch_out,), jnp.float32),
    )


# ----------------------------------------------------------------------------
# Pure-JAX reference (f32 HIGHEST-precision convs, BN training-mode stats).
# ----------------------------------------------------------------------------
def _ref_block(x_nchw, w, g, b):
    y = lax.conv_general_dilated(
        x_nchw, w, window_strides=(1, 1), padding=((1, 1), (1, 1)),
        dimension_numbers=("NCHW", "OIHW", "NCHW"),
        precision=lax.Precision.HIGHEST)
    mean = jnp.mean(y, axis=(0, 2, 3), keepdims=True)
    var = jnp.mean((y - mean) ** 2, axis=(0, 2, 3), keepdims=True)
    yhat = (y - mean) * lax.rsqrt(var + EPS)
    yhat = yhat * g.reshape(1, -1, 1, 1) + b.reshape(1, -1, 1, 1)
    return jnp.maximum(yhat, 0.0)


def _ref_upsample_block(x_nchw, skip_nchw, p):
    xu = jnp.transpose(
        _bilinear_up2x_nhwc(jnp.transpose(x_nchw, (0, 2, 3, 1))), (0, 3, 1, 2))
    if skip_nchw is not None:
        xu = jnp.concatenate([xu, skip_nchw], axis=1)
    h = _ref_block(xu, p["w1"], p["g1"], p["b1"])
    return _ref_block(h, p["w2"], p["g2"], p["b2"])


if __name__ == "__main__":
    key = jax.random.PRNGKey(0)
    kx, ks, kp = jax.random.split(key, 3)

    N, CH_IN, H, W = 2, 4, 16, 16
    SKIP_IN, CH_OUT = 4, 8

    x = jax.random.normal(kx, (N, CH_IN, H, W), jnp.float32)
    skip = jax.random.normal(ks, (N, SKIP_IN, 2 * H, 2 * W), jnp.float32)
    params = init_params(kp, CH_IN, CH_OUT, SKIP_IN)

    out = jax.jit(upsample_block_forward)(x, skip, params)
    out = jax.block_until_ready(out)
    assert out.shape == (N, CH_OUT, 2 * H, 2 * W), out.shape

    ref = jax.block_until_ready(_ref_upsample_block(x, skip, params))
    # Tolerance covers bf16 operands / bf16 intermediates (accumulation and
    # all BN statistics stay f32).
    np.testing.assert_allclose(np.asarray(out), np.asarray(ref), atol=5e-2, rtol=5e-2)

    print("KERNEL_OK")
</pallas_src>

<mosaic_0001>
module attributes {stable_mosaic.version = 11 : i64} {
  func.func @_conv_stats_kernel(%arg0: i32, %arg1: memref<1024x128xbf16, #tpu.memory_space<vmem>>, %arg2: memref<128x128xbf16, #tpu.memory_space<vmem>>, %arg3: memref<1024x128xbf16, #tpu.memory_space<vmem>>, %arg4: memref<8x128xf32, #tpu.memory_space<vmem>>, %arg5: memref<8x128xf32, #tpu.memory_space<vmem>>) attributes {dimension_semantics = [#tpu.dimension_semantics<parallel>], iteration_bounds = array<i64: 2>, scalar_prefetch = 0 : i64, scratch_operands = 0 : i64, tpu.core_type = #tpu.core_type<tc>, window_params = [{transform_indices = @transform_0, window_bounds = array<i64: 1024, 128>}, {pipeline_mode = #tpu.pipeline_mode<synchronous>, transform_indices = @transform_1, window_bounds = array<i64: 128, 128>}, {transform_indices = @transform_2, window_bounds = array<i64: 1024, 128>}, {transform_indices = @transform_3, window_bounds = array<i64: 8, 128>}, {transform_indices = @transform_4, window_bounds = array<i64: 8, 128>}]} {
    %c0 = arith.constant 0 : index
    %c0_0 = arith.constant 0 : index
    %0 = vector.load %arg1[%c0, %c0_0] : memref<1024x128xbf16, #tpu.memory_space<vmem>>, vector<1024x128xbf16>
    %c0_1 = arith.constant 0 : index
    %c0_2 = arith.constant 0 : index
    %1 = vector.load %arg2[%c0_1, %c0_2] : memref<128x128xbf16, #tpu.memory_space<vmem>>, vector<128x128xbf16>
    %cst = arith.constant dense<0.000000e+00> : vector<1024x128xf32>
    %2 = tpu.matmul %0, %1, %cst {dimension_numbers = #tpu.dot_dimension_numbers<[1], [0], [0], [1], [0, 0, 1, 1], [], []>} : vector<1024x128xbf16>, vector<128x128xbf16>, vector<1024x128xf32> -> vector<1024x128xf32>
    %3 = arith.truncf %2 : vector<1024x128xf32> to vector<1024x128xbf16>
    %c0_3 = arith.constant 0 : index
    %c0_4 = arith.constant 0 : index
    %4 = vector.load %arg3[%c0_3, %c0_4] : memref<1024x128xbf16, #tpu.memory_space<vmem>>, vector<1024x128xbf16>
    tpu.vector_store %arg3[%c0_3, %c0_4], %3 {strides = array<i32>} : memref<1024x128xbf16, #tpu.memory_space<vmem>>, vector<1024x128xbf16>,
    %c1024_i32 = arith.constant 1024 : i32
    %5 = arith.muli %arg0, %c1024_i32 : i32
    %c2048_i32 = arith.constant 2048 : i32
    %6 = arith.subi %c2048_i32, %5 : i32
    %c1024_i32_5 = arith.constant 1024 : i32
    %7 = arith.minsi %6, %c1024_i32_5 : i32
    %c1_i32 = arith.constant 1 : i32
    %8 = arith.maxsi %7, %c1_i32 : i32
    %9 = arith.sitofp %8 : i32 to f32
    %10 = tpu.iota {dimensions = array<i32: 0>} : vector<1024x128xi32>
    %c2048_i32_6 = arith.constant 2048 : i32
    %11 = arith.subi %c2048_i32_6, %5 : i32
    %12 = vector.broadcast %11 : i32 to vector<1024x128xi32>
    %13 = arith.cmpi slt, %10, %12 : vector<1024x128xi32>
    %cst_7 = arith.constant 0.000000e+00 : f32
    %14 = vector.broadcast %cst_7 : f32 to vector<1024x128xf32>
    %15 = arith.select %13, %2, %14 : vector<1024x128xi1>, vector<1024x128xf32>
    %cst_8 = arith.constant dense<0.000000e+00> : vector<128xf32>
    %16 = vector.multi_reduction <add>, %15, %cst_8 [0] : vector<1024x128xf32> to vector<128xf32>
    %17 = vector.shape_cast %16 : vector<128xf32> to vector<1x128xf32>
    %18 = vector.broadcast %9 : f32 to vector<1x128xf32>
    %19 = arith.divf %17, %18 : vector<1x128xf32>
    %20 = vector.broadcast %19 : vector<1x128xf32> to vector<1024x128xf32>
    %21 = arith.subf %2, %20 : vector<1024x128xf32>
    %cst_9 = arith.constant 0.000000e+00 : f32
    %22 = vector.broadcast %cst_9 : f32 to vector<1024x128xf32>
    %23 = arith.select %13, %21, %22 : vector<1024x128xi1>, vector<1024x128xf32>
    %24 = arith.mulf %23, %23 : vector<1024x128xf32>
    %cst_10 = arith.constant dense<0.000000e+00> : vector<128xf32>
    %25 = vector.multi_reduction <add>, %24, %cst_10 [0] : vector<1024x128xf32> to vector<128xf32>
    %26 = vector.shape_cast %25 : vector<128xf32> to vector<1x128xf32>
    %27 = vector.shape_cast %17 : vector<1x128xf32> to vector<1x128xf32>
    %28 = vector.broadcast %27 : vector<1x128xf32> to vector<8x128xf32>
    %c0_11 = arith.constant 0 : index
    %c0_12 = arith.constant 0 : index
    %29 = vector.load %arg4[%c0_11, %c0_12] : memref<8x128xf32, #tpu.memory_space<vmem>>, vector<8x128xf32>
    tpu.vector_store %arg4[%c0_11, %c0_12], %28 {strides = array<i32>} : memref<8x128xf32, #tpu.memory_space<vmem>>, vector<8x128xf32>,
    %30 = vector.shape_cast %26 : vector<1x128xf32> to vector<1x128xf32>
    %31 = vector.broadcast %30 : vector<1x128xf32> to vector<8x128xf32>
    %c0_13 = arith.constant 0 : index
    %c0_14 = arith.constant 0 : index
    %32 = vector.load %arg5[%c0_13, %c0_14] : memref<8x128xf32, #tpu.memory_space<vmem>>, vector<8x128xf32>
    tpu.vector_store %arg5[%c0_13, %c0_14], %31 {strides = array<i32>} : memref<8x128xf32, #tpu.memory_space<vmem>>, vector<8x128xf32>,
    return
  }
  func.func @transform_0(%arg0: i32) -> (i32, i32) {
    %c0_i32 = arith.constant 0 : i32
    %c0_i32_0 = arith.constant 0 : i32
    return %arg0, %c0_i32 : i32, i32
  }
  func.func @transform_1(%arg0: i32) -> (i32, i32) {
    %c0_i32 = arith.constant 0 : i32
    %c0_i32_0 = arith.constant 0 : i32
    %c0_i32_1 = arith.constant 0 : i32
    return %c0_i32, %c0_i32_0 : i32, i32
  }
  func.func @transform_2(%arg0: i32) -> (i32, i32) {
    %c0_i32 = arith.constant 0 : i32
    %c0_i32_0 = arith.constant 0 : i32
    return %arg0, %c0_i32 : i32, i32
  }
  func.func @transform_3(%arg0: i32) -> (i32, i32) {
    %c0_i32 = arith.constant 0 : i32
    %c0_i32_0 = arith.constant 0 : i32
    return %arg0, %c0_i32 : i32, i32
  }
  func.func @transform_4(%arg0: i32) -> (i32, i32) {
    %c0_i32 = arith.constant 0 : i32
    %c0_i32_0 = arith.constant 0 : i32
    return %arg0, %c0_i32 : i32, i32
  }
}

module attributes {stable_mosaic.version = 11 : i64} {
  func.func @_bn_relu_kernel(%arg0: i32, %arg1: memref<1024x128xbf16, #tpu.memory_space<vmem>>, %arg2: memref<1x128xf32, #tpu.memory_space<vmem>>, %arg3: memref<1x128xf32, #tpu.memory_space<vmem>>, %arg4: memref<1024x8xf32, #tpu.memory_space<vmem>>) attributes {dimension_semantics = [#tpu.dimension_semantics<parallel>], iteration_bounds = array<i64: 2>, scalar_prefetch = 0 : i64, scratch_operands = 0 : i64, tpu.core_type = #tpu.core_type<tc>, window_params = [{transform_indices = @transform_0, window_bounds = array<i64: 1024, 128>}, {pipeline_mode = #tpu.pipeline_mode<synchronous>, transform_indices = @transform_1, window_bounds = array<i64: 1, 128>}, {pipeline_mode = #tpu.pipeline_mode<synchronous>, transform_indices = @transform_2, window_bounds = array<i64: 1, 128>}, {transform_indices = @transform_3, window_bounds = array<i64: 1024, 8>}]} {
    %c0 = arith.constant 0 : index
    %c0_0 = arith.constant 0 : index
    %0 = vector.load %arg1[%c0, %c0_0] : memref<1024x128xbf16, #tpu.memory_space<vmem>>, vector<1024x128xbf16>
    %1 = arith.extf %0 : vector<1024x128xbf16> to vector<1024x128xf32>
    %c0_1 = arith.constant 0 : index
    %c0_2 = arith.constant 0 : index
    %2 = vector.load %arg2[%c0_1, %c0_2] : memref<1x128xf32, #tpu.memory_space<vmem>>, vector<1x128xf32>
    %3 = vector.broadcast %2 : vector<1x128xf32> to vector<1024x128xf32>
    %4 = arith.mulf %1, %3 : vector<1024x128xf32>
    %c0_3 = arith.constant 0 : index
    %c0_4 = arith.constant 0 : index
    %5 = vector.load %arg3[%c0_3, %c0_4] : memref<1x128xf32, #tpu.memory_space<vmem>>, vector<1x128xf32>
    %6 = vector.broadcast %5 : vector<1x128xf32> to vector<1024x128xf32>
    %7 = arith.addf %4, %6 : vector<1024x128xf32>
    %cst = arith.constant 0.000000e+00 : f32
    %8 = vector.broadcast %cst : f32 to vector<1024x128xf32>
    %9 = arith.maximumf %7, %8 : vector<1024x128xf32>
    %10 = vector.extract_strided_slice %9 {offsets = [0, 0], sizes = [1024, 8], strides = [1, 1]} : vector<1024x128xf32> to vector<1024x8xf32>
    %c0_5 = arith.constant 0 : index
    %c0_6 = arith.constant 0 : index
    %11 = vector.load %arg4[%c0_5, %c0_6] : memref<1024x8xf32, #tpu.memory_space<vmem>>, vector<1024x8xf32>
    tpu.vector_store %arg4[%c0_5, %c0_6], %10 {strides = array<i32>} : memref<1024x8xf32, #tpu.memory_space<vmem>>, vector<1024x8xf32>,
    return
  }
  func.func @transform_0(%arg0: i32) -> (i32, i32) {
    %c0_i32 = arith.constant 0 : i32
    %c0_i32_0 = arith.constant 0 : i32
    return %arg0, %c0_i32 : i32, i32
  }
  func.func @transform_1(%arg0: i32) -> (i32, i32) {
    %c0_i32 = arith.constant 0 : i32
    %c0_i32_0 = arith.constant 0 : i32
    %c0_i32_1 = arith.constant 0 : i32
    return %c0_i32, %c0_i32_0 : i32, i32
  }
  func.func @transform_2(%arg0: i32) -> (i32, i32) {
    %c0_i32 = arith.constant 0 : i32
    %c0_i32_0 = arith.constant 0 : i32
    %c0_i32_1 = arith.constant 0 : i32
    return %c0_i32, %c0_i32_0 : i32, i32
  }
  func.func @transform_3(%arg0: i32) -> (i32, i32) {
    %c0_i32 = arith.constant 0 : i32
    %c0_i32_0 = arith.constant 0 : i32
    return %arg0, %c0_i32 : i32, i32
  }
}

</mosaic_0001>

<bundles_post_ra>
// kernel: upsample_block_forward.3
= control target key start
LH: loop header
LB: loop body
LE: loop exit
PB: predicated region body
PF: predicated region fallthrough
CT: control target
= control target key end

     0   :  { %s3393_s15 = smov 0   ;;  %s5777_s0 = inlined_call_operand.vmem [shape: bf16[2048,128], index: 0, kind: input, shape index: {}]   ;;  %s5778_s1 = inlined_call_operand.vmem [shape: bf16[128,128], index: 1, kind: input, shape index: {}]   ;;  %s5779_s2 = inlined_call_operand.vmem [shape: bf16[2048,128], index: 2, kind: output, shape index: {0}]   ;;  %s5780_s3 = inlined_call_operand.vmem [shape: f32[16,128], index: 3, kind: output, shape index: {1}]   ;;  %s5781_s4 = inlined_call_operand.vmem [shape: f32[16,128], index: 4, kind: output, shape index: {2}]  }
   0x1 LB: > { %s3399_s16 = sadd.s32 4294967295, %s3366_s15   ;;  %p2566_p0 = scmp.ge.s32.totalorder %s3366_s15, 1  ;;  %s3366_s15 = sphi %s3393_s15, %s15_s15  }
   0x2   : > { %p168_p1 = scmp.lt.s32.totalorder %s3366_s15, 3 }
   0x4   : > { %p169_p2 = pnand %p2566_p0, %p168_p1 }
   0x6   : > { %172 = sbr.rel (%p169_p2) target bundleno = 900 (0x384), region = 28 }
   0xb   : > { %v2940_v0 = vld [vmem:[%s5778_s1 + $0x38] sm:$0xff]  ;;  %v2939_v1 = vld [vmem:[%s5778_s1 + $0x30] sm:$0xff]  ;;  %v2938_v2 = vld [vmem:[%s5778_s1 + $0x28] sm:$0xff]  ;;  %s2567_s25 = sshll.u32 %s3399_s16, 7  ;;  %s2861_s17 = sshll.u32 %s3399_s16, 10 }
   0xc   : > { %798 = vmatpush.bf16.msra.mxu0 %v2940_v0  ;;  %3326 = vmatpush.bf16.msra.mxu1 %v2940_v0  ;;  %v2937_v3 = vld [vmem:[%s5778_s1 + $0x20] sm:$0xff]  ;;  %v2936_v4 = vld [vmem:[%s5778_s1 + $0x18] sm:$0xff]  ;;  %p203_p3 = scmp.lt.s32.totalorder %s2567_s25, 255  ;;  %v2935_v5 = vld [vmem:[%s5778_s1 + $0x10] sm:$0xff]  ;;  %s3709_s18 = ssub.s32 2048, %s2861_s17 }
   0xd   : > { %3327 = vmatpush.bf16.msra.mxu2 %v2940_v0  ;;  %3328 = vmatpush.bf16.msra.mxu3 %v2940_v0  ;;  %v2934_v6 = vld [vmem:[%s5778_s1 + $0x8] sm:$0xff]  ;;  %v2933_v7 = vld [vmem:[%s5778_s1] sm:$0xff]  ;;  %p214_p4 = scmp.lt.s32.totalorder %s3399_s16, 1  ;;  %p1385_p5 = scmp.lt.s32.totalorder %s3709_s18, 1024 }
   0xe   : > { %s6687_s25 = smov (!%p203_p3, %s2567_s25), 255  ;;  %p2862_p6 = scmp.gt.s32.totalorder %s3709_s18, 1 }
   0xf   : > { %s2568_s6 = sshll.u32 %s6687_s25, 2  ;;  %s6689_s16 = smov (!%p214_p4, %s3399_s16), 1 }
  0x10   : > { %799 = vmatpush.bf16.msra.mxu0 %v2939_v1  ;;  %3329 = vmatpush.bf16.msra.mxu1 %v2939_v1  ;;  %s3436_s11 = scalar_lea.vmem %s5777_s0, %s2568_s6  ;;  %s3465_s14 = scalar_lea.vmem %s5779_s2, %s2568_s6 }
  0x11   : > { %3330 = vmatpush.bf16.msra.mxu2 %v2939_v1  ;;  %3331 = vmatpush.bf16.msra.mxu3 %v2939_v1  ;;  %v2869_v8 = vld [vmem:[%s3436_s11] sm:$0xff]  ;;  %v2870_v9 = vld [vmem:[%s3436_s11 + $0x8] sm:$0xff]  ;;  %v2871_v11 = vld [vmem:[%s3436_s11 + $0x10] sm:$0xff]  ;;  %s2571_s19 = sshll.u32 %s6689_s16, 3 }
  0x12   : > { %v2885_v10 = vld [vmem:[%s3436_s11 + $0x80] sm:$0xff]  ;;  %v2886_v12 = vld [vmem:[%s3436_s11 + $0x88] sm:$0xff]  ;;  %v2872_v13 = vld [vmem:[%s3436_s11 + $0x18] sm:$0xff]  ;;  %s217_s22 = scalar_lea.vmem %s5780_s3, %s2571_s19  ;;  %s221_s27 = scalar_lea.vmem %s5781_s4, %s2571_s19 }
  0x13   : > { %v2887_v14 = vld [vmem:[%s3436_s11 + $0x90] sm:$0xff]  ;;  %v2873_v15 = vld [vmem:[%s3436_s11 + $0x20] sm:$0xff]  ;;  %v2888_v16 = vld [vmem:[%s3436_s11 + $0x98] sm:$0xff]  ;;  %s1386_s23 = scalar_select %p1385_p5, %s3709_s18, 1024 }
  0x14   : > { %800 = vmatpush.bf16.msra.mxu0 %v2938_v2  ;;  %3332 = vmatpush.bf16.msra.mxu1 %v2938_v2  ;;  %v2874_v17 = vld [vmem:[%s3436_s11 + $0x28] sm:$0xff]  ;;  %v2901_v18 = vld [vmem:[%s3436_s11 + $0x100] sm:$0xff]  ;;  %v2875_v20 = vld [vmem:[%s3436_s11 + $0x30] sm:$0xff] }
  0x15   : > { %3333 = vmatpush.bf16.msra.mxu2 %v2938_v2  ;;  %3334 = vmatpush.bf16.msra.mxu3 %v2938_v2  ;;  %v2889_v19 = vld [vmem:[%s3436_s11 + $0xa0] sm:$0xff]  ;;  %v2902_v21 = vld [vmem:[%s3436_s11 + $0x108] sm:$0xff]  ;;  %v2876_v23 = vld [vmem:[%s3436_s11 + $0x38] sm:$0xff]  ;;  %s6691_s23 = smov (!%p2862_p6, %s1386_s23), 1 }
  0x16   : > { %v2890_v22 = vld [vmem:[%s3436_s11 + $0xa8] sm:$0xff]  ;;  %v2903_v24 = vld [vmem:[%s3436_s11 + $0x110] sm:$0xff]  ;;  %v2877_v26 = vld [vmem:[%s3436_s11 + $0x40] sm:$0xff]  ;;  %s1389_s24 = scvt.s32.f32 %s6691_s23 }
  0x17   : > { %v2891_v25 = vld [vmem:[%s3436_s11 + $0xb0] sm:$0xff]  ;;  %v2904_v28 = vld [vmem:[%s3436_s11 + $0x118] sm:$0xff]  ;;  %v2878_v32 = vld [vmem:[%s3436_s11 + $0x48] sm:$0xff] }
  0x18   : > { %801 = vmatpush.bf16.msra.mxu0 %v2937_v3  ;;  %3335 = vmatpush.bf16.msra.mxu1 %v2937_v3  ;;  %v2892_v31 = vld [vmem:[%s3436_s11 + $0xb8] sm:$0xff]  ;;  %v2905_v34 = vld [vmem:[%s3436_s11 + $0x120] sm:$0xff]  ;;  %v2879_v40 = vld [vmem:[%s3436_s11 + $0x50] sm:$0xff] }
  0x19   : > { %3336 = vmatpush.bf16.msra.mxu2 %v2937_v3  ;;  %3337 = vmatpush.bf16.msra.mxu3 %v2937_v3  ;;  %v2917_v35 = vld [vmem:[%s3436_s11 + $0x180] sm:$0xff]  ;;  %v2906_v44 = vld [vmem:[%s3436_s11 + $0x128] sm:$0xff]  ;;  %v2880_v50 = vld [vmem:[%s3436_s11 + $0x58] sm:$0xff] }
  0x1a   : > { %v2893_v39 = vld [vmem:[%s3436_s11 + $0xc0] sm:$0xff]  ;;  %v2918_v45 = vld [vmem:[%s3436_s11 + $0x188] sm:$0xff]  ;;  %v2907_v54 = vld [vmem:[%s3436_s11 + $0x130] sm:$0xff] }
  0x1b   : > { %v2894_v49 = vld [vmem:[%s3436_s11 + $0xc8] sm:$0xff]  ;;  %v2919_v55 = vld [vmem:[%s3436_s11 + $0x190] sm:$0xff]  ;;  %v2881_v60 = vld [vmem:[%s3436_s11 + $0x60] sm:$0xff] }
  0x1c   : > { %802 = vmatpush.bf16.msra.mxu0 %v2936_v4  ;;  %3338 = vmatpush.bf16.msra.mxu1 %v2936_v4  ;;  %v2895_v59 = vld [vmem:[%s3436_s11 + $0xd0] sm:$0xff]  ;;  %v2908_v0 = vld [vmem:[%s3436_s11 + $0x138] sm:$0xff] }
  0x1d   : > { %3339 = vmatpush.bf16.msra.mxu2 %v2936_v4  ;;  %3340 = vmatpush.bf16.msra.mxu3 %v2936_v4  ;;  %v2920_v1 = vld [vmem:[%s3436_s11 + $0x198] sm:$0xff] }
  0x20   : > { %803 = vmatpush.bf16.msra.mxu0 %v2935_v5  ;;  %3341 = vmatpush.bf16.msra.mxu1 %v2935_v5 }
  0x21   : > { %3342 = vmatpush.bf16.msra.mxu2 %v2935_v5  ;;  %3343 = vmatpush.bf16.msra.mxu3 %v2935_v5  ;;  %v2896_v5 = vld [vmem:[%s3436_s11 + $0xd8] sm:$0xff] }
  0x24   : > { %804 = vmatpush.bf16.msra.mxu0 %v2934_v6  ;;  %3344 = vmatpush.bf16.msra.mxu1 %v2934_v6 }
  0x25   : > { %3345 = vmatpush.bf16.msra.mxu2 %v2934_v6  ;;  %3346 = vmatpush.bf16.msra.mxu3 %v2934_v6  ;;  %v2882_v6 = vld [vmem:[%s3436_s11 + $0x68] sm:$0xff] }
  0x28   : > { %805 = vmatpush.bf16.msra.mxu0 %v2933_v7  ;;  %3347 = vmatpush.bf16.msra.mxu1 %v2933_v7 }
  0x29   : > { %3348 = vmatpush.bf16.msra.mxu2 %v2933_v7  ;;  %3349 = vmatpush.bf16.msra.mxu3 %v2933_v7 }
  0x2b   : > { %806 = vmatmul.bf16.vlgmr.msra.gmra.mxu0 %v2869_v8  ;;  %886 = vmatmul.bf16.vlgmr.msra.gmra.mxu1 %v2885_v10  ;;  %v2909_v10 = vld [vmem:[%s3436_s11 + $0x140] sm:$0xff] }
  0x2c   : > { %966 = vmatmul.bf16.vlgmr.msra.gmra.mxu2 %v2901_v18  ;;  %1046 = vmatmul.bf16.vlgmr.msra.gmra.mxu3 %v2917_v35 }
  0x3b   : > { %811 = vmatmul.bf16.gmra.mxu0 %v2870_v9  ;;  %891 = vmatmul.bf16.gmra.mxu1 %v2886_v12 }
  0x3c   : > { %971 = vmatmul.bf16.gmra.mxu2 %v2902_v21  ;;  %1051 = vmatmul.bf16.gmra.mxu3 %v2918_v45 }
  0x4b   : > { %816 = vmatmul.bf16.gmra.mxu0 %v2871_v11  ;;  %896 = vmatmul.bf16.gmra.mxu1 %v2887_v14  ;;  %v2921_v11 = vld [vmem:[%s3436_s11 + $0x1a0] sm:$0xff] }
  0x4c   : > { %976 = vmatmul.bf16.gmra.mxu2 %v2903_v24  ;;  %1056 = vmatmul.bf16.gmra.mxu3 %v2919_v55  ;;  %v2922_v24 = vld [vmem:[%s3436_s11 + $0x1a8] sm:$0xff] }
  0x5b   : > { %821 = vmatmul.bf16.gmra.mxu0 %v2872_v13  ;;  %901 = vmatmul.bf16.gmra.mxu1 %v2888_v16  ;;  %v2897_v16 = vld [vmem:[%s3436_s11 + $0xe0] sm:$0xff] }
  0x5c   : > { %981 = vmatmul.bf16.gmra.mxu2 %v2904_v28  ;;  %1061 = vmatmul.bf16.gmra.mxu3 %v2920_v1 }
  0x6b   : > { %826 = vmatmul.bf16.gmra.mxu0 %v2873_v15  ;;  %906 = vmatmul.bf16.gmra.mxu1 %v2889_v19 }
  0x6c   : > { %986 = vmatmul.bf16.gmra.mxu2 %v2905_v34  ;;  %1066 = vmatmul.bf16.gmra.mxu3 %v2921_v11 }
  0x7b   : > { %831 = vmatmul.bf16.gmra.mxu0 %v2874_v17  ;;  %911 = vmatmul.bf16.gmra.mxu1 %v2890_v22  ;;  %v2883_v17 = vld [vmem:[%s3436_s11 + $0x70] sm:$0xff] }
  0x7c   : > { %991 = vmatmul.bf16.gmra.mxu2 %v2906_v44  ;;  %1071 = vmatmul.bf16.gmra.mxu3 %v2922_v24  ;;  %v2923_v44 = vld [vmem:[%s3436_s11 + $0x1b0] sm:$0xff] }
  0x8b   : > { %836 = vmatmul.bf16.gmra.mxu0 %v2875_v20  ;;  %916 = vmatmul.bf16.gmra.mxu1 %v2891_v25 }
  0x8c   : > { %996 = vmatmul.bf16.gmra.mxu2 %v2907_v54  ;;  %1076 = vmatmul.bf16.gmra.mxu3 %v2923_v44 }
  0x9b   : > { %841 = vmatmul.bf16.gmra.mxu0 %v2876_v23  ;;  %921 = vmatmul.bf16.gmra.mxu1 %v2892_v31  ;;  %v2910_v23 = vld [vmem:[%s3436_s11 + $0x148] sm:$0xff] }
  0x9c   : > { %1001 = vmatmul.bf16.gmra.mxu2 %v2908_v0  ;;  %v2898_v31 = vld [vmem:[%s3436_s11 + $0xe8] sm:$0xff]  ;;  %v2924_v0 = vld [vmem:[%s3436_s11 + $0x1b8] sm:$0xff] }
  0x9d   : > { %1081 = vmatmul.bf16.gmra.mxu3 %v2924_v0 }
  0xa8   : > { %v3457_v27 = vpop.f32.mrf.mxu0  ;;  %v3480_v37 = vpop.f32.mrf.mxu1 }
  0xa9   : > { %6128 = vst [vmem:[#allocation2_spill] sm:$0xff] %v3457_v27 }
  0xaa   : > { %6132 = vst [vmem:[#allocation6_spill] sm:$0xff] %v3480_v37 }
  0xab   : > { %846 = vmatmul.bf16.gmra.mxu0 %v2877_v26  ;;  %926 = vmatmul.bf16.gmra.mxu1 %v2893_v39 }
  0xac   : > { %1006 = vmatmul.bf16.gmra.mxu2 %v2909_v10 }
  0xaf   : > { %v3556_v15 = vpop.f32.mrf.mxu2 }
  0xb0   : > { %v3467_v29 = vpop.f32.mrf.mxu0  ;;  %v3489_v42 = vpop.f32.mrf.mxu1  ;;  %6146 = vst [vmem:[#allocation20_spill] sm:$0xff] %v3556_v15 }
  0xb1   : > { %6129 = vst [vmem:[#allocation3_spill] sm:$0xff] %v3467_v29  ;;  %v2946_v30 = vpack.c.bf16 %v3467_v29, %v3457_v27  ;;  %v3026_v43 = vpack.c.bf16 %v3489_v42, %v3480_v37 }
  0xb2   : > { %6134 = vst [vmem:[#allocation8_spill] sm:$0xff] %v3489_v42 }
  0xb3   : > { %2947 = vst [vmem:[%s3465_s14] sm:$0xff] %v2946_v30  }
  0xb4   : > { %3278 = vst [vmem:[%s3465_s14 + $0x80] sm:$0xff] %v3026_v43   ;;  %v2911_v43 = vld [vmem:[%s3436_s11 + $0x150] sm:$0xff] }
  0xb7   : > { %v3567_v21 = vpop.f32.mrf.mxu2 }
  0xb8   : > { %v3474_v33 = vpop.f32.mrf.mxu0  ;;  %v3498_v47 = vpop.f32.mrf.mxu1  ;;  %6149 = vst [vmem:[#allocation23_spill] sm:$0xff] %v3567_v21  ;;  %v3106_v22 = vpack.c.bf16 %v3567_v21, %v3556_v15 }
  0xb9   : > { %6130 = vst [vmem:[#allocation4_spill] sm:$0xff] %v3474_v33 }
  0xba   : > { %6135 = vst [vmem:[#allocation9_spill] sm:$0xff] %v3498_v47 }
  0xbb   : > { %851 = vmatmul.bf16.gmra.mxu0 %v2878_v32  ;;  %931 = vmatmul.bf16.gmra.mxu1 %v2894_v49  ;;  %3294 = vst [vmem:[%s3465_s14 + $0x100] sm:$0xff] %v3106_v22   ;;  %v2884_v32 = vld [vmem:[%s3436_s11 + $0x78] sm:$0xff]  ;;  %v2925_v22 = vld [vmem:[%s3436_s11 + $0x1c0] sm:$0xff] }
  0xbc   : > { %1011 = vmatmul.bf16.gmra.mxu2 %v2910_v23  ;;  %1086 = vmatmul.bf16.gmra.mxu3 %v2925_v22 }
  0xbf   : > { %v3581_v30 = vpop.f32.mrf.mxu2 }
  0xc0   : > { %v3478_v36 = vpop.f32.mrf.mxu0  ;;  %v3507_v52 = vpop.f32.mrf.mxu1  ;;  %6152 = vst [vmem:[#allocation26_spill] sm:$0xff] %v3581_v30 }
  0xc1   : > { %6131 = vst [vmem:[#allocation5_spill] sm:$0xff] %v3478_v36  ;;  %v2951_v38 = vpack.c.bf16 %v3478_v36, %v3474_v33  ;;  %v3031_v53 = vpack.c.bf16 %v3507_v52, %v3498_v47 }
  0xc2   : > { %6137 = vst [vmem:[#allocation11_spill] sm:$0xff] %v3507_v52 }
  0xc3   : > { %3263 = vst [vmem:[%s3465_s14 + $0x8] sm:$0xff] %v2951_v38  }
  0xc4   : > { %3279 = vst [vmem:[%s3465_s14 + $0x88] sm:$0xff] %v3031_v53   ;;  %v2899_v53 = vld [vmem:[%s3436_s11 + $0xf0] sm:$0xff] }
  0xc7   : > { %v3592_v39 = vpop.f32.mrf.mxu2 }
  0xc8   : > { %v3487_v41 = vpop.f32.mrf.mxu0  ;;  %v3516_v57 = vpop.f32.mrf.mxu1  ;;  %6155 = vst [vmem:[#allocation29_spill] sm:$0xff] %v3592_v39 }
  0xc9   : > { %6133 = vst [vmem:[#allocation7_spill] sm:$0xff] %v3487_v41 }
  0xcb   : > { %856 = vmatmul.bf16.gmra.mxu0 %v2879_v40  ;;  %936 = vmatmul.bf16.gmra.mxu1 %v2895_v59  ;;  %v3111_v40 = vpack.c.bf16 %v3592_v39, %v3581_v30 }
  0xcc   : > { %1016 = vmatmul.bf16.gmra.mxu2 %v2911_v43 }
  0xcd   : > { %3295 = vst [vmem:[%s3465_s14 + $0x108] sm:$0xff] %v3111_v40  }
  0xd0   : > { %v3496_v46 = vpop.f32.mrf.mxu0  ;;  %v3525_v62 = vpop.f32.mrf.mxu1 }
  0xd1   : > { %v2956_v48 = vpack.c.bf16 %v3496_v46, %v3487_v41  ;;  %v3036_v63 = vpack.c.bf16 %v3525_v62, %v3516_v57 }
  0xd3   : > { %3264 = vst [vmem:[%s3465_s14 + $0x10] sm:$0xff] %v2956_v48  }
  0xd4   : > { %3280 = vst [vmem:[%s3465_s14 + $0x90] sm:$0xff] %v3036_v63   ;;  %v2912_v63 = vld [vmem:[%s3436_s11 + $0x158] sm:$0xff] }
  0xd8   : > { %v3505_v51 = vpop.f32.mrf.mxu0  ;;  %v3534_v3 = vpop.f32.mrf.mxu1 }
  0xd9   : > { %6136 = vst [vmem:[#allocation10_spill] sm:$0xff] %v3505_v51 }
  0xda   : > { %6141 = vst [vmem:[#allocation15_spill] sm:$0xff] %v3534_v3 }
  0xdb   : > { %861 = vmatmul.bf16.gmra.mxu0 %v2880_v50  ;;  %941 = vmatmul.bf16.gmra.mxu1 %v2896_v5  ;;  %v3606_v50 = vpop.f32.mrf.mxu2 }
  0xdc   : > { %6157 = vst [vmem:[#allocation31_spill] sm:$0xff] %v3606_v50  ;;  %1021 = vmatmul.bf16.gmra.mxu2 %v2912_v63 }
  0xe0   : > { %v3514_v56 = vpop.f32.mrf.mxu0  ;;  %v3543_v8 = vpop.f32.mrf.mxu1 }
  0xe1   : > { %6138 = vst [vmem:[#allocation12_spill] sm:$0xff] %v3514_v56  ;;  %v2961_v58 = vpack.c.bf16 %v3514_v56, %v3505_v51  ;;  %v3041_v9 = vpack.c.bf16 %v3543_v8, %v3534_v3 }
  0xe2   : > { %6143 = vst [vmem:[#allocation17_spill] sm:$0xff] %v3543_v8 }
  0xe3   : > { %3265 = vst [vmem:[%s3465_s14 + $0x18] sm:$0xff] %v2961_v58   ;;  %v3616_v59 = vpop.f32.mrf.mxu2 }
  0xe4   : > { %3281 = vst [vmem:[%s3465_s14 + $0x98] sm:$0xff] %v3041_v9   ;;  %v2900_v9 = vld [vmem:[%s3436_s11 + $0xf8] sm:$0xff] }
  0xe5   : > { %6159 = vst [vmem:[#allocation33_spill] sm:$0xff] %v3616_v59 }
  0xe8   : > { %v3523_v61 = vpop.f32.mrf.mxu0  ;;  %v3552_v13 = vpop.f32.mrf.mxu1 }
  0xe9   : > { %6139 = vst [vmem:[#allocation13_spill] sm:$0xff] %v3523_v61 }
  0xea   : > { %6145 = vst [vmem:[#allocation19_spill] sm:$0xff] %v3552_v13 }
  0xeb   : > { %866 = vmatmul.bf16.gmra.mxu0 %v2881_v60  ;;  %946 = vmatmul.bf16.gmra.mxu1 %v2897_v16  ;;  %v3116_v60 = vpack.c.bf16 %v3616_v59, %v3606_v50  ;;  %v2928_v50 = vld [vmem:[%s3436_s11 + $0x1d8] sm:$0xff] }
  0xed   : > { %3296 = vst [vmem:[%s3465_s14 + $0x110] sm:$0xff] %v3116_v60   ;;  %v2926_v60 = vld [vmem:[%s3436_s11 + $0x1c8] sm:$0xff] }
  0xee   : > { %1091 = vmatmul.bf16.gmra.mxu3 %v2926_v60 }
  0xf0   : > { %v3532_v2 = vpop.f32.mrf.mxu0  ;;  %v3563_v19 = vpop.f32.mrf.mxu1 }
  0xf1   : > { %6140 = vst [vmem:[#allocation14_spill] sm:$0xff] %v3532_v2  ;;  %v2966_v4 = vpack.c.bf16 %v3532_v2, %v3523_v61  ;;  %v3046_v20 = vpack.c.bf16 %v3563_v19, %v3552_v13 }
  0xf2   : > { %6148 = vst [vmem:[#allocation22_spill] sm:$0xff] %v3563_v19 }
  0xf3   : > { %3266 = vst [vmem:[%s3465_s14 + $0x20] sm:$0xff] %v2966_v4  }
  0xf4   : > { %3282 = vst [vmem:[%s3465_s14 + $0xa0] sm:$0xff] %v3046_v20   ;;  %v2913_v20 = vld [vmem:[%s3436_s11 + $0x160] sm:$0xff] }
  0xf5   : > { %1026 = vmatmul.bf16.gmra.mxu2 %v2913_v20  ;;  %v1390_v20 = vlaneseq }
  0xf7   : > { %v3700_v60 = vshrl.u32 %v1390_v20, 7 }
  0xf8   : > { %v3541_v7 = vpop.f32.mrf.mxu0  ;;  %v3577_v26 = vpop.f32.mrf.mxu1 }
  0xf9   : > { %6142 = vst [vmem:[#allocation16_spill] sm:$0xff] %v3541_v7  ;;  %v3717_v20 = vadd.s32 16, %v3700_v60  ;;  %v3809_v30 = vadd.s32 72, %v3700_v60 }
  0xfa   : > { %6151 = vst [vmem:[#allocation25_spill] sm:$0xff] %v3577_v26 }
  0xfb   : > { %871 = vmatmul.bf16.gmra.mxu0 %v2882_v6  ;;  %951 = vmatmul.bf16.gmra.mxu1 %v2898_v31  ;;  %v3630_v6 = vpop.f32.mrf.mxu2  ;;  %6180 = vst [vmem:[#allocation54_spill] sm:$0xff] %v3717_v20 }
  0xfc   : > { %6161 = vst [vmem:[#allocation35_spill] sm:$0xff] %v3630_v6 }
  0xfd   : > { %6193 = vst [vmem:[#allocation67_spill] sm:$0xff] %v3809_v30 }
 0x100   : > { %v3550_v12 = vpop.f32.mrf.mxu0  ;;  %v3588_v35 = vpop.f32.mrf.mxu1 }
 0x101   : > { %6144 = vst [vmem:[#allocation18_spill] sm:$0xff] %v3550_v12  ;;  %v2971_v14 = vpack.c.bf16 %v3550_v12, %v3541_v7  ;;  %v3051_v38 = vpack.c.bf16 %v3588_v35, %v3577_v26 }
 0x102   : > { %6154 = vst [vmem:[#allocation28_spill] sm:$0xff] %v3588_v35 }
 0x103   : > { %3267 = vst [vmem:[%s3465_s14 + $0x28] sm:$0xff] %v2971_v14   ;;  %v3640_v16 = vpop.f32.mrf.mxu2 }
 0x104   : > { %3283 = vst [vmem:[%s3465_s14 + $0xa8] sm:$0xff] %v3051_v38  }
 0x105   : > { %6164 = vst [vmem:[#allocation38_spill] sm:$0xff] %v3640_v16 }
 0x108   : > { %v3561_v18 = vpop.f32.mrf.mxu0  ;;  %v3602_v48 = vpop.f32.mrf.mxu1 }
 0x109   : > { %6147 = vst [vmem:[#allocation21_spill] sm:$0xff] %v3561_v18 }
 0x10b   : > { %876 = vmatmul.bf16.gmra.mxu0 %v2883_v17  ;;  %956 = vmatmul.bf16.gmra.mxu1 %v2899_v53  ;;  %v3121_v17 = vpack.c.bf16 %v3640_v16, %v3630_v6  ;;  %v3654_v31 = vpop.f32.mrf.mxu2 }
 0x10c   : > { %6166 = vst [vmem:[#allocation40_spill] sm:$0xff] %v3654_v31 }
 0x10d   : > { %3297 = vst [vmem:[%s3465_s14 + $0x118] sm:$0xff] %v3121_v17  }
 0x110   : > { %v3575_v25 = vpop.f32.mrf.mxu0  ;;  %v3612_v55 = vpop.f32.mrf.mxu1 }
 0x111   : > { %6150 = vst [vmem:[#allocation24_spill] sm:$0xff] %v3575_v25  ;;  %v2976_v28 = vpack.c.bf16 %v3575_v25, %v3561_v18  ;;  %v3056_v58 = vpack.c.bf16 %v3612_v55, %v3602_v48 }
 0x113   : > { %3268 = vst [vmem:[%s3465_s14 + $0x30] sm:$0xff] %v2976_v28   ;;  %v3665_v44 = vpop.f32.mrf.mxu2 }
 0x114   : > { %3284 = vst [vmem:[%s3465_s14 + $0xb0] sm:$0xff] %v3056_v58   ;;  %v3126_v53 = vpack.c.bf16 %v3665_v44, %v3654_v31  ;;  %v2914_v58 = vld [vmem:[%s3436_s11 + $0x168] sm:$0xff]  ;;  %v3752_v31 = vadd.s32 40, %v3700_v60 }
 0x115   : > { %6169 = vst [vmem:[#allocation43_spill] sm:$0xff] %v3665_v44  ;;  %1031 = vmatmul.bf16.gmra.mxu2 %v2914_v58  ;;  %v3712_v44 = vadd.s32 8, %v3700_v60 }
 0x116   : > { %3298 = vst [vmem:[%s3465_s14 + $0x120] sm:$0xff] %v3126_v53  }
 0x117   : > { %6179 = vst [vmem:[#allocation53_spill] sm:$0xff] %v3712_v44 }
 0x118   : > { %v3586_v34 = vpop.f32.mrf.mxu0  ;;  %v3626_v4 = vpop.f32.mrf.mxu1  ;;  %6187 = vst [vmem:[#allocation61_spill] sm:$0xff] %v3752_v31 }
 0x119   : > { %6153 = vst [vmem:[#allocation27_spill] sm:$0xff] %v3586_v34 }
 0x11b   : > { %881 = vmatmul.bf16.gmra.mxu0 %v2884_v32  ;;  %961 = vmatmul.bf16.gmra.mxu1 %v2900_v9  ;;  %v3656_v32 = vpop.f32.mrf.mxu3 }
 0x11c   : > { %6167 = vst [vmem:[#allocation41_spill] sm:$0xff] %v3656_v32 }
 0x120   : > { %v3600_v45 = vpop.f32.mrf.mxu0  ;;  %v3636_v11 = vpop.f32.mrf.mxu1 }
 0x121   : > { %6156 = vst [vmem:[#allocation30_spill] sm:$0xff] %v3600_v45  ;;  %v2981_v49 = vpack.c.bf16 %v3600_v45, %v3586_v34  ;;  %v3061_v14 = vpack.c.bf16 %v3636_v11, %v3626_v4 }
 0x122   : > { %6163 = vst [vmem:[#allocation37_spill] sm:$0xff] %v3636_v11 }
 0x123   : > { %3269 = vst [vmem:[%s3465_s14 + $0x38] sm:$0xff] %v2981_v49   ;;  %v3667_v49 = vpop.f32.mrf.mxu3 }
 0x124   : > { %3285 = vst [vmem:[%s3465_s14 + $0xb8] sm:$0xff] %v3061_v14   ;;  %v3186_v63 = vpack.c.bf16 %v3667_v49, %v3656_v32  ;;  %v3684_v14 = vpop.f32.mrf.mxu2 }
 0x125   : > { %6170 = vst [vmem:[#allocation44_spill] sm:$0xff] %v3667_v49  ;;  %v2927_v49 = vld [vmem:[%s3436_s11 + $0x1d0] sm:$0xff] }
 0x126   : > { %3310 = vst [vmem:[%s3465_s14 + $0x180] sm:$0xff] %v3186_v63   ;;  %1096 = vmatmul.bf16.gmra.mxu3 %v2927_v49 }
 0x127   : > { %6173 = vst [vmem:[#allocation47_spill] sm:$0xff] %v3684_v14 }
 0x128   : > { %v3610_v54 = vpop.f32.mrf.mxu0  ;;  %v3650_v24 = vpop.f32.mrf.mxu1 }
 0x129   : > { %6158 = vst [vmem:[#allocation32_spill] sm:$0xff] %v3610_v54 }
 0x12b   : > { %v3686_v17 = vpop.f32.mrf.mxu3 }
 0x12c   : > { %6174 = vst [vmem:[#allocation48_spill] sm:$0xff] %v3686_v17  ;;  %v3696_v53 = vpop.f32.mrf.mxu2 }
 0x12d   : > { %6177 = vst [vmem:[#allocation51_spill] sm:$0xff] %v3696_v53  ;;  %v3131_v63 = vpack.c.bf16 %v3696_v53, %v3684_v14  ;;  %v3720_v53 = vstv %s3709_s18 }
 0x12e   : > { %vm1521_vm0 = vcmp.lt.s32.totalorder %v3712_v44, %v3720_v53  ;;  %vm1520_vm1 = vcmp.lt.s32.totalorder %v3700_v60, %v3720_v53  ;;  %vm1522_vm2 = vcmp.lt.s32.totalorder %v3717_v20, %v3720_v53  ;;  %vm1525_vm5 = vcmp.lt.s32.totalorder %v3752_v31, %v3720_v53 }
 0x12f   : > { %3299 = vst [vmem:[%s3465_s14 + $0x128] sm:$0xff] %v3131_v63   ;;  %v1649_v14 = vsel %vm1521_vm0, %v3467_v29, 0.0  ;;  %v1648_v16 = vsel %vm1520_vm1, %v3457_v27, 0.0  ;;  %v1650_v6 = vsel %vm1522_vm2, %v3474_v33, 0.0  ;;  %v3793_v27 = vadd.s32 64, %v3700_v60 }
 0x130   : > { %v3624_v1 = vpop.f32.mrf.mxu0  ;;  %v3661_v40 = vpop.f32.mrf.mxu1  ;;  %v1776_v59 = vadd.f32 %v1649_v14, %v1648_v16  ;;  %v3774_v16 = vadd.s32 56, %v3700_v60  ;;  %v1653_v39 = vsel %vm1525_vm5, %v3496_v46, 0.0  ;;  %vm1529_vm9 = vcmp.lt.s32.totalorder %v3809_v30, %v3720_v53 }
 0x131   : > { %6160 = vst [vmem:[#allocation34_spill] sm:$0xff] %v3624_v1  ;;  %v2986_v5 = vpack.c.bf16 %v3624_v1, %v3610_v54  ;;  %v3066_v43 = vpack.c.bf16 %v3661_v40, %v3650_v24  ;;  %vm1528_vm8 = vcmp.lt.s32.totalorder %v3793_v27, %v3720_v53  ;;  %v3858_v31 = vadd.s32 104, %v3700_v60 }
 0x132   : > { %v1777_v29 = vadd.f32 %v1776_v59, %v1650_v6  ;;  %6189 = vst [vmem:[#allocation63_spill] sm:$0xff] %v3774_v16  ;;  %vm1527_vm7 = vcmp.lt.s32.totalorder %v3774_v16, %v3720_v53  ;;  %v3867_v30 = vadd.s32 112, %v3700_v60 }
 0x133   : > { %3270 = vst [vmem:[%s3465_s14 + $0x40] sm:$0xff] %v2986_v5   ;;  %v3698_v58 = vpop.f32.mrf.mxu3  ;;  %vm5837_vm13 = vcmp.lt.s32.totalorder %v3858_v31, %v3720_v53 }
 0x134   : > { %3286 = vst [vmem:[%s3465_s14 + $0xc0] sm:$0xff] %v3066_v43   ;;  %v3191_v32 = vpack.c.bf16 %v3698_v58, %v3686_v17  ;;  %v3733_v63 = vpop.f32.mrf.mxu2  ;;  %vm5848_vm14 = vcmp.lt.s32.totalorder %v3867_v30, %v3720_v53 }
 0x135   : > { %6178 = vst [vmem:[#allocation52_spill] sm:$0xff] %v3698_v58 }
 0x136   : > { %3311 = vst [vmem:[%s3465_s14 + $0x188] sm:$0xff] %v3191_v32   ;;  %1101 = vmatmul.bf16.gmra.mxu3 %v2928_v50 }
 0x137   : > { %6184 = vst [vmem:[#allocation58_spill] sm:$0xff] %v3733_v63 }
 0x138   : > { %v3634_v10 = vpop.f32.mrf.mxu0  ;;  %v3680_v5 = vpop.f32.mrf.mxu1  ;;  %6192 = vst [vmem:[#allocation66_spill] sm:$0xff] %v3793_v27  ;;  %v1657_v27 = vsel %vm1529_vm9, %v3532_v2, 0.0  ;;  %v2929_v2 = vld [vmem:[%s3436_s11 + $0x1e0] sm:$0xff] }
 0x139   : > { %6162 = vst [vmem:[#allocation36_spill] sm:$0xff] %v3634_v10 }
 0x13a   : > { %6172 = vst [vmem:[#allocation46_spill] sm:$0xff] %v3680_v5 }
 0x13b   : > { %v3735_v49 = vpop.f32.mrf.mxu3  ;;  %6199 = vst [vmem:[#allocation73_spill] sm:$0xff] %v3858_v31 }
 0x13c   : > { %6185 = vst [vmem:[#allocation59_spill] sm:$0xff] %v3735_v49  ;;  %v3786_v6 = vpop.f32.mrf.mxu2 }
 0x13d   : > { %6191 = vst [vmem:[#allocation65_spill] sm:$0xff] %v3786_v6 }
 0x13e   : > { %6200 = vst [vmem:[#allocation74_spill] sm:$0xff] %v3867_v30  ;;  %v3949_v30 = vadd.s32 160, %v3700_v60 }
 0x140   : > { %v3648_v23 = vpop.f32.mrf.mxu0  ;;  %6210 = vst [vmem:[#allocation84_spill] sm:$0xff] %v3949_v30 }
 0x141   : > { %6165 = vst [vmem:[#allocation39_spill] sm:$0xff] %v3648_v23  ;;  %v2991_v28 = vpack.c.bf16 %v3648_v23, %v3634_v10 }
 0x143   : > { %3271 = vst [vmem:[%s3465_s14 + $0x48] sm:$0xff] %v2991_v28   ;;  %v3691_v28 = vpop.f32.mrf.mxu1 }
 0x144   : > { %6176 = vst [vmem:[#allocation50_spill] sm:$0xff] %v3691_v28  ;;  %v3071_v43 = vpack.c.bf16 %v3691_v28, %v3680_v5  ;;  %v3841_v16 = vpop.f32.mrf.mxu2 }
 0x146   : > { %3287 = vst [vmem:[%s3465_s14 + $0xc8] sm:$0xff] %v3071_v43   ;;  %v3725_v43 = vadd.s32 24, %v3700_v60  ;;  %1106 = vmatmul.bf16.gmra.mxu3 %v2929_v2 }
 0x148   : > { %v3659_v38 = vpop.f32.mrf.mxu0  ;;  %6181 = vst [vmem:[#allocation55_spill] sm:$0xff] %v3725_v43  ;;  %vm1523_vm3 = vcmp.lt.s32.totalorder %v3725_v43, %v3720_v53  ;;  %v3788_v43 = vpop.f32.mrf.mxu3 }
 0x149   : > { %6168 = vst [vmem:[#allocation42_spill] sm:$0xff] %v3659_v38  ;;  %v1651_v44 = vsel %vm1523_vm3, %v3478_v36, 0.0 }
 0x14a   : > { %v1778_v36 = vadd.f32 %v1777_v29, %v1651_v44  ;;  %v3196_v29 = vpack.c.bf16 %v3788_v43, %v3735_v49 }
 0x14b   : > { %v3729_v17 = vpop.f32.mrf.mxu1 }
 0x14c   : > { %6183 = vst [vmem:[#allocation57_spill] sm:$0xff] %v3729_v17 }
 0x14d   : > { %3312 = vst [vmem:[%s3465_s14 + $0x190] sm:$0xff] %v3196_v29   ;;  %v1656_v29 = vsel %vm1528_vm8, %v3523_v61, 0.0 }
 0x150   : > { %v3678_v0 = vpop.f32.mrf.mxu0 }
 0x151   : > { %6171 = vst [vmem:[#allocation45_spill] sm:$0xff] %v3678_v0  ;;  %v2996_v9 = vpack.c.bf16 %v3678_v0, %v3659_v38 }
 0x153   : > { %3272 = vst [vmem:[%s3465_s14 + $0x50] sm:$0xff] %v2996_v9   ;;  %v2915_v9 = vld [vmem:[%s3436_s11 + $0x170] sm:$0xff]  ;;  %v3778_v20 = vpop.f32.mrf.mxu1 }
 0x154   : > { %1036 = vmatmul.bf16.gmra.mxu2 %v2915_v9  ;;  %v3742_v9 = vadd.s32 32, %v3700_v60  ;;  %v3076_v59 = vpack.c.bf16 %v3778_v20, %v3729_v17 }
 0x156   : > { %6186 = vst [vmem:[#allocation60_spill] sm:$0xff] %v3742_v9  ;;  %vm1524_vm4 = vcmp.lt.s32.totalorder %v3742_v9, %v3720_v53  ;;  %v3136_v9 = vpack.c.bf16 %v3786_v6, %v3733_v63 }
 0x157   : > { %v1652_v33 = vsel %vm1524_vm4, %v3487_v41, 0.0  ;;  %v2916_v41 = vld [vmem:[%s3436_s11 + $0x178] sm:$0xff]  ;;  %3288 = vst [vmem:[%s3465_s14 + $0xd0] sm:$0xff] %v3076_v59  }
 0x158   : > { %v3689_v22 = vpop.f32.mrf.mxu0  ;;  %v1779_v44 = vadd.f32 %v1778_v36, %v1652_v33  ;;  %3300 = vst [vmem:[%s3465_s14 + $0x130] sm:$0xff] %v3136_v9   ;;  %v3820_v33 = vadd.s32 80, %v3700_v60  ;;  %v1655_v36 = vsel %vm1527_vm7, %v3514_v56, 0.0 }
 0x159   : > { %6175 = vst [vmem:[#allocation49_spill] sm:$0xff] %v3689_v22 }
 0x15a   : > { %v1780_v59 = vadd.f32 %v1779_v44, %v1653_v39  ;;  %6194 = vst [vmem:[#allocation68_spill] sm:$0xff] %v3820_v33  ;;  %vm1530_vm10 = vcmp.lt.s32.totalorder %v3820_v33, %v3720_v53 }
 0x15b   : > { %v3833_v50 = vpop.f32.mrf.mxu1 }
 0x15c   : > { %6197 = vst [vmem:[#allocation71_spill] sm:$0xff] %v3833_v50 }
 0x160   : > { %v3727_v58 = vpop.f32.mrf.mxu0 }
 0x161   : > { %6182 = vst [vmem:[#allocation56_spill] sm:$0xff] %v3727_v58  ;;  %v3001_v32 = vpack.c.bf16 %v3727_v58, %v3689_v22 }
 0x163   : > { %3273 = vst [vmem:[%s3465_s14 + $0x58] sm:$0xff] %v3001_v32   ;;  %v3765_v32 = vadd.s32 48, %v3700_v60 }
 0x164   : > { %1041 = vmatmul.bf16.gmra.mxu2 %v2916_v41  ;;  %v3829_v41 = vadd.s32 88, %v3700_v60 }
 0x165   : > { %6188 = vst [vmem:[#allocation62_spill] sm:$0xff] %v3765_v32  ;;  %vm1526_vm6 = vcmp.lt.s32.totalorder %v3765_v32, %v3720_v53  ;;  %v3848_v32 = vadd.s32 96, %v3700_v60 }
 0x166   : > { %v1654_v6 = vsel %vm1526_vm6, %v3505_v51, 0.0  ;;  %6195 = vst [vmem:[#allocation69_spill] sm:$0xff] %v3829_v41  ;;  %vm1531_vm11 = vcmp.lt.s32.totalorder %v3829_v41, %v3720_v53  ;;  %v1662_v51 = vsel %vm5848_vm14, %v3586_v34, 0.0 }
 0x167   : > { %v1781_v9 = vadd.f32 %v1780_v59, %v1654_v6  ;;  %v3843_v6 = vpop.f32.mrf.mxu3  ;;  %6198 = vst [vmem:[#allocation72_spill] sm:$0xff] %v3848_v32  ;;  %vm5838_vm12 = vcmp.lt.s32.totalorder %v3848_v32, %v3720_v53 }
 0x168   : > { %v3776_v14 = vpop.f32.mrf.mxu0  ;;  %v1660_v33 = vsel %vm5838_vm12, %v3561_v18, 0.0  ;;  %v1661_v18 = vsel %vm5837_vm13, %v3575_v25, 0.0 }
 0x169   : > { %6190 = vst [vmem:[#allocation64_spill] sm:$0xff] %v3776_v14  ;;  %v1782_v59 = vadd.f32 %v1781_v9, %v1655_v36  ;;  %v1658_v36 = vsel %vm1530_vm10, %v3541_v7, 0.0  ;;  %v3895_v7 = vadd.s32 128, %v3700_v60 }
 0x16b   : > { %v1783_v61 = vadd.f32 %v1782_v59, %v1656_v29  ;;  %v1659_v29 = vsel %vm1531_vm11, %v3550_v12, 0.0  ;;  %v3876_v59 = vadd.s32 120, %v3700_v60  ;;  %6204 = vst [vmem:[#allocation78_spill] sm:$0xff] %v3895_v7  ;;  %vm5844_vm13 = vcmp.lt.s32.totalorder %v3895_v7, %v3720_v53 }
 0x16d   : > { %v1784_v9 = vadd.f32 %v1783_v61, %v1657_v27  ;;  %6201 = vst [vmem:[#allocation75_spill] sm:$0xff] %v3876_v59  ;;  %v3880_v61 = vpop.f32.mrf.mxu1  ;;  %vm5840_vm15 = vcmp.lt.s32.totalorder %v3876_v59, %v3720_v53 }
 0x16e   : > { %6203 = vst [vmem:[#allocation77_spill] sm:$0xff] %v3880_v61  ;;  %v3081_v41 = vpack.c.bf16 %v3880_v61, %v3833_v50 }
 0x170   : > { %v3831_v39 = vpop.f32.mrf.mxu0  ;;  %3289 = vst [vmem:[%s3465_s14 + $0xd8] sm:$0xff] %v3081_v41   ;;  %v1664_v41 = vsel %vm5844_vm13, %v3610_v54, 0.0 }
 0x171   : > { %6196 = vst [vmem:[#allocation70_spill] sm:$0xff] %v3831_v39  ;;  %v3006_v44 = vpack.c.bf16 %v3831_v39, %v3776_v14 }
 0x173   : > { %3274 = vst [vmem:[%s3465_s14 + $0x60] sm:$0xff] %v3006_v44   ;;  %v1785_v44 = vadd.f32 %v1784_v9, %v1658_v36  ;;  %v3888_v36 = vpop.f32.mrf.mxu2  ;;  %v3890_v9 = vpop.f32.mrf.mxu3 }
 0x174   : > { %v3141_v32 = vpack.c.bf16 %v3888_v36, %v3841_v16  ;;  %v3201_v56 = vpack.c.bf16 %v3890_v9, %v3843_v6 }
 0x175   : > { %v1786_v12 = vadd.f32 %v1785_v44, %v1659_v29  ;;  %v3910_v44 = vadd.s32 136, %v3700_v60 }
 0x176   : > { %3301 = vst [vmem:[%s3465_s14 + $0x138] sm:$0xff] %v3141_v32   ;;  %v1663_v32 = vsel %vm5840_vm15, %v3600_v45, 0.0  ;;  %v3959_v45 = vadd.s32 168, %v3700_v60 }
 0x177   : > { %v1787_v29 = vadd.f32 %v1786_v12, %v1660_v33  ;;  %6205 = vst [vmem:[#allocation79_spill] sm:$0xff] %v3910_v44  ;;  %v3921_v12 = vadd.s32 144, %v3700_v60  ;;  %vm5847_vm12 = vcmp.lt.s32.totalorder %v3910_v44, %v3720_v53  ;;  %v3994_v44 = vadd.s32 192, %v3700_v60 }
 0x178   : > { %v3878_v27 = vpop.f32.mrf.mxu0  ;;  %3313 = vst [vmem:[%s3465_s14 + $0x198] sm:$0xff] %v3201_v56   ;;  %v3930_v56 = vadd.s32 152, %v3700_v60  ;;  %v1665_v7 = vsel %vm5847_vm12, %v3624_v1, 0.0  ;;  %vm5858_vm12 = vcmp.lt.s32.totalorder %v3949_v30, %v3720_v53  ;;  %vm5861_vm14 = vcmp.lt.s32.totalorder %v3959_v45, %v3720_v53  ;;  %v2930_v1 = vld [vmem:[%s3436_s11 + $0x1e8] sm:$0xff] }
 0x179   : > { %6202 = vst [vmem:[#allocation76_spill] sm:$0xff] %v3878_v27  ;;  %v1788_v31 = vadd.f32 %v1787_v29, %v1661_v18  ;;  %v3934_v18 = vpop.f32.mrf.mxu1  ;;  %vm5872_vm15 = vcmp.lt.s32.totalorder %v3921_v12, %v3720_v53  ;;  %1111 = vmatmul.bf16.gmra.mxu3 %v2930_v1 }
 0x17a   : > { %6206 = vst [vmem:[#allocation80_spill] sm:$0xff] %v3921_v12  ;;  %vm5850_vm13 = vcmp.lt.s32.totalorder %v3930_v56, %v3720_v53 }
 0x17b   : > { %v1789_v33 = vadd.f32 %v1788_v31, %v1662_v51  ;;  %6207 = vst [vmem:[#allocation81_spill] sm:$0xff] %v3930_v56  ;;  %v3942_v59 = vpop.f32.mrf.mxu2  ;;  %v3944_v51 = vpop.f32.mrf.mxu3 }
 0x17c   : > { %6209 = vst [vmem:[#allocation83_spill] sm:$0xff] %v3934_v18 }
 0x17d   : > { %v1790_v31 = vadd.f32 %v1789_v33, %v1663_v32  ;;  %6211 = vst [vmem:[#allocation85_spill] sm:$0xff] %v3959_v45  ;;  %v1666_v32 = vsel %vm5872_vm15, %v3634_v10, 0.0  ;;  %v3966_v33 = vadd.s32 176, %v3700_v60 }
 0x17e   : > { %6218 = vst [vmem:[#allocation92_spill] sm:$0xff] %v3994_v44 }
 0x17f   : > { %v1791_v54 = vadd.f32 %v1790_v31, %v1664_v41  ;;  %6212 = vst [vmem:[#allocation86_spill] sm:$0xff] %v3966_v33  ;;  %v1667_v41 = vsel %vm5850_vm13, %v3648_v23, 0.0  ;;  %v3977_v31 = vadd.s32 184, %v3700_v60  ;;  %vm5862_vm13 = vcmp.lt.s32.totalorder %v3966_v33, %v3720_v53 }
 0x180   : > { %v3932_v2 = vpop.f32.mrf.mxu0  ;;  %v1670_v25 = vsel %vm5862_vm13, %v3689_v22, 0.0  ;;  %v4050_v33 = vadd.s32 224, %v3700_v60 }
 0x181   : > { %6208 = vst [vmem:[#allocation82_spill] sm:$0xff] %v3932_v2  ;;  %v3011_v29 = vpack.c.bf16 %v3932_v2, %v3878_v27  ;;  %v1792_v34 = vadd.f32 %v1791_v54, %v1665_v7  ;;  %v3981_v7 = vpop.f32.mrf.mxu1  ;;  %v1668_v54 = vsel %vm5858_vm12, %v3659_v38, 0.0  ;;  %v1669_v38 = vsel %vm5861_vm14, %v3678_v0, 0.0 }
 0x182   : > { %6213 = vst [vmem:[#allocation87_spill] sm:$0xff] %v3977_v31  ;;  %v3086_v23 = vpack.c.bf16 %v3981_v7, %v3934_v18  ;;  %vm5864_vm12 = vcmp.lt.s32.totalorder %v3977_v31, %v3720_v53  ;;  %vm5868_vm14 = vcmp.lt.s32.totalorder %v3994_v44, %v3720_v53  ;;  %v4115_v0 = vadd.s32 264, %v3700_v60 }
 0x183   : > { %3275 = vst [vmem:[%s3465_s14 + $0x68] sm:$0xff] %v3011_v29   ;;  %v1793_v29 = vadd.f32 %v1792_v34, %v1666_v32  ;;  %v3989_v34 = vpop.f32.mrf.mxu2  ;;  %v3991_v32 = vpop.f32.mrf.mxu3 }
 0x184   : > { %6215 = vst [vmem:[#allocation89_spill] sm:$0xff] %v3981_v7  ;;  %v3146_v30 = vpack.c.bf16 %v3989_v34, %v3942_v59  ;;  %v3206_v10 = vpack.c.bf16 %v3991_v32, %v3944_v51 }
 0x185   : > { %6216 = vst [vmem:[#allocation90_spill] sm:$0xff] %v3989_v34  ;;  %v1794_v56 = vadd.f32 %v1793_v29, %v1667_v41  ;;  %v4010_v29 = vadd.s32 200, %v3700_v60 }
 0x186   : > { %6217 = vst [vmem:[#allocation91_spill] sm:$0xff] %v3991_v32 }
 0x187   : > { %v1795_v41 = vadd.f32 %v1794_v56, %v1668_v54  ;;  %6219 = vst [vmem:[#allocation93_spill] sm:$0xff] %v4010_v29  ;;  %v4021_v56 = vadd.s32 208, %v3700_v60  ;;  %vm5871_vm13 = vcmp.lt.s32.totalorder %v4010_v29, %v3720_v53 }
 0x188   : > { %v3979_v12 = vpop.f32.mrf.mxu0  ;;  %3290 = vst [vmem:[%s3465_s14 + $0xe0] sm:$0xff] %v3086_v23   ;;  %v1671_v23 = vsel %vm5864_vm12, %v3727_v58, 0.0  ;;  %v1673_v44 = vsel %vm5871_vm13, %v3831_v39, 0.0  ;;  %v4060_v58 = vadd.s32 232, %v3700_v60  ;;  %vm5885_vm13 = vcmp.lt.s32.totalorder %v4050_v33, %v3720_v53 }
 0x189   : > { %6214 = vst [vmem:[#allocation88_spill] sm:$0xff] %v3979_v12  ;;  %v1796_v45 = vadd.f32 %v1795_v41, %v1669_v38  ;;  %v4035_v38 = vpop.f32.mrf.mxu1  ;;  %vm5874_vm12 = vcmp.lt.s32.totalorder %v4021_v56, %v3720_v53 }
 0x18a   : > { %3302 = vst [vmem:[%s3465_s14 + $0x140] sm:$0xff] %v3146_v30   ;;  %v4031_v30 = vadd.s32 216, %v3700_v60  ;;  %vm5884_vm15 = vcmp.lt.s32.totalorder %v4060_v58, %v3720_v53 }
 0x18b   : > { %6220 = vst [vmem:[#allocation94_spill] sm:$0xff] %v4021_v56  ;;  %v1797_v54 = vadd.f32 %v1796_v45, %v1670_v25  ;;  %v4043_v31 = vpop.f32.mrf.mxu2  ;;  %v4045_v25 = vpop.f32.mrf.mxu3 }
 0x18c   : > { %3314 = vst [vmem:[%s3465_s14 + $0x1a0] sm:$0xff] %v3206_v10   ;;  %v1672_v10 = vsel %vm5868_vm14, %v3776_v14, 0.0  ;;  %vm5892_vm14 = vcmp.lt.s32.totalorder %v4031_v30, %v3720_v53 }
 0x18d   : > { %6221 = vst [vmem:[#allocation95_spill] sm:$0xff] %v4031_v30  ;;  %v1798_v45 = vadd.f32 %v1797_v54, %v1671_v23  ;;  %v1674_v23 = vsel %vm5874_vm12, %v3878_v27, 0.0  ;;  %v4067_v54 = vadd.s32 240, %v3700_v60  ;;  %v4092_v30 = vadd.s32 248, %v3700_v60  ;;  %v2931_v27 = vld [vmem:[%s3436_s11 + $0x1f0] sm:$0xff] }
 0x18e   : > { %6222 = vst [vmem:[#allocation96_spill] sm:$0xff] %v4035_v38  ;;  %1116 = vmatmul.bf16.gmra.mxu3 %v2931_v27 }
 0x18f   : > { %6223 = vst [vmem:[#allocation97_spill] sm:$0xff] %v4050_v33  ;;  %v1799_v14 = vadd.f32 %v1798_v45, %v1672_v10  ;;  %v1675_v10 = vsel %vm5892_vm14, %v3932_v2, 0.0  ;;  %vm5886_vm12 = vcmp.lt.s32.totalorder %v4067_v54, %v3720_v53 }
 0x190   : > { %v4033_v1 = vpop.f32.mrf.mxu0  ;;  %6224 = vst [vmem:[#allocation98_spill] sm:$0xff] %v4060_v58 }
 0x191   : > { %v3016_v41 = vpack.c.bf16 %v4033_v1, %v3979_v12  ;;  %6225 = vst [vmem:[#allocation99_spill] sm:$0xff] %v4067_v54  ;;  %v1800_v22 = vadd.f32 %v1799_v14, %v1673_v44  ;;  %v4079_v56 = vpop.f32.mrf.mxu1  ;;  %v1676_v14 = vsel %vm5885_vm13, %v3979_v12, 0.0  ;;  %v1677_v12 = vsel %vm5884_vm15, %v4033_v1, 0.0 }
 0x192   : > { %6227 = vst [vmem:[#allocation101_spill] sm:$0xff] %v4079_v56  ;;  %v3091_v29 = vpack.c.bf16 %v4079_v56, %v4035_v38  ;;  %vm5888_vm15 = vcmp.lt.s32.totalorder %v4092_v30, %v3720_v53 }
 0x193   : > { %3276 = vst [vmem:[%s3465_s14 + $0x70] sm:$0xff] %v3016_v41   ;;  %v1801_v41 = vadd.f32 %v1800_v22, %v1674_v23  ;;  %v4087_v44 = vpop.f32.mrf.mxu2  ;;  %v4089_v22 = vpop.f32.mrf.mxu3 }
 0x194   : > { %6228 = vst [vmem:[#allocation102_spill] sm:$0xff] %v4092_v30  ;;  %v3151_v33 = vpack.c.bf16 %v4087_v44, %v4043_v31  ;;  %v3211_v2 = vpack.c.bf16 %v4089_v22, %v4045_v25  ;;  %v4152_v30 = vadd.s32 288, %v3700_v60 }
 0x195   : > { %v1802_v23 = vadd.f32 %v1801_v41, %v1675_v10  ;;  %v4106_v10 = vadd.s32 256, %v3700_v60  ;;  %3291 = vst [vmem:[%s3465_s14 + $0xe8] sm:$0xff] %v3091_v29   ;;  %v4123_v29 = vadd.s32 272, %v3700_v60 }
 0x196   : > { %3303 = vst [vmem:[%s3465_s14 + $0x148] sm:$0xff] %v3151_v33  }
 0x197   : > { %6229 = vst [vmem:[#allocation103_spill] sm:$0xff] %v4106_v10  ;;  %v1803_v41 = vadd.f32 %v1802_v23, %v1676_v14  ;;  %vm5893_vm13 = vcmp.lt.s32.totalorder %v4106_v10, %v3720_v53 }
 0x198   : > { %v4077_v45 = vpop.f32.mrf.mxu0  ;;  %6230 = vst [vmem:[#allocation104_spill] sm:$0xff] %v4115_v0  ;;  %v1680_v54 = vsel %vm5893_vm13, %v3480_v37, 0.0  ;;  %vm5904_vm13 = vcmp.lt.s32.totalorder %v4152_v30, %v3720_v53  ;;  %v4202_v37 = vadd.s32 320, %v3700_v60 }
 0x199   : > { %6226 = vst [vmem:[#allocation100_spill] sm:$0xff] %v4077_v45  ;;  %v1678_v39 = vsel %vm5886_vm12, %v4077_v45, 0.0  ;;  %v1804_v58 = vadd.f32 %v1803_v41, %v1677_v12  ;;  %v4127_v33 = vpop.f32.mrf.mxu1  ;;  %vm5906_vm12 = vcmp.lt.s32.totalorder %v4115_v0, %v3720_v53 }
 0x19a   : > { %3315 = vst [vmem:[%s3465_s14 + $0x1a8] sm:$0xff] %v3211_v2  }
 0x19b   : > { %6231 = vst [vmem:[#allocation105_spill] sm:$0xff] %v4123_v29  ;;  %v1805_v14 = vadd.f32 %v1804_v58, %v1678_v39  ;;  %v4135_v2 = vpop.f32.mrf.mxu2  ;;  %v4137_v41 = vpop.f32.mrf.mxu3  ;;  %v4142_v58 = vadd.s32 280, %v3700_v60 }
 0x19c   : > { %6233 = vst [vmem:[#allocation107_spill] sm:$0xff] %v4127_v33 }
 0x19d   : > { %6234 = vst [vmem:[#allocation108_spill] sm:$0xff] %v4137_v41  ;;  %vm5902_vm14 = vcmp.lt.s32.totalorder %v4142_v58, %v3720_v53 }
 0x19e   : > { %6235 = vst [vmem:[#allocation109_spill] sm:$0xff] %v4142_v58 }
 0x19f   : > { %6236 = vst [vmem:[#allocation110_spill] sm:$0xff] %v4152_v30 }
 0x1a0   : > { %v4125_v23 = vpop.f32.mrf.mxu0  ;;  %6241 = vst [vmem:[#allocation115_spill] sm:$0xff] %v4202_v37 }
 0x1a1   : > { %6232 = vst [vmem:[#allocation106_spill] sm:$0xff] %v4125_v23  ;;  %v3021_v27 = vpack.c.bf16 %v4125_v23, %v4077_v45  ;;  %v1679_v12 = vsel %vm5888_vm15, %v4125_v23, 0.0  ;;  %vm5897_vm15 = vcmp.lt.s32.totalorder %v4123_v29, %v3720_v53  ;;  %v1681_v45 = vsel %vm5906_vm12, %v3489_v42, 0.0  ;;  %v4172_v0 = vpop.f32.mrf.mxu1  ;;  %v2932_v42 = vld [vmem:[%s3436_s11 + $0x1f8] sm:$0xff] }
 0x1a2   : > { %v1806_v39 = vadd.f32 %v1805_v14, %v1679_v12  ;;  %v4161_v14 = vadd.s32 296, %v3700_v60  ;;  %v1682_v12 = vsel %vm5897_vm15, %v3498_v47, 0.0  ;;  %6239 = vst [vmem:[#allocation113_spill] sm:$0xff] %v4172_v0  ;;  %1121 = vmatmul.bf16.gmra.mxu3 %v2932_v42  ;;  %vm5915_vm12 = vcmp.lt.s32.totalorder %v4202_v37, %v3720_v53 }
 0x1a3   : > { %3277 = vst [vmem:[%s3465_s14 + $0x78] sm:$0xff] %v3021_v27   ;;  %v4180_v29 = vpop.f32.mrf.mxu2  ;;  %v4182_v10 = vpop.f32.mrf.mxu3 }
 0x1a4   : > { %v1807_v23 = vadd.f32 %v1806_v39, %v1680_v54  ;;  %6237 = vst [vmem:[#allocation111_spill] sm:$0xff] %v4161_v14  ;;  %v4170_v54 = vadd.s32 304, %v3700_v60  ;;  %vm5910_vm15 = vcmp.lt.s32.totalorder %v4161_v14, %v3720_v53  ;;  %v3156_v58 = vpack.c.bf16 %v4180_v29, %v4135_v2 }
 0x1a5   : > { %v3216_v47 = vpack.c.bf16 %v4182_v10, %v4137_v41 }
 0x1a6   : > { %v1808_v27 = vadd.f32 %v1807_v23, %v1681_v45  ;;  %6238 = vst [vmem:[#allocation112_spill] sm:$0xff] %v4170_v54  ;;  %v1683_v45 = vsel %vm5902_vm14, %v3507_v52, 0.0  ;;  %v3096_v23 = vpack.c.bf16 %v4172_v0, %v4127_v33  ;;  %v1684_v52 = vsel %vm5904_vm13, %v3516_v57, 0.0 }
 0x1a7   : > { %vm5907_vm14 = vcmp.lt.s32.totalorder %v4170_v54, %v3720_v53  ;;  %3304 = vst [vmem:[%s3465_s14 + $0x150] sm:$0xff] %v3156_v58   ;;  %v4222_v58 = vadd.s32 336, %v3700_v60  ;;  %v4237_v54 = vadd.s32 344, %v3700_v60 }
 0x1a8   : > { %v1809_v39 = vadd.f32 %v1808_v27, %v1682_v12  ;;  %v4187_v27 = vadd.s32 312, %v3700_v60  ;;  %3292 = vst [vmem:[%s3465_s14 + $0xf0] sm:$0xff] %v3096_v23   ;;  %v4213_v23 = vadd.s32 328, %v3700_v60 }
 0x1a9   : > { %3316 = vst [vmem:[%s3465_s14 + $0x1b0] sm:$0xff] %v3216_v47   ;;  %v4224_v42 = vpop.f32.mrf.mxu1 }
 0x1aa   : > { %6240 = vst [vmem:[#allocation114_spill] sm:$0xff] %v4187_v27  ;;  %v1810_v12 = vadd.f32 %v1809_v39, %v1683_v45  ;;  %v1685_v45 = vsel %vm5910_vm15, %v3525_v62, 0.0  ;;  %vm5913_vm13 = vcmp.lt.s32.totalorder %v4187_v27, %v3720_v53  ;;  %vm5919_vm15 = vcmp.lt.s32.totalorder %v4222_v58, %v3720_v53 }
 0x1ab   : > { %6242 = vst [vmem:[#allocation116_spill] sm:$0xff] %v4213_v23  ;;  %v1690_v37 = vsel %vm5919_vm15, %v3577_v26, 0.0 }
 0x1ac   : > { %v1811_v39 = vadd.f32 %v1810_v12, %v1684_v52  ;;  %v1686_v52 = vsel %vm5907_vm14, %v3534_v3, 0.0  ;;  %6243 = vst [vmem:[#allocation117_spill] sm:$0xff] %v4222_v58  ;;  %v1687_v12 = vsel %vm5913_vm13, %v3543_v8, 0.0  ;;  %vm5928_vm14 = vcmp.lt.s32.totalorder %v4213_v23, %v3720_v53 }
 0x1ad   : > { %6244 = vst [vmem:[#allocation118_spill] sm:$0xff] %v4224_v42  ;;  %v1689_v8 = vsel %vm5928_vm14, %v3563_v19, 0.0  ;;  %vm5923_vm13 = vcmp.lt.s32.totalorder %v4237_v54, %v3720_v53 }
 0x1ae   : > { %v1812_v30 = vadd.f32 %v1811_v39, %v1685_v45  ;;  %v4230_v39 = vpop.f32.mrf.mxu2  ;;  %v4232_v45 = vpop.f32.mrf.mxu3  ;;  %6245 = vst [vmem:[#allocation119_spill] sm:$0xff] %v4237_v54 }
 0x1b0   : > { %v1813_v47 = vadd.f32 %v1812_v30, %v1686_v52  ;;  %v1688_v30 = vsel %vm5915_vm12, %v3552_v13, 0.0  ;;  %v4246_v52 = vadd.s32 352, %v3700_v60  ;;  %v4295_v13 = vadd.s32 384, %v3700_v60 }
 0x1b1   : > { %v4266_v23 = vpop.f32.mrf.mxu1 }
 0x1b2   : > { %v1814_v14 = vadd.f32 %v1813_v47, %v1687_v12  ;;  %6246 = vst [vmem:[#allocation120_spill] sm:$0xff] %v4246_v52  ;;  %v4255_v47 = vadd.s32 360, %v3700_v60  ;;  %vm5926_vm12 = vcmp.lt.s32.totalorder %v4246_v52, %v3720_v53  ;;  %vm5936_vm14 = vcmp.lt.s32.totalorder %v4295_v13, %v3720_v53 }
 0x1b3   : > { %6249 = vst [vmem:[#allocation123_spill] sm:$0xff] %v4266_v23  ;;  %v1692_v54 = vsel %vm5926_vm12, %v3602_v48, 0.0 }
 0x1b4   : > { %v1815_v27 = vadd.f32 %v1814_v14, %v1688_v30  ;;  %6247 = vst [vmem:[#allocation121_spill] sm:$0xff] %v4255_v47  ;;  %v4264_v14 = vadd.s32 368, %v3700_v60  ;;  %vm5929_vm15 = vcmp.lt.s32.totalorder %v4255_v47, %v3720_v53 }
 0x1b5   : > { %6251 = vst [vmem:[#allocation125_spill] sm:$0xff] %v4295_v13 }
 0x1b6   : > { %v1816_v12 = vadd.f32 %v1815_v27, %v1689_v8  ;;  %6248 = vst [vmem:[#allocation122_spill] sm:$0xff] %v4264_v14  ;;  %v1691_v8 = vsel %vm5923_vm13, %v3588_v35, 0.0  ;;  %v3101_v27 = vpack.c.bf16 %v4266_v23, %v4224_v42  ;;  %v4274_v58 = vpop.f32.mrf.mxu2  ;;  %v4276_v26 = vpop.f32.mrf.mxu3  ;;  %vm5931_vm13 = vcmp.lt.s32.totalorder %v4264_v14, %v3720_v53 }
 0x1b7   : > { %v3161_v19 = vpack.c.bf16 %v4274_v58, %v4230_v39  ;;  %v3221_v35 = vpack.c.bf16 %v4276_v26, %v4232_v45  ;;  %v1694_v52 = vsel %vm5931_vm13, %v3626_v4, 0.0 }
 0x1b8   : > { %v1817_v30 = vadd.f32 %v1816_v12, %v1690_v37  ;;  %v4281_v37 = vadd.s32 376, %v3700_v60  ;;  %3293 = vst [vmem:[%s3465_s14 + $0xf8] sm:$0xff] %v3101_v27  }
 0x1b9   : > { %3305 = vst [vmem:[%s3465_s14 + $0x158] sm:$0xff] %v3161_v19   ;;  %v4315_v19 = vadd.s32 400, %v3700_v60 }
 0x1ba   : > { %6250 = vst [vmem:[#allocation124_spill] sm:$0xff] %v4281_v37  ;;  %v1818_v12 = vadd.f32 %v1817_v30, %v1691_v8  ;;  %v1693_v30 = vsel %vm5929_vm15, %v3612_v55, 0.0  ;;  %vm5935_vm12 = vcmp.lt.s32.totalorder %v4281_v37, %v3720_v53  ;;  %v4306_v8 = vadd.s32 392, %v3700_v60 }
 0x1bb   : > { %3317 = vst [vmem:[%s3465_s14 + $0x1b8] sm:$0xff] %v3221_v35   ;;  %v1695_v35 = vsel %vm5935_vm12, %v3636_v11, 0.0  ;;  %vm5945_vm13 = vcmp.lt.s32.totalorder %v4315_v19, %v3720_v53  ;;  %v4344_v11 = vadd.s32 424, %v3700_v60 }
 0x1bc   : > { %v1819_v3 = vadd.f32 %v1818_v12, %v1692_v54  ;;  %6252 = vst [vmem:[#allocation126_spill] sm:$0xff] %v4306_v8  ;;  %vm5938_vm15 = vcmp.lt.s32.totalorder %v4306_v8, %v3720_v53 }
 0x1bd   : > { %6253 = vst [vmem:[#allocation127_spill] sm:$0xff] %v4315_v19  ;;  %v1697_v47 = vsel %vm5938_vm15, %v3661_v40, 0.0  ;;  %vm5954_vm15 = vcmp.lt.s32.totalorder %v4344_v11, %v3720_v53  ;;  %v4368_v19 = vadd.s32 440, %v3700_v60 }
 0x1be   : > { %v1820_v27 = vadd.f32 %v1819_v3, %v1693_v30  ;;  %v4321_v12 = vpop.f32.mrf.mxu2  ;;  %v4323_v3 = vpop.f32.mrf.mxu3  ;;  %v4328_v30 = vadd.s32 408, %v3700_v60  ;;  %6256 = vst [vmem:[#allocation130_spill] sm:$0xff] %v4344_v11 }
 0x1bf   : > { %6259 = vst [vmem:[#allocation133_spill] sm:$0xff] %v4368_v19 }
 0x1c0   : > { %v1821_v54 = vadd.f32 %v1820_v27, %v1694_v52  ;;  %6254 = vst [vmem:[#allocation128_spill] sm:$0xff] %v4328_v30  ;;  %v1696_v52 = vsel %vm5936_vm14, %v3650_v24, 0.0  ;;  %v4337_v27 = vadd.s32 416, %v3700_v60  ;;  %vm5942_vm12 = vcmp.lt.s32.totalorder %v4328_v30, %v3720_v53 }
 0x1c1   : > { %v1699_v8 = vsel %vm5942_vm12, %v3691_v28, 0.0  ;;  %v4381_v30 = vadd.s32 448, %v3700_v60 }
 0x1c2   : > { %v1822_v14 = vadd.f32 %v1821_v54, %v1695_v35  ;;  %6255 = vst [vmem:[#allocation129_spill] sm:$0xff] %v4337_v27  ;;  %v1698_v35 = vsel %vm5945_vm13, %v3680_v5, 0.0  ;;  %vm5948_vm14 = vcmp.lt.s32.totalorder %v4337_v27, %v3720_v53  ;;  %vm5951_vm13 = vcmp.lt.s32.totalorder %v4368_v19, %v3720_v53 }
 0x1c3   : > { %6260 = vst [vmem:[#allocation134_spill] sm:$0xff] %v4381_v30  ;;  %v4392_v27 = vadd.s32 456, %v3700_v60  ;;  %v4423_v19 = vadd.s32 480, %v3700_v60 }
 0x1c4   : > { %v1823_v37 = vadd.f32 %v1822_v14, %v1696_v52  ;;  %v4355_v14 = vadd.s32 432, %v3700_v60 }
 0x1c5   : > { %6261 = vst [vmem:[#allocation135_spill] sm:$0xff] %v4392_v27 }
 0x1c6   : > { %v1824_v54 = vadd.f32 %v1823_v37, %v1697_v47  ;;  %6257 = vst [vmem:[#allocation131_spill] sm:$0xff] %v4355_v14  ;;  %v4363_v47 = vpop.f32.mrf.mxu2  ;;  %v4365_v37 = vpop.f32.mrf.mxu3  ;;  %vm5949_vm12 = vcmp.lt.s32.totalorder %v4355_v14, %v3720_v53  ;;  %v4414_v14 = vadd.s32 472, %v3700_v60 }
 0x1c7   : > { %6258 = vst [vmem:[#allocation132_spill] sm:$0xff] %v4363_v47  ;;  %v3166_v5 = vpack.c.bf16 %v4363_v47, %v4321_v12 }
 0x1c8   : > { %v1825_v52 = vadd.f32 %v1824_v54, %v1698_v35  ;;  %v3226_v54 = vpack.c.bf16 %v4365_v37, %v4323_v3  ;;  %v1700_v35 = vsel %vm5948_vm14, %v3729_v17, 0.0  ;;  %v1702_v17 = vsel %vm5949_vm12, %v3833_v50, 0.0  ;;  %6264 = vst [vmem:[#allocation138_spill] sm:$0xff] %v4414_v14 }
 0x1c9   : > { %3306 = vst [vmem:[%s3465_s14 + $0x160] sm:$0xff] %v3166_v5   ;;  %vm5955_vm14 = vcmp.lt.s32.totalorder %v4381_v30, %v3720_v53  ;;  %v4401_v5 = vadd.s32 464, %v3700_v60  ;;  %vm5957_vm12 = vcmp.lt.s32.totalorder %v4392_v27, %v3720_v53  ;;  %v4441_v27 = vadd.s32 496, %v3700_v60 }
 0x1ca   : > { %v1826_v13 = vadd.f32 %v1825_v52, %v1699_v8  ;;  %v1701_v8 = vsel %vm5954_vm15, %v3778_v20, 0.0  ;;  %3318 = vst [vmem:[%s3465_s14 + $0x1c0] sm:$0xff] %v3226_v54   ;;  %vm5964_vm15 = vcmp.lt.s32.totalorder %v4414_v14, %v3720_v53 }
 0x1cb   : > { %6262 = vst [vmem:[#allocation136_spill] sm:$0xff] %v4401_v5 }
 0x1cc   : > { %v1827_v28 = vadd.f32 %v1826_v13, %v1700_v35  ;;  %6265 = vst [vmem:[#allocation139_spill] sm:$0xff] %v4423_v19 }
 0x1cd   : > { %6267 = vst [vmem:[#allocation141_spill] sm:$0xff] %v4441_v27 }
 0x1ce   : > { %v1828_v52 = vadd.f32 %v1827_v28, %v1701_v8  ;;  %v1703_v28 = vsel %vm5951_vm13, %v3880_v61, 0.0  ;;  %v4407_v54 = vpop.f32.mrf.mxu2  ;;  %v4409_v35 = vpop.f32.mrf.mxu3  ;;  %vm5967_vm13 = vcmp.lt.s32.totalorder %v4401_v5, %v3720_v53  ;;  %v4602_v61 = vadd.s32 616, %v3700_v60 }
 0x1cf   : > { %6263 = vst [vmem:[#allocation137_spill] sm:$0xff] %v4407_v54 }
 0x1d0   : > { %v1829_v13 = vadd.f32 %v1828_v52, %v1702_v17  ;;  %v1704_v17 = vsel %vm5955_vm14, %v3934_v18, 0.0  ;;  %vm5966_vm14 = vcmp.lt.s32.totalorder %v4423_v19, %v3720_v53  ;;  %v4516_v19 = vadd.s32 552, %v3700_v60 }
 0x1d1   : > { %v1708_v14 = vsel %vm5966_vm14, %v4127_v33, 0.0 }
 0x1d2   : > { %v1830_v8 = vadd.f32 %v1829_v13, %v1703_v28  ;;  %v1705_v13 = vsel %vm5957_vm12, %v3981_v7, 0.0  ;;  %v4430_v28 = vadd.s32 488, %v3700_v60  ;;  %6275 = vst [vmem:[#allocation149_spill] sm:$0xff] %v4516_v19 }
 0x1d4   : > { %v1831_v52 = vadd.f32 %v1830_v8, %v1704_v17  ;;  %6266 = vst [vmem:[#allocation140_spill] sm:$0xff] %v4430_v28  ;;  %v1706_v8 = vsel %vm5967_vm13, %v4035_v38, 0.0  ;;  %vm5968_vm12 = vcmp.lt.s32.totalorder %v4430_v28, %v3720_v53 }
 0x1d6   : > { %v1832_v11 = vadd.f32 %v1831_v52, %v1705_v13  ;;  %v1707_v52 = vsel %vm5964_vm15, %v4079_v56, 0.0  ;;  %v4449_v13 = vpop.f32.mrf.mxu2  ;;  %v4451_v5 = vpop.f32.mrf.mxu3  ;;  %v4465_v56 = vadd.s32 512, %v3700_v60  ;;  %vm5971_vm15 = vcmp.lt.s32.totalorder %v4441_v27, %v3720_v53 }
 0x1d7   : > { %6268 = vst [vmem:[#allocation142_spill] sm:$0xff] %v4449_v13  ;;  %v3171_v30 = vpack.c.bf16 %v4449_v13, %v4407_v54  ;;  %v3231_v38 = vpack.c.bf16 %v4451_v5, %v4409_v35  ;;  %v4500_v27 = vadd.s32 536, %v3700_v60 }
 0x1d8   : > { %v1833_v17 = vadd.f32 %v1832_v11, %v1706_v8  ;;  %v4454_v8 = vadd.s32 504, %v3700_v60  ;;  %6270 = vst [vmem:[#allocation144_spill] sm:$0xff] %v4465_v56  ;;  %vm5977_vm13 = vcmp.lt.s32.totalorder %v4465_v56, %v3720_v53 }
 0x1d9   : > { %3307 = vst [vmem:[%s3465_s14 + $0x168] sm:$0xff] %v3171_v30   ;;  %v4487_v30 = vadd.s32 528, %v3700_v60 }
 0x1da   : > { %v1834_v11 = vadd.f32 %v1833_v17, %v1707_v52  ;;  %6269 = vst [vmem:[#allocation143_spill] sm:$0xff] %v4454_v8  ;;  %v1709_v17 = vsel %vm5968_vm12, %v4172_v0, 0.0  ;;  %v4476_v52 = vadd.s32 520, %v3700_v60  ;;  %vm5975_vm14 = vcmp.lt.s32.totalorder %v4454_v8, %v3720_v53  ;;  %v6285_v0 = vld [vmem:[#allocation35_spill] sm:$0xff] }
 0x1db   : > { %3319 = vst [vmem:[%s3465_s14 + $0x1c8] sm:$0xff] %v3231_v38  }
 0x1dc   : > { %v1835_v7 = vadd.f32 %v1834_v11, %v1708_v14  ;;  %6271 = vst [vmem:[#allocation145_spill] sm:$0xff] %v4476_v52  ;;  %v1710_v14 = vsel %vm5971_vm15, %v4224_v42, 0.0  ;;  %vm5980_vm12 = vcmp.lt.s32.totalorder %v4476_v52, %v3720_v53  ;;  %vm5986_vm15 = vcmp.lt.s32.totalorder %v4487_v30, %v3720_v53  ;;  %v6278_v52 = vld [vmem:[#allocation29_spill] sm:$0xff] }
 0x1dd   : > { %6272 = vst [vmem:[#allocation146_spill] sm:$0xff] %v4487_v30  ;;  %v4540_v30 = vadd.s32 568, %v3700_v60 }
 0x1de   : > { %v1836_v18 = vadd.f32 %v1835_v7, %v1709_v17  ;;  %v1711_v7 = vsel %vm5975_vm14, %v4266_v23, 0.0  ;;  %v4493_v38 = vpop.f32.mrf.mxu2  ;;  %v4495_v17 = vpop.f32.mrf.mxu3  ;;  %6273 = vst [vmem:[#allocation147_spill] sm:$0xff] %v4500_v27  ;;  %v1713_v23 = vsel %vm5980_vm12, %v3567_v21, 0.0  ;;  %vm5984_vm14 = vcmp.lt.s32.totalorder %v4500_v27, %v3720_v53 }
 0x1df   : > { %v1715_v21 = vsel %vm5984_vm14, %v6278_v52, 0.0  ;;  %vm5992_vm12 = vcmp.lt.s32.totalorder %v4516_v19, %v3720_v53  ;;  %6280 = vst [vmem:[#allocation152_spill] sm:$0xff] %v4540_v30  ;;  %v4553_v52 = vadd.s32 576, %v3700_v60 }
 0x1e0   : > { %v1837_v11 = vadd.f32 %v1836_v18, %v1710_v14  ;;  %v1712_v18 = vsel %vm5977_vm13, %v3556_v15, 0.0  ;;  %v4509_v14 = vadd.s32 544, %v3700_v60 }
 0x1e1   : > { %6282 = vst [vmem:[#allocation153_spill] sm:$0xff] %v4553_v52 }
 0x1e2   : > { %v1838_v28 = vadd.f32 %v1837_v11, %v1711_v7  ;;  %6274 = vst [vmem:[#allocation148_spill] sm:$0xff] %v4509_v14  ;;  %v6276_v7 = vld [vmem:[#allocation26_spill] sm:$0xff]  ;;  %vm5990_vm13 = vcmp.lt.s32.totalorder %v4509_v14, %v3720_v53  ;;  %v4564_v14 = vadd.s32 584, %v3700_v60 }
 0x1e3   : > { %v1714_v56 = vsel %vm5986_vm15, %v6276_v7, 0.0  ;;  %vm5997_vm15 = vcmp.lt.s32.totalorder %v4540_v30, %v3720_v53 }
 0x1e4   : > { %v1839_v8 = vadd.f32 %v1838_v28, %v1712_v18  ;;  %v4527_v28 = vadd.s32 560, %v3700_v60  ;;  %6284 = vst [vmem:[#allocation154_spill] sm:$0xff] %v4564_v14 }
 0x1e6   : > { %v1840_v11 = vadd.f32 %v1839_v8, %v1713_v23  ;;  %6277 = vst [vmem:[#allocation150_spill] sm:$0xff] %v4527_v28  ;;  %v4535_v23 = vpop.f32.mrf.mxu2  ;;  %v4537_v8 = vpop.f32.mrf.mxu3  ;;  %vm5994_vm14 = vcmp.lt.s32.totalorder %v4527_v28, %v3720_v53 }
 0x1e7   : > { %6279 = vst [vmem:[#allocation151_spill] sm:$0xff] %v4535_v23  ;;  %v3176_v15 = vpack.c.bf16 %v4535_v23, %v4493_v38  ;;  %v1718_v33 = vsel %vm5994_vm14, %v6285_v0, 0.0  ;;  %v6290_v0 = vld [vmem:[#allocation40_spill] sm:$0xff] }
 0x1e8   : > { %v1841_v18 = vadd.f32 %v1840_v11, %v1714_v56  ;;  %v3236_v56 = vpack.c.bf16 %v4537_v8, %v4495_v17  ;;  %v6281_v11 = vld [vmem:[#allocation31_spill] sm:$0xff] }
 0x1e9   : > { %v1716_v27 = vsel %vm5990_vm13, %v6281_v11, 0.0  ;;  %3308 = vst [vmem:[%s3465_s14 + $0x170] sm:$0xff] %v3176_v15   ;;  %vm5999_vm13 = vcmp.lt.s32.totalorder %v4553_v52, %v3720_v53  ;;  %v4573_v15 = vadd.s32 592, %v3700_v60 }
 0x1ea   : > { %v1842_v7 = vadd.f32 %v1841_v18, %v1715_v21  ;;  %v6283_v21 = vld [vmem:[#allocation33_spill] sm:$0xff]  ;;  %3320 = vst [vmem:[%s3465_s14 + $0x1d0] sm:$0xff] %v3236_v56  }
 0x1eb   : > { %v1717_v18 = vsel %vm5992_vm12, %v6283_v21, 0.0  ;;  %6286 = vst [vmem:[#allocation155_spill] sm:$0xff] %v4573_v15  ;;  %vm6001_vm12 = vcmp.lt.s32.totalorder %v4564_v14, %v3720_v53  ;;  %vm6005_vm14 = vcmp.lt.s32.totalorder %v4573_v15, %v3720_v53  ;;  %v6295_v14 = vld [vmem:[#allocation51_spill] sm:$0xff]  ;;  %v4626_v15 = vadd.s32 632, %v3700_v60 }
 0x1ec   : > { %v1843_v42 = vadd.f32 %v1842_v7, %v1716_v27  ;;  %v6287_v7 = vld [vmem:[#allocation38_spill] sm:$0xff] }
 0x1ed   : > { %v1719_v56 = vsel %vm5997_vm15, %v6287_v7, 0.0  ;;  %v6292_v7 = vld [vmem:[#allocation43_spill] sm:$0xff]  ;;  %6297 = vst [vmem:[#allocation161_spill] sm:$0xff] %v4626_v15 }
 0x1ee   : > { %v1844_v11 = vadd.f32 %v1843_v42, %v1717_v18  ;;  %v4579_v19 = vpop.f32.mrf.mxu2  ;;  %v4581_v42 = vpop.f32.mrf.mxu3  ;;  %v4586_v18 = vadd.s32 600, %v3700_v60  ;;  %v1721_v21 = vsel %vm6001_vm12, %v6292_v7, 0.0  ;;  %vm6010_vm12 = vcmp.lt.s32.totalorder %v4602_v61, %v3720_v53 }
 0x1ef   : > { %6288 = vst [vmem:[#allocation156_spill] sm:$0xff] %v4579_v19 }
 0x1f0   : > { %v1845_v27 = vadd.f32 %v1844_v11, %v1718_v33  ;;  %6289 = vst [vmem:[#allocation157_spill] sm:$0xff] %v4586_v18  ;;  %v1720_v33 = vsel %vm5999_vm13, %v6290_v0, 0.0  ;;  %v4595_v11 = vadd.s32 608, %v3700_v60  ;;  %vm6003_vm15 = vcmp.lt.s32.totalorder %v4586_v18, %v3720_v53 }
 0x1f1   : > { %v1723_v7 = vsel %vm6003_vm15, %v6295_v14, 0.0  ;;  %v4639_v18 = vadd.s32 640, %v3700_v60 }
 0x1f2   : > { %v1846_v28 = vadd.f32 %v1845_v27, %v1719_v56  ;;  %6291 = vst [vmem:[#allocation158_spill] sm:$0xff] %v4595_v11  ;;  %v6293_v56 = vld [vmem:[#allocation47_spill] sm:$0xff]  ;;  %vm6009_vm13 = vcmp.lt.s32.totalorder %v4595_v11, %v3720_v53  ;;  %v4650_v11 = vadd.s32 648, %v3700_v60 }
 0x1f3   : > { %v1722_v52 = vsel %vm6005_vm14, %v6293_v56, 0.0  ;;  %6298 = vst [vmem:[#allocation162_spill] sm:$0xff] %v4639_v18  ;;  %vm6014_vm14 = vcmp.lt.s32.totalorder %v4626_v15, %v3720_v53 }
 0x1f4   : > { %v1847_v30 = vadd.f32 %v1846_v28, %v1720_v33  ;;  %v4613_v28 = vadd.s32 624, %v3700_v60 }
 0x1f6   : > { %v1848_v27 = vadd.f32 %v1847_v30, %v1721_v21  ;;  %6294 = vst [vmem:[#allocation159_spill] sm:$0xff] %v4613_v28  ;;  %v4621_v30 = vpop.f32.mrf.mxu2  ;;  %v4623_v21 = vpop.f32.mrf.mxu3  ;;  %vm6012_vm15 = vcmp.lt.s32.totalorder %v4613_v28, %v3720_v53 }
 0x1f7   : > { %6296 = vst [vmem:[#allocation160_spill] sm:$0xff] %v4621_v30  ;;  %v3181_v0 = vpack.c.bf16 %v4621_v30, %v4579_v19  ;;  %v1726_v50 = vsel %vm6012_vm15, %v3841_v16, 0.0 }
 0x1f8   : > { %v1849_v33 = vadd.f32 %v1848_v27, %v1722_v52  ;;  %v3241_v52 = vpack.c.bf16 %v4623_v21, %v4581_v42  ;;  %v1724_v27 = vsel %vm6009_vm13, %v3733_v63, 0.0  ;;  %vm6016_vm13 = vcmp.lt.s32.totalorder %v4639_v18, %v3720_v53 }
 0x1f9   : > { %3309 = vst [vmem:[%s3465_s14 + $0x178] sm:$0xff] %v3181_v0   ;;  %v4659_v0 = vadd.s32 656, %v3700_v60  ;;  %v1728_v28 = vsel %vm6016_vm13, %v3942_v59, 0.0 }
 0x1fa   : > { %v1850_v56 = vadd.f32 %v1849_v33, %v1723_v7  ;;  %v6299_v7 = vld [vmem:[#allocation65_spill] sm:$0xff]  ;;  %3321 = vst [vmem:[%s3465_s14 + $0x1d8] sm:$0xff] %v3241_v52   ;;  %v1727_v52 = vsel %vm6014_vm14, %v3888_v36, 0.0 }
 0x1fb   : > { %v1725_v33 = vsel %vm6010_vm12, %v6299_v7, 0.0  ;;  %6300 = vst [vmem:[#allocation65_spill] sm:$0xff] %v4650_v11  ;;  %vm6019_vm12 = vcmp.lt.s32.totalorder %v4650_v11, %v3720_v53  ;;  %vm6023_vm15 = vcmp.lt.s32.totalorder %v4659_v0, %v3720_v53 }
 0x1fc   : > { %v1851_v14 = vadd.f32 %v1850_v56, %v1724_v27  ;;  %6301 = vst [vmem:[#allocation163_spill] sm:$0xff] %v4659_v0  ;;  %v1729_v15 = vsel %vm6019_vm12, %v3989_v34, 0.0  ;;  %v1730_v18 = vsel %vm6023_vm15, %v4043_v31, 0.0 }
 0x1fe   : > { %v1852_v63 = vadd.f32 %v1851_v14, %v1725_v33  ;;  %v4665_v27 = vpop.f32.mrf.mxu3  ;;  %v4670_v14 = vadd.s32 664, %v3700_v60 }
 0x1ff   : > { %6302 = vst [vmem:[#allocation164_spill] sm:$0xff] %v4665_v27 }
 0x200   : > { %v1853_v56 = vadd.f32 %v1852_v63, %v1726_v50  ;;  %6303 = vst [vmem:[#allocation165_spill] sm:$0xff] %v4670_v14  ;;  %v4679_v63 = vadd.s32 672, %v3700_v60  ;;  %vm6021_vm14 = vcmp.lt.s32.totalorder %v4670_v14, %v3720_v53  ;;  %v4719_v14 = vadd.s32 704, %v3700_v60 }
 0x201   : > { %v1731_v11 = vsel %vm6021_vm14, %v4087_v44, 0.0 }
 0x202   : > { %v1854_v33 = vadd.f32 %v1853_v56, %v1727_v52  ;;  %6304 = vst [vmem:[#allocation166_spill] sm:$0xff] %v4679_v63  ;;  %v4688_v56 = vadd.s32 680, %v3700_v60  ;;  %vm6025_vm13 = vcmp.lt.s32.totalorder %v4679_v63, %v3720_v53  ;;  %v4729_v63 = vadd.s32 712, %v3700_v60 }
 0x203   : > { %6309 = vst [vmem:[#allocation171_spill] sm:$0xff] %v4719_v14 }
 0x204   : > { %v1855_v50 = vadd.f32 %v1854_v33, %v1728_v28  ;;  %6305 = vst [vmem:[#allocation167_spill] sm:$0xff] %v4688_v56  ;;  %v4697_v28 = vadd.s32 688, %v3700_v60  ;;  %vm6027_vm12 = vcmp.lt.s32.totalorder %v4688_v56, %v3720_v53 }
 0x205   : > { %6310 = vst [vmem:[#allocation172_spill] sm:$0xff] %v4729_v63 }
 0x206   : > { %v1856_v52 = vadd.f32 %v1855_v50, %v1729_v15  ;;  %6306 = vst [vmem:[#allocation168_spill] sm:$0xff] %v4697_v28  ;;  %v4703_v34 = vpop.f32.mrf.mxu3  ;;  %v4708_v15 = vadd.s32 696, %v3700_v60  ;;  %vm6029_vm14 = vcmp.lt.s32.totalorder %v4697_v28, %v3720_v53  ;;  %v4749_v28 = vadd.s32 728, %v3700_v60 }
 0x207   : > { %6307 = vst [vmem:[#allocation169_spill] sm:$0xff] %v4703_v34  ;;  %v3246_v0 = vpack.c.bf16 %v4703_v34, %v4665_v27 }
 0x208   : > { %v1857_v33 = vadd.f32 %v1856_v52, %v1730_v18  ;;  %6308 = vst [vmem:[#allocation170_spill] sm:$0xff] %v4708_v15  ;;  %v1732_v18 = vsel %vm6025_vm13, %v4135_v2, 0.0  ;;  %vm6031_vm15 = vcmp.lt.s32.totalorder %v4708_v15, %v3720_v53  ;;  %vm6033_vm13 = vcmp.lt.s32.totalorder %v4719_v14, %v3720_v53 }
 0x209   : > { %3322 = vst [vmem:[%s3465_s14 + $0x1e0] sm:$0xff] %v3246_v0   ;;  %v4738_v0 = vadd.s32 720, %v3700_v60  ;;  %v4758_v15 = vadd.s32 736, %v3700_v60  ;;  %v4767_v14 = vadd.s32 744, %v3700_v60 }
 0x20a   : > { %v1858_v50 = vadd.f32 %v1857_v33, %v1731_v11  ;;  %v1733_v11 = vsel %vm6027_vm12, %v4180_v29, 0.0  ;;  %vm6036_vm12 = vcmp.lt.s32.totalorder %v4729_v63, %v3720_v53  ;;  %6313 = vst [vmem:[#allocation175_spill] sm:$0xff] %v4749_v28  ;;  %v4776_v63 = vadd.s32 752, %v3700_v60 }
 0x20b   : > { %6311 = vst [vmem:[#allocation173_spill] sm:$0xff] %v4738_v0 }
 0x20c   : > { %v1859_v52 = vadd.f32 %v1858_v50, %v1732_v18  ;;  %v1734_v50 = vsel %vm6029_vm14, %v4230_v39, 0.0  ;;  %vm6043_vm14 = vcmp.lt.s32.totalorder %v4738_v0, %v3720_v53  ;;  %6314 = vst [vmem:[#allocation176_spill] sm:$0xff] %v4758_v15  ;;  %v4787_v0 = vadd.s32 760, %v3700_v60 }
 0x20d   : > { %6315 = vst [vmem:[#allocation177_spill] sm:$0xff] %v4767_v14 }
 0x20e   : > { %v1860_v33 = vadd.f32 %v1859_v52, %v1733_v11  ;;  %v1735_v52 = vsel %vm6031_vm15, %v4274_v58, 0.0  ;;  %v4744_v11 = vpop.f32.mrf.mxu3  ;;  %vm6040_vm15 = vcmp.lt.s32.totalorder %v4749_v28, %v3720_v53  ;;  %6316 = vst [vmem:[#allocation178_spill] sm:$0xff] %v4776_v63  ;;  %v4796_v28 = vadd.s32 768, %v3700_v60 }
 0x20f   : > { %6312 = vst [vmem:[#allocation174_spill] sm:$0xff] %v4744_v11 }
 0x210   : > { %v1861_v18 = vadd.f32 %v1860_v33, %v1734_v50  ;;  %v1736_v33 = vsel %vm6033_vm13, %v4321_v12, 0.0  ;;  %vm6042_vm13 = vcmp.lt.s32.totalorder %v4758_v15, %v3720_v53  ;;  %6318 = vst [vmem:[#allocation180_spill] sm:$0xff] %v4787_v0  ;;  %v6324_v15 = vld [vmem:[#allocation41_spill] sm:$0xff] }
 0x211   : > { %6319 = vst [vmem:[#allocation181_spill] sm:$0xff] %v4796_v28 }
 0x212   : > { %v1862_v56 = vadd.f32 %v1861_v18, %v1735_v52  ;;  %v1737_v18 = vsel %vm6036_vm12, %v4363_v47, 0.0  ;;  %vm6044_vm12 = vcmp.lt.s32.totalorder %v4767_v14, %v3720_v53 }
 0x214   : > { %v1863_v50 = vadd.f32 %v1862_v56, %v1736_v33  ;;  %v1738_v56 = vsel %vm6043_vm14, %v4407_v54, 0.0  ;;  %vm6054_vm14 = vcmp.lt.s32.totalorder %v4796_v28, %v3720_v53  ;;  %v6328_v28 = vld [vmem:[#allocation48_spill] sm:$0xff] }
 0x216   : > { %v1864_v52 = vadd.f32 %v1863_v50, %v1737_v18  ;;  %v1739_v50 = vsel %vm6040_vm15, %v4449_v13, 0.0  ;;  %v4782_v18 = vpop.f32.mrf.mxu3  ;;  %vm6049_vm15 = vcmp.lt.s32.totalorder %v4776_v63, %v3720_v53  ;;  %v4828_v63 = vadd.s32 792, %v3700_v60 }
 0x217   : > { %6317 = vst [vmem:[#allocation179_spill] sm:$0xff] %v4782_v18 }
 0x218   : > { %v1865_v33 = vadd.f32 %v1864_v52, %v1738_v56  ;;  %v3251_v52 = vpack.c.bf16 %v4782_v18, %v4744_v11  ;;  %v1740_v56 = vsel %vm6042_vm13, %v4493_v38, 0.0  ;;  %vm6052_vm13 = vcmp.lt.s32.totalorder %v4787_v0, %v3720_v53  ;;  %6323 = vst [vmem:[#allocation185_spill] sm:$0xff] %v4828_v63  ;;  %v6326_v0 = vld [vmem:[#allocation44_spill] sm:$0xff] }
 0x21a   : > { %v1866_v47 = vadd.f32 %v1865_v33, %v1739_v50  ;;  %3323 = vst [vmem:[%s3465_s14 + $0x1e8] sm:$0xff] %v3251_v52   ;;  %v1741_v33 = vsel %vm6044_vm12, %v4535_v23, 0.0  ;;  %v4806_v50 = vadd.s32 776, %v3700_v60  ;;  %v4817_v52 = vadd.s32 784, %v3700_v60 }
 0x21c   : > { %v1867_v13 = vadd.f32 %v1866_v47, %v1740_v56  ;;  %6320 = vst [vmem:[#allocation182_spill] sm:$0xff] %v4806_v50  ;;  %v1742_v47 = vsel %vm6049_vm15, %v4579_v19, 0.0  ;;  %vm6057_vm12 = vcmp.lt.s32.totalorder %v4806_v50, %v3720_v53  ;;  %v1744_v19 = vsel %vm6054_vm14, %v6324_v15, 0.0  ;;  %v6330_v50 = vld [vmem:[#allocation52_spill] sm:$0xff] }
 0x21d   : > { %6321 = vst [vmem:[#allocation183_spill] sm:$0xff] %v4817_v52  ;;  %vm6061_vm15 = vcmp.lt.s32.totalorder %v4817_v52, %v3720_v53 }
 0x21e   : > { %v1868_v54 = vadd.f32 %v1867_v13, %v1741_v33  ;;  %v1743_v13 = vsel %vm6052_vm13, %v4621_v30, 0.0  ;;  %v4823_v33 = vpop.f32.mrf.mxu3  ;;  %v1745_v30 = vsel %vm6057_vm12, %v6326_v0, 0.0  ;;  %vm6059_vm13 = vcmp.lt.s32.totalorder %v4828_v63, %v3720_v53 }
 0x21f   : > { %6322 = vst [vmem:[#allocation184_spill] sm:$0xff] %v4823_v33  ;;  %v1746_v15 = vsel %vm6061_vm15, %v6328_v28, 0.0  ;;  %v1747_v0 = vsel %vm6059_vm13, %v6330_v50, 0.0 }
 0x220   : > { %v1869_v56 = vadd.f32 %v1868_v54, %v1742_v47  ;;  %v4837_v54 = vadd.s32 800, %v3700_v60 }
 0x222   : > { %v1870_v14 = vadd.f32 %v1869_v56, %v1743_v13  ;;  %6325 = vst [vmem:[#allocation186_spill] sm:$0xff] %v4837_v54  ;;  %v4846_v56 = vadd.s32 808, %v3700_v60  ;;  %vm6064_vm14 = vcmp.lt.s32.totalorder %v4837_v54, %v3720_v53 }
 0x224   : > { %v1871_v47 = vadd.f32 %v1870_v14, %v1744_v19  ;;  %6327 = vst [vmem:[#allocation187_spill] sm:$0xff] %v4846_v56  ;;  %v4855_v19 = vadd.s32 816, %v3700_v60  ;;  %vm6066_vm12 = vcmp.lt.s32.totalorder %v4846_v56, %v3720_v53 }
 0x226   : > { %v1872_v13 = vadd.f32 %v1871_v47, %v1745_v30  ;;  %6329 = vst [vmem:[#allocation48_spill] sm:$0xff] %v4855_v19  ;;  %v4861_v23 = vpop.f32.mrf.mxu3  ;;  %v4866_v30 = vadd.s32 824, %v3700_v60  ;;  %vm6068_vm13 = vcmp.lt.s32.totalorder %v4855_v19, %v3720_v53 }
 0x227   : > { %6331 = vst [vmem:[#allocation52_spill] sm:$0xff] %v4861_v23  ;;  %v3256_v52 = vpack.c.bf16 %v4861_v23, %v4823_v33 }
 0x228   : > { %v1873_v14 = vadd.f32 %v1872_v13, %v1746_v15  ;;  %6332 = vst [vmem:[#allocation188_spill] sm:$0xff] %v4866_v30  ;;  %v1748_v15 = vsel %vm6064_vm14, %v3735_v49, 0.0  ;;  %v4877_v13 = vadd.s32 832, %v3700_v60  ;;  %vm6070_vm15 = vcmp.lt.s32.totalorder %v4866_v30, %v3720_v53 }
 0x229   : > { %3324 = vst [vmem:[%s3465_s14 + $0x1f0] sm:$0xff] %v3256_v52   ;;  %v1750_v49 = vsel %vm6068_vm13, %v3843_v6, 0.0  ;;  %v4896_v52 = vadd.s32 848, %v3700_v60 }
 0x22a   : > { %v1874_v47 = vadd.f32 %v1873_v14, %v1747_v0  ;;  %6333 = vst [vmem:[#allocation189_spill] sm:$0xff] %v4877_v13  ;;  %v1749_v0 = vsel %vm6066_vm12, %v3788_v43, 0.0  ;;  %v4887_v14 = vadd.s32 840, %v3700_v60  ;;  %vm6072_vm14 = vcmp.lt.s32.totalorder %v4877_v13, %v3720_v53 }
 0x22b   : > { %6335 = vst [vmem:[#allocation191_spill] sm:$0xff] %v4896_v52  ;;  %v1752_v19 = vsel %vm6072_vm14, %v3944_v51, 0.0  ;;  %vm6079_vm13 = vcmp.lt.s32.totalorder %v4896_v52, %v3720_v53 }
 0x22c   : > { %v1875_v63 = vadd.f32 %v1874_v47, %v1748_v15  ;;  %6334 = vst [vmem:[#allocation190_spill] sm:$0xff] %v4887_v14  ;;  %v1751_v15 = vsel %vm6070_vm15, %v3890_v9, 0.0  ;;  %vm6075_vm12 = vcmp.lt.s32.totalorder %v4887_v14, %v3720_v53  ;;  %v1754_v13 = vsel %vm6079_vm13, %v4045_v25, 0.0 }
 0x22d   : > { %v1753_v30 = vsel %vm6075_vm12, %v3991_v32, 0.0 }
 0x22e   : > { %v1876_v54 = vadd.f32 %v1875_v63, %v1749_v0  ;;  %v4902_v56 = vpop.f32.mrf.mxu3  ;;  %v4907_v63 = vadd.s32 856, %v3700_v60 }
 0x22f   : > { %6336 = vst [vmem:[#allocation192_spill] sm:$0xff] %v4902_v56 }
 0x230   : > { %v1877_v47 = vadd.f32 %v1876_v54, %v1750_v49  ;;  %6337 = vst [vmem:[#allocation193_spill] sm:$0xff] %v4907_v63  ;;  %v4916_v49 = vadd.s32 864, %v3700_v60  ;;  %vm6077_vm15 = vcmp.lt.s32.totalorder %v4907_v63, %v3720_v53 }
 0x231   : > { %v1755_v14 = vsel %vm6077_vm15, %v4089_v22, 0.0 }
 0x232   : > { %v1878_v0 = vadd.f32 %v1877_v47, %v1751_v15  ;;  %6338 = vst [vmem:[#allocation194_spill] sm:$0xff] %v4916_v49  ;;  %v4925_v47 = vadd.s32 872, %v3700_v60  ;;  %vm6082_vm14 = vcmp.lt.s32.totalorder %v4916_v49, %v3720_v53 }
 0x234   : > { %v1879_v54 = vadd.f32 %v1878_v0, %v1752_v19  ;;  %v4934_v19 = vadd.s32 880, %v3700_v60  ;;  %vm6083_vm12 = vcmp.lt.s32.totalorder %v4925_v47, %v3720_v53 }
 0x236   : > { %v1880_v15 = vadd.f32 %v1879_v54, %v1753_v30  ;;  %6339 = vst [vmem:[#allocation195_spill] sm:$0xff] %v4934_v19  ;;  %v4940_v32 = vpop.f32.mrf.mxu3  ;;  %v4945_v30 = vadd.s32 888, %v3700_v60  ;;  %vm6085_vm15 = vcmp.lt.s32.totalorder %v4934_v19, %v3720_v53 }
 0x237   : > { %6340 = vst [vmem:[#allocation196_spill] sm:$0xff] %v4940_v32  ;;  %v3261_v52 = vpack.c.bf16 %v4940_v32, %v4902_v56 }
 0x238   : > { %v1881_v0 = vadd.f32 %v1880_v15, %v1754_v13  ;;  %6341 = vst [vmem:[#allocation197_spill] sm:$0xff] %v4945_v30  ;;  %v1756_v13 = vsel %vm6082_vm14, %v4137_v41, 0.0  ;;  %v4956_v15 = vadd.s32 896, %v3700_v60  ;;  %vm6087_vm13 = vcmp.lt.s32.totalorder %v4945_v30, %v3720_v53 }
 0x239   : > { %3325 = vst [vmem:[%s3465_s14 + $0x1f8] sm:$0xff] %v3261_v52   ;;  %v1758_v41 = vsel %vm6085_vm15, %v4232_v45, 0.0  ;;  %v4975_v52 = vadd.s32 912, %v3700_v60 }
 0x23a   : > { %v1882_v54 = vadd.f32 %v1881_v0, %v1755_v14  ;;  %6342 = vst [vmem:[#allocation198_spill] sm:$0xff] %v4956_v15  ;;  %v1757_v14 = vsel %vm6083_vm12, %v4182_v10, 0.0  ;;  %v4966_v0 = vadd.s32 904, %v3700_v60  ;;  %vm6089_vm14 = vcmp.lt.s32.totalorder %v4956_v15, %v3720_v53 }
 0x23b   : > { %6344 = vst [vmem:[#allocation200_spill] sm:$0xff] %v4975_v52  ;;  %v1760_v19 = vsel %vm6089_vm14, %v4323_v3, 0.0  ;;  %vm6093_vm15 = vcmp.lt.s32.totalorder %v4975_v52, %v3720_v53 }
 0x23c   : > { %v1883_v63 = vadd.f32 %v1882_v54, %v1756_v13  ;;  %6343 = vst [vmem:[#allocation199_spill] sm:$0xff] %v4966_v0  ;;  %v1759_v13 = vsel %vm6087_vm13, %v4276_v26, 0.0  ;;  %vm6091_vm12 = vcmp.lt.s32.totalorder %v4966_v0, %v3720_v53  ;;  %v1762_v15 = vsel %vm6093_vm15, %v4409_v35, 0.0 }
 0x23d   : > { %v1761_v30 = vsel %vm6091_vm12, %v4365_v37, 0.0 }
 0x23e   : > { %v1884_v49 = vadd.f32 %v1883_v63, %v1757_v14  ;;  %v4984_v63 = vadd.s32 920, %v3700_v60 }
 0x240   : > { %v1885_v54 = vadd.f32 %v1884_v49, %v1758_v41  ;;  %6345 = vst [vmem:[#allocation201_spill] sm:$0xff] %v4984_v63  ;;  %v4993_v41 = vadd.s32 928, %v3700_v60  ;;  %vm6095_vm13 = vcmp.lt.s32.totalorder %v4984_v63, %v3720_v53 }
 0x241   : > { %v1763_v0 = vsel %vm6095_vm13, %v4451_v5, 0.0 }
 0x242   : > { %v1886_v14 = vadd.f32 %v1885_v54, %v1759_v13  ;;  %6346 = vst [vmem:[#allocation202_spill] sm:$0xff] %v4993_v41  ;;  %v5002_v54 = vadd.s32 936, %v3700_v60  ;;  %vm6096_vm14 = vcmp.lt.s32.totalorder %v4993_v41, %v3720_v53  ;;  %v5047_v41 = vadd.s32 976, %v3700_v60 }
 0x243   : > { %v1764_v52 = vsel %vm6096_vm14, %v4495_v17, 0.0 }
 0x244   : > { %v1887_v49 = vadd.f32 %v1886_v14, %v1760_v19  ;;  %6347 = vst [vmem:[#allocation203_spill] sm:$0xff] %v5002_v54  ;;  %v5011_v19 = vadd.s32 944, %v3700_v60  ;;  %vm6098_vm12 = vcmp.lt.s32.totalorder %v5002_v54, %v3720_v53  ;;  %v5056_v54 = vadd.s32 984, %v3700_v60 }
 0x245   : > { %v1765_v63 = vsel %vm6098_vm12, %v4537_v8, 0.0  ;;  %6352 = vst [vmem:[#allocation208_spill] sm:$0xff] %v5047_v41 }
 0x246   : > { %v1888_v13 = vadd.f32 %v1887_v49, %v1761_v30  ;;  %6348 = vst [vmem:[#allocation204_spill] sm:$0xff] %v5011_v19  ;;  %v5020_v30 = vadd.s32 952, %v3700_v60  ;;  %vm6100_vm15 = vcmp.lt.s32.totalorder %v5011_v19, %v3720_v53  ;;  %v5065_v19 = vadd.s32 992, %v3700_v60 }
 0x247   : > { %6353 = vst [vmem:[#allocation209_spill] sm:$0xff] %v5056_v54 }
 0x248   : > { %v1889_v14 = vadd.f32 %v1888_v13, %v1762_v15  ;;  %6349 = vst [vmem:[#allocation205_spill] sm:$0xff] %v5020_v30  ;;  %v5029_v13 = vadd.s32 960, %v3700_v60  ;;  %vm6102_vm13 = vcmp.lt.s32.totalorder %v5020_v30, %v3720_v53  ;;  %v5074_v30 = vadd.s32 1000, %v3700_v60 }
 0x249   : > { %6354 = vst [vmem:[#allocation210_spill] sm:$0xff] %v5065_v19 }
 0x24a   : > { %v1890_v49 = vadd.f32 %v1889_v14, %v1763_v0  ;;  %6350 = vst [vmem:[#allocation206_spill] sm:$0xff] %v5029_v13  ;;  %v5038_v14 = vadd.s32 968, %v3700_v60  ;;  %vm6104_vm14 = vcmp.lt.s32.totalorder %v5029_v13, %v3720_v53  ;;  %v6359_v13 = vld [vmem:[#allocation3_spill] sm:$0xff] }
 0x24b   : > { %6355 = vst [vmem:[#allocation211_spill] sm:$0xff] %v5074_v30 }
 0x24c   : > { %v1891_v15 = vadd.f32 %v1890_v49, %v1764_v52  ;;  %6351 = vst [vmem:[#allocation207_spill] sm:$0xff] %v5038_v14  ;;  %v1766_v52 = vsel %vm6100_vm15, %v4581_v42, 0.0  ;;  %vm6106_vm12 = vcmp.lt.s32.totalorder %v5038_v14, %v3720_v53  ;;  %vm6108_vm15 = vcmp.lt.s32.totalorder %v5047_v41, %v3720_v53 }
 0x24d   : > { %v5083_v14 = vadd.s32 1008, %v3700_v60  ;;  %v5092_v41 = vadd.s32 1016, %v3700_v60 }
 0x24e   : > { %v1892_v0 = vadd.f32 %v1891_v15, %v1765_v63  ;;  %v1767_v63 = vsel %vm6102_vm13, %v4623_v21, 0.0  ;;  %vm6109_vm13 = vcmp.lt.s32.totalorder %v5056_v54, %v3720_v53 }
 0x24f   : > { %6356 = vst [vmem:[#allocation212_spill] sm:$0xff] %v5083_v14 }
 0x250   : > { %v1893_v49 = vadd.f32 %v1892_v0, %v1766_v52  ;;  %v1768_v0 = vsel %vm6104_vm14, %v4665_v27, 0.0  ;;  %vm6120_vm14 = vcmp.lt.s32.totalorder %v5065_v19, %v3720_v53  ;;  %6357 = vst [vmem:[#allocation213_spill] sm:$0xff] %v5092_v41 }
 0x252   : > { %v1894_v15 = vadd.f32 %v1893_v49, %v1767_v63  ;;  %v1769_v49 = vsel %vm6106_vm12, %v4703_v34, 0.0  ;;  %vm6118_vm12 = vcmp.lt.s32.totalorder %v5074_v30, %v3720_v53 }
 0x254   : > { %v1895_v52 = vadd.f32 %v1894_v15, %v1768_v0  ;;  %v1770_v15 = vsel %vm6108_vm15, %v4744_v11, 0.0  ;;  %vm6116_vm15 = vcmp.lt.s32.totalorder %v5083_v14, %v3720_v53 }
 0x255   : > { %v1774_v19 = vsel %vm6116_vm15, %v4902_v56, 0.0 }
 0x256   : > { %v1896_v63 = vadd.f32 %v1895_v52, %v1769_v49  ;;  %v1771_v52 = vsel %vm6109_vm13, %v4782_v18, 0.0  ;;  %vm6115_vm13 = vcmp.lt.s32.totalorder %v5092_v41, %v3720_v53 }
 0x258   : > { %v1897_v0 = vadd.f32 %v1896_v63, %v1770_v15  ;;  %v1772_v63 = vsel %vm6120_vm14, %v4823_v33, 0.0  ;;  %v6358_v33 = vld [vmem:[#allocation2_spill] sm:$0xff] }
 0x25a   : > { %v1898_v49 = vadd.f32 %v1897_v0, %v1771_v52  ;;  %v1773_v0 = vsel %vm6118_vm12, %v4861_v23, 0.0 }
 0x25c   : > { %v1899_v15 = vadd.f32 %v1898_v49, %v1772_v63  ;;  %v1775_v63 = vsel %vm6115_vm13, %v4940_v32, 0.0 }
 0x25e   : > { %v1900_v52 = vadd.f32 %v1899_v15, %v1773_v0 }
 0x260   : > { %v1901_v49 = vadd.f32 %v1900_v52, %v1774_v19  ;;  %v1909_v52 = vstv %s1389_s24 }
 0x261   : > { %3358 = vrcp.f32 %v1909_v52  ;;  %vm1915_vm13 = vweird.f32 %v1909_v52  ;;  %v1919_v41 = vand.u32 2147483647, %v1909_v52 }
 0x262   : > { %v1902_v30 = vadd.f32 %v1901_v49, %v1775_v63 }
 0x263   : > { %vm1920_vm14 = vcmp.eq.f32.partialorder %v1919_v41, 8.507059e+37 }
 0x264   : > { %v1903_v15 = vrot.slane %v1902_v30, 4 }
 0x266   : > { %v1904_v0 = vadd.f32 %v1903_v15, %v1902_v30 }
 0x267   : > { %v3359_v49 = vpop.eup %3358 }
 0x268   : > { %v1905_v54 = vrot.slane %v1904_v0, 2  ;;  %v1911_v30 = vmul.f32 %v3359_v49, %v1909_v52  ;;  %vm1916_vm15 = vweird.f32 %v3359_v49 }
 0x269   : > { %vm1917_vm12 = vmor %vm1915_vm13, %vm1916_vm15 }
 0x26a   : > { %v1906_v14 = vadd.f32 %v1905_v54, %v1904_v0  ;;  %v1912_v63 = vsub.f32 1.0, %v1911_v30  ;;  %v1921_v54 = vand.u32 2147483648, %v1909_v52  ;;  %v6360_v30 = vld [vmem:[#allocation4_spill] sm:$0xff] }
 0x26c   : > { %v1907_v56 = vrot.slane %v1906_v14, 1  ;;  %v1913_v15 = vmul.f32 %v3359_v49, %v1912_v63  ;;  %v1922_v32 = vor.u32 1.1754944e-38, %v1921_v54 }
 0x26e   : > { %v1908_v19 = vadd.f32 %v1907_v56, %v1906_v14  ;;  %v1914_v0 = vadd.f32 %v3359_v49, %v1913_v15  ;;  %v6366_v15 = vld [vmem:[#allocation10_spill] sm:$0xff] }
 0x270   : > { %2442 = vst [vmem:[%s217_s22] sm:$0xff] %v1908_v19  ;;  %v1918_v56 = vsel %vm1917_vm12, %v3359_v49, %v1914_v0 }
 0x271   : > { %v1923_v14 = vsel %vm1920_vm14, %v1922_v32, %v1918_v56  ;;  %v6362_v32 = vld [vmem:[#allocation5_spill] sm:$0xff] }
 0x272   : > { %v5127_v23 = vmul.f32 %v1923_v14, %v1908_v19 }
 0x274   : > { %v1925_v18 = vsub.f32 %v6358_v33, %v5127_v23  ;;  %v1926_v11 = vsub.f32 %v6359_v13, %v5127_v23  ;;  %v1927_v63 = vsub.f32 %v6360_v30, %v5127_v23  ;;  %v1928_v19 = vsub.f32 %v6362_v32, %v5127_v23  ;;  %v6363_v33 = vld [vmem:[#allocation7_spill] sm:$0xff] }
 0x275   : > { %v1929_v0 = vsub.f32 %v6363_v33, %v5127_v23  ;;  %v1930_v60 = vsub.f32 %v3496_v46, %v5127_v23 }
 0x276   : > { %v2053_v52 = vsel %vm1520_vm1, %v1925_v18, 0.0  ;;  %v2054_v41 = vsel %vm1521_vm0, %v1926_v11, 0.0  ;;  %v2055_v56 = vsel %vm1522_vm2, %v1927_v63, 0.0  ;;  %v2056_v14 = vsel %vm1523_vm3, %v1928_v19, 0.0  ;;  %v6368_v63 = vld [vmem:[#allocation12_spill] sm:$0xff] }
 0x277   : > { %v2181_v49 = vmul.f32 %v2053_v52, %v2053_v52  ;;  %v2182_v54 = vmul.f32 %v2054_v41, %v2054_v41  ;;  %v2183_v11 = vmul.f32 %v2055_v56, %v2055_v56  ;;  %v1931_v52 = vsub.f32 %v6366_v15, %v5127_v23 }
 0x278   : > { %v2057_v32 = vsel %vm1524_vm4, %v1929_v0, 0.0  ;;  %v2184_v33 = vmul.f32 %v2056_v14, %v2056_v14  ;;  %v1932_v13 = vsub.f32 %v6368_v63, %v5127_v23  ;;  %v2058_v46 = vsel %vm1525_vm5, %v1930_v60, 0.0  ;;  %v6372_v14 = vld [vmem:[#allocation14_spill] sm:$0xff] }
 0x279   : > { %v2309_v30 = vadd.f32 %v2182_v54, %v2181_v49  ;;  %v2185_v18 = vmul.f32 %v2057_v32, %v2057_v32  ;;  %v6370_v49 = vld [vmem:[#allocation13_spill] sm:$0xff]  ;;  %v2059_v15 = vsel %vm1526_vm6, %v1931_v52, 0.0  ;;  %v2186_v41 = vmul.f32 %v2058_v46, %v2058_v46  ;;  %v6376_v46 = vld [vmem:[#allocation18_spill] sm:$0xff] }
 0x27a   : > { %v1933_v54 = vsub.f32 %v6370_v49, %v5127_v23  ;;  %v2060_v63 = vsel %vm1527_vm7, %v1932_v13, 0.0  ;;  %v2187_v27 = vmul.f32 %v2059_v15, %v2059_v15  ;;  %v6378_v15 = vld [vmem:[#allocation21_spill] sm:$0xff] }
 0x27b   : > { %v2310_v34 = vadd.f32 %v2309_v30, %v2183_v11  ;;  %v1934_v11 = vsub.f32 %v6372_v14, %v5127_v23  ;;  %v2188_v56 = vmul.f32 %v2060_v63, %v2060_v63  ;;  %v6380_v63 = vld [vmem:[#allocation24_spill] sm:$0xff] }
 0x27c   : > { %v2061_v49 = vsel %vm1528_vm8, %v1933_v54, 0.0 }
 0x27d   : > { %v2311_v19 = vadd.f32 %v2310_v34, %v2184_v33  ;;  %v6374_v34 = vld [vmem:[#allocation16_spill] sm:$0xff]  ;;  %v2062_v14 = vsel %vm1529_vm9, %v1934_v11, 0.0  ;;  %v2189_v30 = vmul.f32 %v2061_v49, %v2061_v49  ;;  %v6382_v49 = vld [vmem:[#allocation27_spill] sm:$0xff] }
 0x27e   : > { %v1935_v32 = vsub.f32 %v6374_v34, %v5127_v23  ;;  %v2190_v33 = vmul.f32 %v2062_v14, %v2062_v14  ;;  %v6385_v14 = vld [vmem:[#allocation30_spill] sm:$0xff] }
 0x27f   : > { %v2312_v0 = vadd.f32 %v2311_v19, %v2185_v18  ;;  %v1936_v18 = vsub.f32 %v6376_v46, %v5127_v23 }
 0x280   : > { %v2063_v34 = vsel %vm1530_vm10, %v1935_v32, 0.0 }
 0x281   : > { %v2313_v60 = vadd.f32 %v2312_v0, %v2186_v41  ;;  %v1937_v41 = vsub.f32 %v6378_v15, %v5127_v23  ;;  %v2064_v46 = vsel %vm1531_vm11, %v1936_v18, 0.0  ;;  %v2191_v19 = vmul.f32 %v2063_v34, %v2063_v34  ;;  %v6388_v34 = vld [vmem:[#allocation32_spill] sm:$0xff] }
 0x282   : > { %v2192_v0 = vmul.f32 %v2064_v46, %v2064_v46  ;;  %v6391_v46 = vld [vmem:[#allocation34_spill] sm:$0xff] }
 0x283   : > { %v2314_v52 = vadd.f32 %v2313_v60, %v2187_v27  ;;  %v1938_v27 = vsub.f32 %v6380_v63, %v5127_v23 }
 0x285   : > { %v2315_v13 = vadd.f32 %v2314_v52, %v2188_v56  ;;  %v1939_v56 = vsub.f32 %v6382_v49, %v5127_v23  ;;  %v6383_v52 = vld [vmem:[#allocation72_spill] sm:$0xff] }
 0x286   : > { %vm6384_vm0 = vcmp.lt.s32.totalorder %v6383_v52, %v3720_v53 }
 0x287   : > { %v2316_v54 = vadd.f32 %v2315_v13, %v2189_v30  ;;  %v2065_v15 = vsel %vm6384_vm0, %v1937_v41, 0.0  ;;  %v1940_v30 = vsub.f32 %v6385_v14, %v5127_v23  ;;  %v6386_v13 = vld [vmem:[#allocation73_spill] sm:$0xff] }
 0x288   : > { %vm6387_vm1 = vcmp.lt.s32.totalorder %v6386_v13, %v3720_v53  ;;  %v2193_v60 = vmul.f32 %v2065_v15, %v2065_v15  ;;  %v6394_v15 = vld [vmem:[#allocation36_spill] sm:$0xff] }
 0x289   : > { %v2317_v11 = vadd.f32 %v2316_v54, %v2190_v33  ;;  %v2066_v63 = vsel %vm6387_vm1, %v1938_v27, 0.0  ;;  %v1941_v33 = vsub.f32 %v6388_v34, %v5127_v23  ;;  %v6389_v54 = vld [vmem:[#allocation74_spill] sm:$0xff] }
 0x28a   : > { %vm6390_vm2 = vcmp.lt.s32.totalorder %v6389_v54, %v3720_v53  ;;  %v2194_v52 = vmul.f32 %v2066_v63, %v2066_v63  ;;  %v6397_v63 = vld [vmem:[#allocation39_spill] sm:$0xff] }
 0x28b   : > { %v2318_v32 = vadd.f32 %v2317_v11, %v2191_v19  ;;  %v2067_v49 = vsel %vm6390_vm2, %v1939_v56, 0.0  ;;  %v1942_v19 = vsub.f32 %v6391_v46, %v5127_v23  ;;  %v6392_v11 = vld [vmem:[#allocation75_spill] sm:$0xff] }
 0x28c   : > { %vm6393_vm3 = vcmp.lt.s32.totalorder %v6392_v11, %v3720_v53  ;;  %v2195_v13 = vmul.f32 %v2067_v49, %v2067_v49  ;;  %v6400_v49 = vld [vmem:[#allocation42_spill] sm:$0xff] }
 0x28d   : > { %v2319_v18 = vadd.f32 %v2318_v32, %v2192_v0  ;;  %v2068_v14 = vsel %vm6393_vm3, %v1940_v30, 0.0  ;;  %v1943_v0 = vsub.f32 %v6394_v15, %v5127_v23  ;;  %v6395_v32 = vld [vmem:[#allocation78_spill] sm:$0xff] }
 0x28e   : > { %vm6396_vm4 = vcmp.lt.s32.totalorder %v6395_v32, %v3720_v53  ;;  %v2196_v54 = vmul.f32 %v2068_v14, %v2068_v14  ;;  %v6403_v14 = vld [vmem:[#allocation45_spill] sm:$0xff] }
 0x28f   : > { %v2320_v41 = vadd.f32 %v2319_v18, %v2193_v60  ;;  %v2069_v34 = vsel %vm6396_vm4, %v1941_v33, 0.0  ;;  %v1944_v60 = vsub.f32 %v6397_v63, %v5127_v23  ;;  %v6398_v18 = vld [vmem:[#allocation79_spill] sm:$0xff] }
 0x290   : > { %vm6399_vm5 = vcmp.lt.s32.totalorder %v6398_v18, %v3720_v53  ;;  %v2197_v11 = vmul.f32 %v2069_v34, %v2069_v34  ;;  %v6406_v34 = vld [vmem:[#allocation49_spill] sm:$0xff] }
 0x291   : > { %v2321_v27 = vadd.f32 %v2320_v41, %v2194_v52  ;;  %v2070_v46 = vsel %vm6399_vm5, %v1942_v19, 0.0  ;;  %v1945_v52 = vsub.f32 %v6400_v49, %v5127_v23  ;;  %v6401_v41 = vld [vmem:[#allocation80_spill] sm:$0xff] }
 0x292   : > { %vm6402_vm6 = vcmp.lt.s32.totalorder %v6401_v41, %v3720_v53  ;;  %v2198_v32 = vmul.f32 %v2070_v46, %v2070_v46  ;;  %v6409_v46 = vld [vmem:[#allocation56_spill] sm:$0xff] }
 0x293   : > { %v2322_v56 = vadd.f32 %v2321_v27, %v2195_v13  ;;  %v2071_v15 = vsel %vm6402_vm6, %v1943_v0, 0.0  ;;  %v1946_v13 = vsub.f32 %v6403_v14, %v5127_v23  ;;  %v6404_v27 = vld [vmem:[#allocation81_spill] sm:$0xff] }
 0x294   : > { %vm6405_vm7 = vcmp.lt.s32.totalorder %v6404_v27, %v3720_v53  ;;  %v2199_v18 = vmul.f32 %v2071_v15, %v2071_v15  ;;  %v6412_v15 = vld [vmem:[#allocation64_spill] sm:$0xff] }
 0x295   : > { %v2323_v30 = vadd.f32 %v2322_v56, %v2196_v54  ;;  %v2072_v63 = vsel %vm6405_vm7, %v1944_v60, 0.0  ;;  %v1947_v54 = vsub.f32 %v6406_v34, %v5127_v23  ;;  %v6407_v56 = vld [vmem:[#allocation84_spill] sm:$0xff] }
 0x296   : > { %vm6408_vm8 = vcmp.lt.s32.totalorder %v6407_v56, %v3720_v53  ;;  %v2200_v41 = vmul.f32 %v2072_v63, %v2072_v63  ;;  %v6415_v63 = vld [vmem:[#allocation70_spill] sm:$0xff] }
 0x297   : > { %v2324_v33 = vadd.f32 %v2323_v30, %v2197_v11  ;;  %v2073_v49 = vsel %vm6408_vm8, %v1945_v52, 0.0  ;;  %v1948_v11 = vsub.f32 %v6409_v46, %v5127_v23  ;;  %v6410_v30 = vld [vmem:[#allocation85_spill] sm:$0xff] }
 0x298   : > { %vm6411_vm9 = vcmp.lt.s32.totalorder %v6410_v30, %v3720_v53  ;;  %v2201_v27 = vmul.f32 %v2073_v49, %v2073_v49  ;;  %v6418_v49 = vld [vmem:[#allocation76_spill] sm:$0xff] }
 0x299   : > { %v2325_v19 = vadd.f32 %v2324_v33, %v2198_v32  ;;  %v2074_v14 = vsel %vm6411_vm9, %v1946_v13, 0.0  ;;  %v1949_v32 = vsub.f32 %v6412_v15, %v5127_v23  ;;  %v6413_v33 = vld [vmem:[#allocation86_spill] sm:$0xff] }
 0x29a   : > { %vm6414_vm10 = vcmp.lt.s32.totalorder %v6413_v33, %v3720_v53  ;;  %v2202_v56 = vmul.f32 %v2074_v14, %v2074_v14  ;;  %v6421_v14 = vld [vmem:[#allocation82_spill] sm:$0xff] }
 0x29b   : > { %v2326_v0 = vadd.f32 %v2325_v19, %v2199_v18  ;;  %v2075_v34 = vsel %vm6414_vm10, %v1947_v54, 0.0  ;;  %v1950_v18 = vsub.f32 %v6415_v63, %v5127_v23  ;;  %v6416_v19 = vld [vmem:[#allocation87_spill] sm:$0xff] }
 0x29c   : > { %vm6417_vm11 = vcmp.lt.s32.totalorder %v6416_v19, %v3720_v53  ;;  %v2203_v30 = vmul.f32 %v2075_v34, %v2075_v34  ;;  %v6424_v34 = vld [vmem:[#allocation88_spill] sm:$0xff] }
 0x29d   : > { %v2327_v60 = vadd.f32 %v2326_v0, %v2200_v41  ;;  %v2076_v46 = vsel %vm6417_vm11, %v1948_v11, 0.0  ;;  %v1951_v41 = vsub.f32 %v6418_v49, %v5127_v23  ;;  %v6419_v0 = vld [vmem:[#allocation92_spill] sm:$0xff] }
 0x29e   : > { %vm6420_vm12 = vcmp.lt.s32.totalorder %v6419_v0, %v3720_v53  ;;  %v2204_v33 = vmul.f32 %v2076_v46, %v2076_v46  ;;  %v1954_v46 = vsub.f32 %v4033_v1, %v5127_v23 }
 0x29f   : > { %v2328_v52 = vadd.f32 %v2327_v60, %v2201_v27  ;;  %v2077_v15 = vsel %vm6420_vm12, %v1949_v32, 0.0  ;;  %v1952_v27 = vsub.f32 %v6421_v14, %v5127_v23  ;;  %v6422_v60 = vld [vmem:[#allocation93_spill] sm:$0xff] }
 0x2a0   : > { %vm6423_vm13 = vcmp.lt.s32.totalorder %v6422_v60, %v3720_v53  ;;  %v2205_v19 = vmul.f32 %v2077_v15, %v2077_v15  ;;  %v6429_v15 = vld [vmem:[#allocation100_spill] sm:$0xff] }
 0x2a1   : > { %v2329_v13 = vadd.f32 %v2328_v52, %v2202_v56  ;;  %v2078_v63 = vsel %vm6423_vm13, %v1950_v18, 0.0  ;;  %v1953_v56 = vsub.f32 %v6424_v34, %v5127_v23  ;;  %v6425_v52 = vld [vmem:[#allocation94_spill] sm:$0xff] }
 0x2a2   : > { %vm6426_vm14 = vcmp.lt.s32.totalorder %v6425_v52, %v3720_v53  ;;  %v2206_v0 = vmul.f32 %v2078_v63, %v2078_v63  ;;  %v6432_v63 = vld [vmem:[#allocation106_spill] sm:$0xff] }
 0x2a3   : > { %v2330_v54 = vadd.f32 %v2329_v13, %v2203_v30  ;;  %v2079_v49 = vsel %vm6426_vm14, %v1951_v41, 0.0  ;;  %v6427_v30 = vld [vmem:[#allocation95_spill] sm:$0xff] }
 0x2a4   : > { %vm6428_vm15 = vcmp.lt.s32.totalorder %v6427_v30, %v3720_v53  ;;  %v2207_v14 = vmul.f32 %v2079_v49, %v2079_v49  ;;  %v6435_v49 = vld [vmem:[#allocation6_spill] sm:$0xff] }
 0x2a5   : > { %v2331_v11 = vadd.f32 %v2330_v54, %v2204_v33  ;;  %v2080_v13 = vsel %vm6428_vm15, %v1952_v27, 0.0  ;;  %v1955_v33 = vsub.f32 %v6429_v15, %v5127_v23  ;;  %v6430_v54 = vld [vmem:[#allocation97_spill] sm:$0xff] }
 0x2a6   : > { %vm6431_vm0 = vcmp.lt.s32.totalorder %v6430_v54, %v3720_v53  ;;  %v2208_v34 = vmul.f32 %v2080_v13, %v2080_v13  ;;  %v6438_v13 = vld [vmem:[#allocation8_spill] sm:$0xff] }
 0x2a7   : > { %v2332_v32 = vadd.f32 %v2331_v11, %v2205_v19  ;;  %v2081_v60 = vsel %vm6431_vm0, %v1953_v56, 0.0  ;;  %v1956_v19 = vsub.f32 %v6432_v63, %v5127_v23  ;;  %v6433_v11 = vld [vmem:[#allocation98_spill] sm:$0xff] }
 0x2a8   : > { %vm6434_vm1 = vcmp.lt.s32.totalorder %v6433_v11, %v3720_v53  ;;  %v2209_v52 = vmul.f32 %v2081_v60, %v2081_v60  ;;  %v6441_v60 = vld [vmem:[#allocation9_spill] sm:$0xff] }
 0x2a9   : > { %v2333_v18 = vadd.f32 %v2332_v32, %v2206_v0  ;;  %v2082_v1 = vsel %vm6434_vm1, %v1954_v46, 0.0  ;;  %v1957_v0 = vsub.f32 %v6435_v49, %v5127_v23  ;;  %v6436_v32 = vld [vmem:[#allocation99_spill] sm:$0xff] }
 0x2aa   : > { %vm6437_vm2 = vcmp.lt.s32.totalorder %v6436_v32, %v3720_v53  ;;  %v2210_v15 = vmul.f32 %v2082_v1, %v2082_v1  ;;  %v6444_v1 = vld [vmem:[#allocation11_spill] sm:$0xff] }
 0x2ab   : > { %v2334_v41 = vadd.f32 %v2333_v18, %v2207_v14  ;;  %v2083_v30 = vsel %vm6437_vm2, %v1955_v33, 0.0  ;;  %v1958_v14 = vsub.f32 %v6438_v13, %v5127_v23  ;;  %v6439_v18 = vld [vmem:[#allocation102_spill] sm:$0xff] }
 0x2ac   : > { %vm6440_vm3 = vcmp.lt.s32.totalorder %v6439_v18, %v3720_v53  ;;  %v2211_v63 = vmul.f32 %v2083_v30, %v2083_v30  ;;  %v1961_v30 = vsub.f32 %v3516_v57, %v5127_v23 }
 0x2ad   : > { %v2335_v27 = vadd.f32 %v2334_v41, %v2208_v34  ;;  %v2084_v54 = vsel %vm6440_vm3, %v1956_v19, 0.0  ;;  %v1959_v34 = vsub.f32 %v6441_v60, %v5127_v23  ;;  %v6442_v41 = vld [vmem:[#allocation103_spill] sm:$0xff] }
 0x2ae   : > { %vm6443_vm4 = vcmp.lt.s32.totalorder %v6442_v41, %v3720_v53  ;;  %v2212_v49 = vmul.f32 %v2084_v54, %v2084_v54  ;;  %v1962_v54 = vsub.f32 %v3525_v62, %v5127_v23  ;;  %v6451_v41 = vld [vmem:[#allocation15_spill] sm:$0xff] }
 0x2af   : > { %v2336_v56 = vadd.f32 %v2335_v27, %v2209_v52  ;;  %v2085_v11 = vsel %vm6443_vm4, %v1957_v0, 0.0  ;;  %v1960_v52 = vsub.f32 %v6444_v1, %v5127_v23  ;;  %v6445_v27 = vld [vmem:[#allocation104_spill] sm:$0xff]  ;;  %v6454_v1 = vld [vmem:[#allocation17_spill] sm:$0xff] }
 0x2b0   : > { %vm6446_vm5 = vcmp.lt.s32.totalorder %v6445_v27, %v3720_v53  ;;  %v2213_v13 = vmul.f32 %v2085_v11, %v2085_v11  ;;  %v1963_v11 = vsub.f32 %v6451_v41, %v5127_v23  ;;  %v1964_v27 = vsub.f32 %v6454_v1, %v5127_v23 }
 0x2b1   : > { %v2337_v46 = vadd.f32 %v2336_v56, %v2210_v15  ;;  %v2086_v32 = vsel %vm6446_vm5, %v1958_v14, 0.0  ;;  %v6447_v15 = vld [vmem:[#allocation105_spill] sm:$0xff] }
 0x2b2   : > { %vm6448_vm6 = vcmp.lt.s32.totalorder %v6447_v15, %v3720_v53  ;;  %v2214_v18 = vmul.f32 %v2086_v32, %v2086_v32  ;;  %v6455_v32 = vld [vmem:[#allocation111_spill] sm:$0xff] }
 0x2b3   : > { %v2338_v33 = vadd.f32 %v2337_v46, %v2211_v63  ;;  %v2087_v56 = vsel %vm6448_vm6, %v1959_v34, 0.0  ;;  %v6449_v63 = vld [vmem:[#allocation109_spill] sm:$0xff]  ;;  %vm6456_vm9 = vcmp.lt.s32.totalorder %v6455_v32, %v3720_v53  ;;  %v6466_v32 = vld [vmem:[#allocation28_spill] sm:$0xff] }
 0x2b4   : > { %vm6450_vm7 = vcmp.lt.s32.totalorder %v6449_v63, %v3720_v53  ;;  %v2215_v60 = vmul.f32 %v2087_v56, %v2087_v56  ;;  %v2090_v62 = vsel %vm6456_vm9, %v1962_v54, 0.0  ;;  %v6458_v56 = vld [vmem:[#allocation112_spill] sm:$0xff]  ;;  %v6460_v63 = vld [vmem:[#allocation22_spill] sm:$0xff] }
 0x2b5   : > { %v2339_v19 = vadd.f32 %v2338_v33, %v2212_v49  ;;  %v2088_v46 = vsel %vm6450_vm7, %v1960_v52, 0.0  ;;  %v6452_v49 = vld [vmem:[#allocation110_spill] sm:$0xff]  ;;  %vm6459_vm10 = vcmp.lt.s32.totalorder %v6458_v56, %v3720_v53  ;;  %v1969_v56 = vsub.f32 %v3602_v48, %v5127_v23 }
 0x2b6   : > { %vm6453_vm8 = vcmp.lt.s32.totalorder %v6452_v49, %v3720_v53  ;;  %v2216_v33 = vmul.f32 %v2088_v46, %v2088_v46  ;;  %v1966_v46 = vsub.f32 %v6460_v63, %v5127_v23  ;;  %v6463_v49 = vld [vmem:[#allocation25_spill] sm:$0xff]  ;;  %v1970_v63 = vsub.f32 %v3612_v55, %v5127_v23 }
 0x2b7   : > { %v2340_v0 = vadd.f32 %v2339_v19, %v2213_v13  ;;  %v2089_v57 = vsel %vm6453_vm8, %v1961_v30, 0.0  ;;  %v6457_v19 = vld [vmem:[#allocation19_spill] sm:$0xff] }
 0x2b8   : > { %v2217_v13 = vmul.f32 %v2089_v57, %v2089_v57  ;;  %v1965_v15 = vsub.f32 %v6457_v19, %v5127_v23  ;;  %v1967_v57 = vsub.f32 %v6463_v49, %v5127_v23  ;;  %v6473_v49 = vld [vmem:[#allocation120_spill] sm:$0xff] }
 0x2b9   : > { %v2341_v14 = vadd.f32 %v2340_v0, %v2214_v18  ;;  %v2091_v18 = vsel %vm6459_vm10, %v1963_v11, 0.0  ;;  %v2218_v0 = vmul.f32 %v2090_v62, %v2090_v62  ;;  %v1968_v62 = vsub.f32 %v6466_v32, %v5127_v23 }
 0x2ba   : > { %v2219_v41 = vmul.f32 %v2091_v18, %v2091_v18  ;;  %v6469_v18 = vld [vmem:[#allocation117_spill] sm:$0xff]  ;;  %vm6474_vm0 = vcmp.lt.s32.totalorder %v6473_v49, %v3720_v53 }
 0x2bb   : > { %v2342_v34 = vadd.f32 %v2341_v14, %v2215_v60  ;;  %v6461_v60 = vld [vmem:[#allocation114_spill] sm:$0xff]  ;;  %vm6470_vm14 = vcmp.lt.s32.totalorder %v6469_v18, %v3720_v53  ;;  %v2097_v48 = vsel %vm6474_vm0, %v1969_v56, 0.0  ;;  %v1974_v56 = vsub.f32 %v3661_v40, %v5127_v23  ;;  %v6480_v18 = vld [vmem:[#allocation124_spill] sm:$0xff] }
 0x2bc   : > { %vm6462_vm11 = vcmp.lt.s32.totalorder %v6461_v60, %v3720_v53  ;;  %v6471_v60 = vld [vmem:[#allocation119_spill] sm:$0xff]  ;;  %v2225_v32 = vmul.f32 %v2097_v48, %v2097_v48  ;;  %vm6481_vm3 = vcmp.lt.s32.totalorder %v6480_v18, %v3720_v53  ;;  %v6486_v48 = vld [vmem:[#allocation126_spill] sm:$0xff] }
 0x2bd   : > { %v2343_v52 = vadd.f32 %v2342_v34, %v2216_v33  ;;  %v2092_v14 = vsel %vm6462_vm11, %v1964_v27, 0.0  ;;  %v6464_v33 = vld [vmem:[#allocation115_spill] sm:$0xff]  ;;  %vm6472_vm15 = vcmp.lt.s32.totalorder %v6471_v60, %v3720_v53  ;;  %vm6487_vm5 = vcmp.lt.s32.totalorder %v6486_v48, %v3720_v53 }
 0x2be   : > { %vm6465_vm12 = vcmp.lt.s32.totalorder %v6464_v33, %v3720_v53  ;;  %v2220_v1 = vmul.f32 %v2092_v14, %v2092_v14  ;;  %v2096_v14 = vsel %vm6472_vm15, %v1968_v62, 0.0  ;;  %v2102_v40 = vsel %vm6487_vm5, %v1974_v56, 0.0  ;;  %v6493_v56 = vld [vmem:[#allocation71_spill] sm:$0xff] }
 0x2bf   : > { %v2344_v30 = vadd.f32 %v2343_v52, %v2217_v13  ;;  %v2093_v34 = vsel %vm6465_vm12, %v1965_v15, 0.0  ;;  %v6467_v13 = vld [vmem:[#allocation116_spill] sm:$0xff]  ;;  %v2224_v33 = vmul.f32 %v2096_v14, %v2096_v14  ;;  %v6483_v14 = vld [vmem:[#allocation125_spill] sm:$0xff]  ;;  %v1979_v18 = vsub.f32 %v6493_v56, %v5127_v23  ;;  %v6500_v48 = vld [vmem:[#allocation131_spill] sm:$0xff] }
 0x2c0   : > { %vm6468_vm13 = vcmp.lt.s32.totalorder %v6467_v13, %v3720_v53  ;;  %v2221_v19 = vmul.f32 %v2093_v34, %v2093_v34  ;;  %v6475_v34 = vld [vmem:[#allocation37_spill] sm:$0xff]  ;;  %v1973_v13 = vsub.f32 %v3650_v24, %v5127_v23  ;;  %vm6484_vm4 = vcmp.lt.s32.totalorder %v6483_v14, %v3720_v53 }
 0x2c1   : > { %v2345_v54 = vadd.f32 %v2344_v30, %v2218_v0  ;;  %v2094_v52 = vsel %vm6468_vm13, %v1966_v46, 0.0  ;;  %v2095_v0 = vsel %vm6470_vm14, %v1967_v57, 0.0  ;;  %vm6501_vm10 = vcmp.lt.s32.totalorder %v6500_v48, %v3720_v53 }
 0x2c2   : > { %v2222_v30 = vmul.f32 %v2094_v52, %v2094_v52  ;;  %v6478_v52 = vld [vmem:[#allocation122_spill] sm:$0xff]  ;;  %v2101_v24 = vsel %vm6484_vm4, %v1973_v13, 0.0  ;;  %v1978_v13 = vsub.f32 %v3778_v20, %v5127_v23 }
 0x2c3   : > { %v2346_v11 = vadd.f32 %v2345_v54, %v2219_v41  ;;  %v2223_v41 = vmul.f32 %v2095_v0, %v2095_v0  ;;  %v1971_v54 = vsub.f32 %v3626_v4, %v5127_v23  ;;  %vm6479_vm2 = vcmp.lt.s32.totalorder %v6478_v52, %v3720_v53  ;;  %v6491_v52 = vld [vmem:[#allocation128_spill] sm:$0xff] }
 0x2c4   : > { %vm6492_vm7 = vcmp.lt.s32.totalorder %v6491_v52, %v3720_v53 }
 0x2c5   : > { %v2347_v27 = vadd.f32 %v2346_v11, %v2220_v1  ;;  %v1972_v1 = vsub.f32 %v6475_v34, %v5127_v23  ;;  %v6476_v11 = vld [vmem:[#allocation121_spill] sm:$0xff]  ;;  %v2099_v4 = vsel %vm6479_vm2, %v1971_v54, 0.0  ;;  %v6485_v54 = vld [vmem:[#allocation50_spill] sm:$0xff] }
 0x2c6   : > { %vm6477_vm1 = vcmp.lt.s32.totalorder %v6476_v11, %v3720_v53  ;;  %v1976_v49 = vsub.f32 %v6485_v54, %v5127_v23  ;;  %v6488_v34 = vld [vmem:[#allocation57_spill] sm:$0xff]  ;;  %v6489_v11 = vld [vmem:[#allocation127_spill] sm:$0xff] }
 0x2c7   : > { %v2348_v15 = vadd.f32 %v2347_v27, %v2221_v19  ;;  %v2098_v55 = vsel %vm6477_vm1, %v1970_v63, 0.0  ;;  %v2100_v0 = vsel %vm6481_vm3, %v1972_v1, 0.0  ;;  %v6482_v63 = vld [vmem:[#allocation46_spill] sm:$0xff]  ;;  %v1977_v1 = vsub.f32 %v6488_v34, %v5127_v23  ;;  %v6499_v54 = vld [vmem:[#allocation83_spill] sm:$0xff]  ;;  %v6502_v34 = vld [vmem:[#allocation89_spill] sm:$0xff] }
 0x2c8   : > { %v2226_v19 = vmul.f32 %v2098_v55, %v2098_v55  ;;  %v1975_v60 = vsub.f32 %v6482_v63, %v5127_v23  ;;  %vm6490_vm6 = vcmp.lt.s32.totalorder %v6489_v11, %v3720_v53  ;;  %v6503_v11 = vld [vmem:[#allocation133_spill] sm:$0xff] }
 0x2c9   : > { %v2349_v46 = vadd.f32 %v2348_v15, %v2222_v30  ;;  %v2227_v30 = vmul.f32 %v2099_v4, %v2099_v4  ;;  %v2104_v4 = vsel %vm6492_vm7, %v1976_v49, 0.0  ;;  %v1981_v49 = vsub.f32 %v6499_v54, %v5127_v23 }
 0x2ca   : > { %v2103_v55 = vsel %vm6490_vm6, %v1975_v60, 0.0  ;;  %v6496_v60 = vld [vmem:[#allocation77_spill] sm:$0xff]  ;;  %vm6504_vm11 = vcmp.lt.s32.totalorder %v6503_v11, %v3720_v53 }
 0x2cb   : > { %v2350_v57 = vadd.f32 %v2349_v46, %v2223_v41  ;;  %v2228_v41 = vmul.f32 %v2100_v0, %v2100_v0  ;;  %v6494_v0 = vld [vmem:[#allocation129_spill] sm:$0xff]  ;;  %v1980_v14 = vsub.f32 %v6496_v60, %v5127_v23 }
 0x2cc   : > { %vm6495_vm8 = vcmp.lt.s32.totalorder %v6494_v0, %v3720_v53 }
 0x2cd   : > { %v2351_v62 = vadd.f32 %v2350_v57, %v2224_v33  ;;  %v2229_v33 = vmul.f32 %v2101_v24, %v2101_v24  ;;  %v6497_v24 = vld [vmem:[#allocation130_spill] sm:$0xff] }
 0x2ce   : > { %vm6498_vm9 = vcmp.lt.s32.totalorder %v6497_v24, %v3720_v53 }
 0x2cf   : > { %v2352_v27 = vadd.f32 %v2351_v62, %v2225_v32  ;;  %v2230_v32 = vmul.f32 %v2102_v40, %v2102_v40  ;;  %v2106_v20 = vsel %vm6498_vm9, %v1978_v13, 0.0  ;;  %v2107_v40 = vsel %vm6501_vm10, %v1979_v18, 0.0  ;;  %v6505_v13 = vld [vmem:[#allocation96_spill] sm:$0xff]  ;;  %v6508_v18 = vld [vmem:[#allocation101_spill] sm:$0xff] }
 0x2d0   : > { %v1983_v52 = vsub.f32 %v6505_v13, %v5127_v23  ;;  %v1984_v0 = vsub.f32 %v6508_v18, %v5127_v23 }
 0x2d1   : > { %v2353_v15 = vadd.f32 %v2352_v27, %v2226_v19  ;;  %v2231_v19 = vmul.f32 %v2103_v55, %v2103_v55  ;;  %v2108_v55 = vsel %vm6504_vm11, %v1980_v14, 0.0  ;;  %v6511_v14 = vld [vmem:[#allocation107_spill] sm:$0xff] }
 0x2d2   : > { %v1985_v24 = vsub.f32 %v6511_v14, %v5127_v23 }
 0x2d3   : > { %v2354_v46 = vadd.f32 %v2353_v15, %v2227_v30  ;;  %v2105_v30 = vsel %vm6495_vm8, %v1977_v1, 0.0  ;;  %v2232_v15 = vmul.f32 %v2104_v4, %v2104_v4  ;;  %v1982_v1 = vsub.f32 %v6502_v34, %v5127_v23  ;;  %v6506_v4 = vld [vmem:[#allocation134_spill] sm:$0xff] }
 0x2d4   : > { %vm6507_vm12 = vcmp.lt.s32.totalorder %v6506_v4, %v3720_v53 }
 0x2d5   : > { %v2355_v57 = vadd.f32 %v2354_v46, %v2228_v41  ;;  %v2233_v41 = vmul.f32 %v2105_v30, %v2105_v30  ;;  %v6509_v30 = vld [vmem:[#allocation135_spill] sm:$0xff] }
 0x2d6   : > { %vm6510_vm13 = vcmp.lt.s32.totalorder %v6509_v30, %v3720_v53 }
 0x2d7   : > { %v2356_v62 = vadd.f32 %v2355_v57, %v2229_v33  ;;  %v2234_v33 = vmul.f32 %v2106_v20, %v2106_v20  ;;  %v6512_v20 = vld [vmem:[#allocation136_spill] sm:$0xff] }
 0x2d8   : > { %vm6513_vm14 = vcmp.lt.s32.totalorder %v6512_v20, %v3720_v53 }
 0x2d9   : > { %v2357_v27 = vadd.f32 %v2356_v62, %v2230_v32  ;;  %v2235_v32 = vmul.f32 %v2107_v40, %v2107_v40  ;;  %v6515_v40 = vld [vmem:[#allocation138_spill] sm:$0xff] }
 0x2da   : > { %vm6516_vm15 = vcmp.lt.s32.totalorder %v6515_v40, %v3720_v53 }
 0x2db   : > { %v2358_v63 = vadd.f32 %v2357_v27, %v2231_v19  ;;  %v2109_v19 = vsel %vm6507_vm12, %v1981_v49, 0.0  ;;  %v2236_v27 = vmul.f32 %v2108_v55, %v2108_v55  ;;  %v6514_v49 = vld [vmem:[#allocation113_spill] sm:$0xff]  ;;  %v6518_v55 = vld [vmem:[#allocation139_spill] sm:$0xff] }
 0x2dc   : > { %v1986_v48 = vsub.f32 %v6514_v49, %v5127_v23  ;;  %vm6519_vm0 = vcmp.lt.s32.totalorder %v6518_v55, %v3720_v53 }
 0x2dd   : > { %v2359_v46 = vadd.f32 %v2358_v63, %v2232_v15  ;;  %v2110_v15 = vsel %vm6510_vm13, %v1982_v1, 0.0  ;;  %v2237_v63 = vmul.f32 %v2109_v19, %v2109_v19  ;;  %v6517_v1 = vld [vmem:[#allocation118_spill] sm:$0xff]  ;;  %v6521_v19 = vld [vmem:[#allocation140_spill] sm:$0xff] }
 0x2de   : > { %v1987_v11 = vsub.f32 %v6517_v1, %v5127_v23  ;;  %vm6522_vm1 = vcmp.lt.s32.totalorder %v6521_v19, %v3720_v53 }
 0x2df   : > { %v2360_v57 = vadd.f32 %v2359_v46, %v2233_v41  ;;  %v2111_v41 = vsel %vm6513_vm14, %v1983_v52, 0.0  ;;  %v2238_v46 = vmul.f32 %v2110_v15, %v2110_v15  ;;  %v6520_v52 = vld [vmem:[#allocation123_spill] sm:$0xff]  ;;  %v6524_v15 = vld [vmem:[#allocation141_spill] sm:$0xff] }
 0x2e0   : > { %v1988_v4 = vsub.f32 %v6520_v52, %v5127_v23  ;;  %vm6525_vm2 = vcmp.lt.s32.totalorder %v6524_v15, %v3720_v53 }
 0x2e1   : > { %v2361_v62 = vadd.f32 %v2360_v57, %v2234_v33  ;;  %v2112_v33 = vsel %vm6516_vm15, %v1984_v0, 0.0  ;;  %v2239_v57 = vmul.f32 %v2111_v41, %v2111_v41  ;;  %v6523_v0 = vld [vmem:[#allocation20_spill] sm:$0xff]  ;;  %v6527_v41 = vld [vmem:[#allocation143_spill] sm:$0xff] }
 0x2e2   : > { %v1989_v30 = vsub.f32 %v6523_v0, %v5127_v23  ;;  %vm6528_vm3 = vcmp.lt.s32.totalorder %v6527_v41, %v3720_v53 }
 0x2e3   : > { %v2362_v56 = vadd.f32 %v2361_v62, %v2235_v32  ;;  %v2113_v32 = vsel %vm6519_vm0, %v1985_v24, 0.0  ;;  %v2240_v62 = vmul.f32 %v2112_v33, %v2112_v33  ;;  %v6526_v24 = vld [vmem:[#allocation23_spill] sm:$0xff]  ;;  %v6530_v33 = vld [vmem:[#allocation144_spill] sm:$0xff] }
 0x2e4   : > { %v1990_v20 = vsub.f32 %v6526_v24, %v5127_v23  ;;  %vm6531_vm4 = vcmp.lt.s32.totalorder %v6530_v33, %v3720_v53 }
 0x2e5   : > { %v2363_v60 = vadd.f32 %v2362_v56, %v2236_v27  ;;  %v2114_v27 = vsel %vm6522_vm1, %v1986_v48, 0.0  ;;  %v2241_v56 = vmul.f32 %v2113_v32, %v2113_v32  ;;  %v6529_v48 = vld [vmem:[#allocation26_spill] sm:$0xff]  ;;  %v6533_v32 = vld [vmem:[#allocation145_spill] sm:$0xff]  ;;  %vm6566_vm1 = vcmp.lt.s32.totalorder %v4602_v61, %v3720_v53 }
 0x2e6   : > { %v1991_v40 = vsub.f32 %v6529_v48, %v5127_v23  ;;  %vm6534_vm5 = vcmp.lt.s32.totalorder %v6533_v32, %v3720_v53 }
 0x2e7   : > { %v2364_v54 = vadd.f32 %v2363_v60, %v2237_v63  ;;  %v2115_v63 = vsel %vm6525_vm2, %v1987_v11, 0.0  ;;  %v2242_v60 = vmul.f32 %v2114_v27, %v2114_v27  ;;  %v6532_v11 = vld [vmem:[#allocation29_spill] sm:$0xff]  ;;  %v6536_v27 = vld [vmem:[#allocation146_spill] sm:$0xff] }
 0x2e8   : > { %v1992_v55 = vsub.f32 %v6532_v11, %v5127_v23  ;;  %vm6537_vm6 = vcmp.lt.s32.totalorder %v6536_v27, %v3720_v53 }
 0x2e9   : > { %v2365_v34 = vadd.f32 %v2364_v54, %v2238_v46  ;;  %v2116_v46 = vsel %vm6528_vm3, %v1988_v4, 0.0  ;;  %v2243_v54 = vmul.f32 %v2115_v63, %v2115_v63  ;;  %v6535_v4 = vld [vmem:[#allocation31_spill] sm:$0xff] }
 0x2ea   : > { %v1993_v19 = vsub.f32 %v6535_v4, %v5127_v23  ;;  %v6539_v63 = vld [vmem:[#allocation147_spill] sm:$0xff] }
 0x2eb   : > { %v2366_v13 = vadd.f32 %v2365_v34, %v2239_v57  ;;  %v2117_v57 = vsel %vm6531_vm4, %v1989_v30, 0.0  ;;  %v2244_v34 = vmul.f32 %v2116_v46, %v2116_v46  ;;  %v6538_v30 = vld [vmem:[#allocation33_spill] sm:$0xff]  ;;  %vm6540_vm7 = vcmp.lt.s32.totalorder %v6539_v63, %v3720_v53  ;;  %v6542_v46 = vld [vmem:[#allocation148_spill] sm:$0xff] }
 0x2ec   : > { %v1994_v15 = vsub.f32 %v6538_v30, %v5127_v23  ;;  %vm6543_vm8 = vcmp.lt.s32.totalorder %v6542_v46, %v3720_v53 }
 0x2ed   : > { %v2367_v18 = vadd.f32 %v2366_v13, %v2240_v62  ;;  %v2118_v62 = vsel %vm6534_vm5, %v1990_v20, 0.0  ;;  %v2245_v13 = vmul.f32 %v2117_v57, %v2117_v57  ;;  %v6541_v20 = vld [vmem:[#allocation35_spill] sm:$0xff]  ;;  %v6545_v57 = vld [vmem:[#allocation149_spill] sm:$0xff] }
 0x2ee   : > { %v1995_v41 = vsub.f32 %v6541_v20, %v5127_v23  ;;  %vm6546_vm9 = vcmp.lt.s32.totalorder %v6545_v57, %v3720_v53 }
 0x2ef   : > { %v2368_v14 = vadd.f32 %v2367_v18, %v2241_v56  ;;  %v2119_v56 = vsel %vm6537_vm6, %v1991_v40, 0.0  ;;  %v2246_v18 = vmul.f32 %v2118_v62, %v2118_v62  ;;  %v6544_v40 = vld [vmem:[#allocation38_spill] sm:$0xff] }
 0x2f0   : > { %v1996_v33 = vsub.f32 %v6544_v40, %v5127_v23  ;;  %v6548_v62 = vld [vmem:[#allocation150_spill] sm:$0xff] }
 0x2f1   : > { %v2369_v49 = vadd.f32 %v2368_v14, %v2242_v60  ;;  %v2120_v60 = vsel %vm6540_vm7, %v1992_v55, 0.0  ;;  %v2247_v14 = vmul.f32 %v2119_v56, %v2119_v56  ;;  %v6547_v55 = vld [vmem:[#allocation40_spill] sm:$0xff]  ;;  %vm6549_vm10 = vcmp.lt.s32.totalorder %v6548_v62, %v3720_v53  ;;  %v6562_v62 = vld [vmem:[#allocation157_spill] sm:$0xff] }
 0x2f2   : > { %v1997_v32 = vsub.f32 %v6547_v55, %v5127_v23  ;;  %v6551_v56 = vld [vmem:[#allocation152_spill] sm:$0xff]  ;;  %vm6563_vm15 = vcmp.lt.s32.totalorder %v6562_v62, %v3720_v53  ;;  %v2009_v62 = vsub.f32 %v4135_v2, %v5127_v23 }
 0x2f3   : > { %v2370_v1 = vadd.f32 %v2369_v49, %v2243_v54  ;;  %v2121_v54 = vsel %vm6543_vm8, %v1993_v19, 0.0  ;;  %v2248_v49 = vmul.f32 %v2120_v60, %v2120_v60  ;;  %v6550_v19 = vld [vmem:[#allocation43_spill] sm:$0xff]  ;;  %vm6552_vm11 = vcmp.lt.s32.totalorder %v6551_v56, %v3720_v53  ;;  %v6554_v60 = vld [vmem:[#allocation153_spill] sm:$0xff] }
 0x2f4   : > { %v1998_v27 = vsub.f32 %v6550_v19, %v5127_v23  ;;  %vm6555_vm12 = vcmp.lt.s32.totalorder %v6554_v60, %v3720_v53  ;;  %v2003_v19 = vsub.f32 %v3841_v16, %v5127_v23  ;;  %v2005_v60 = vsub.f32 %v3942_v59, %v5127_v23 }
 0x2f5   : > { %v2371_v52 = vadd.f32 %v2370_v1, %v2244_v34  ;;  %v2122_v34 = vsel %vm6546_vm9, %v1994_v15, 0.0  ;;  %v2249_v1 = vmul.f32 %v2121_v54, %v2121_v54  ;;  %v6553_v15 = vld [vmem:[#allocation47_spill] sm:$0xff]  ;;  %v6557_v54 = vld [vmem:[#allocation154_spill] sm:$0xff] }
 0x2f6   : > { %v1999_v63 = vsub.f32 %v6553_v15, %v5127_v23  ;;  %vm6558_vm13 = vcmp.lt.s32.totalorder %v6557_v54, %v3720_v53  ;;  %v6570_v54 = vld [vmem:[#allocation161_spill] sm:$0xff] }
 0x2f7   : > { %v2372_v0 = vadd.f32 %v2371_v52, %v2245_v13  ;;  %v2123_v13 = vsel %vm6549_vm10, %v1995_v41, 0.0  ;;  %v2250_v52 = vmul.f32 %v2122_v34, %v2122_v34  ;;  %v6556_v41 = vld [vmem:[#allocation51_spill] sm:$0xff]  ;;  %vm6571_vm3 = vcmp.lt.s32.totalorder %v6570_v54, %v3720_v53  ;;  %v6586_v54 = vld [vmem:[#allocation132_spill] sm:$0xff] }
 0x2f8   : > { %v2000_v46 = vsub.f32 %v6556_v41, %v5127_v23  ;;  %v6560_v34 = vld [vmem:[#allocation155_spill] sm:$0xff]  ;;  %v6569_v41 = vld [vmem:[#allocation90_spill] sm:$0xff] }
 0x2f9   : > { %v2373_v24 = vadd.f32 %v2372_v0, %v2246_v18  ;;  %v2124_v18 = vsel %vm6552_vm11, %v1996_v33, 0.0  ;;  %v2251_v0 = vmul.f32 %v2123_v13, %v2123_v13  ;;  %v6559_v33 = vld [vmem:[#allocation58_spill] sm:$0xff]  ;;  %vm6561_vm14 = vcmp.lt.s32.totalorder %v6560_v34, %v3720_v53 }
 0x2fa   : > { %v2001_v57 = vsub.f32 %v6559_v33, %v5127_v23  ;;  %v2128_v13 = vsel %vm6563_vm15, %v2000_v46, 0.0  ;;  %v2006_v46 = vsub.f32 %v6569_v41, %v5127_v23  ;;  %v2008_v34 = vsub.f32 %v4087_v44, %v5127_v23 }
 0x2fb   : > { %v2374_v48 = vadd.f32 %v2373_v24, %v2247_v14  ;;  %v2125_v14 = vsel %vm6555_vm12, %v1997_v32, 0.0  ;;  %v2252_v24 = vmul.f32 %v2124_v18, %v2124_v18  ;;  %v2002_v32 = vsub.f32 %v6299_v7, %v5127_v23 }
 0x2fc   : > { %v2256_v18 = vmul.f32 %v2128_v13, %v2128_v13  ;;  %v6576_v13 = vld [vmem:[#allocation163_spill] sm:$0xff] }
 0x2fd   : > { %v2375_v11 = vadd.f32 %v2374_v48, %v2248_v49  ;;  %v2126_v49 = vsel %vm6558_vm13, %v1998_v27, 0.0  ;;  %v2253_v48 = vmul.f32 %v2125_v14, %v2125_v14  ;;  %v6564_v27 = vld [vmem:[#allocation158_spill] sm:$0xff]  ;;  %v2130_v7 = vsel %vm6566_vm1, %v2002_v32, 0.0  ;;  %v6567_v14 = vld [vmem:[#allocation159_spill] sm:$0xff] }
 0x2fe   : > { %vm6565_vm0 = vcmp.lt.s32.totalorder %v6564_v27, %v3720_v53  ;;  %vm6568_vm2 = vcmp.lt.s32.totalorder %v6567_v14, %v3720_v53  ;;  %vm6577_vm6 = vcmp.lt.s32.totalorder %v6576_v13, %v3720_v53  ;;  %v6578_v27 = vld [vmem:[#allocation165_spill] sm:$0xff] }
 0x2ff   : > { %v2376_v4 = vadd.f32 %v2375_v11, %v2249_v1  ;;  %v2127_v1 = vsel %vm6561_vm14, %v1999_v63, 0.0  ;;  %v2254_v11 = vmul.f32 %v2126_v49, %v2126_v49  ;;  %v2129_v56 = vsel %vm6565_vm0, %v2001_v57, 0.0 }
 0x300   : > { %v2257_v15 = vmul.f32 %v2129_v56, %v2129_v56  ;;  %v2131_v16 = vsel %vm6568_vm2, %v2003_v19, 0.0  ;;  %v2010_v19 = vsub.f32 %v4180_v29, %v5127_v23  ;;  %vm6579_vm7 = vcmp.lt.s32.totalorder %v6578_v27, %v3720_v53 }
 0x301   : > { %v2377_v30 = vadd.f32 %v2376_v4, %v2250_v52  ;;  %v2255_v52 = vmul.f32 %v2127_v1, %v2127_v1  ;;  %v2259_v61 = vmul.f32 %v2131_v16, %v2131_v16  ;;  %v6574_v1 = vld [vmem:[#allocation65_spill] sm:$0xff]  ;;  %v2136_v44 = vsel %vm6579_vm7, %v2008_v34, 0.0 }
 0x302   : > { %vm6575_vm5 = vcmp.lt.s32.totalorder %v6574_v1, %v3720_v53  ;;  %v6592_v1 = vld [vmem:[#allocation142_spill] sm:$0xff] }
 0x303   : > { %v2378_v20 = vadd.f32 %v2377_v30, %v2251_v0  ;;  %v2004_v30 = vsub.f32 %v3888_v36, %v5127_v23 }
 0x305   : > { %v2379_v40 = vadd.f32 %v2378_v20, %v2252_v24  ;;  %v2258_v24 = vmul.f32 %v2130_v7, %v2130_v7  ;;  %v2132_v36 = vsel %vm6571_vm3, %v2004_v30, 0.0  ;;  %v6580_v30 = vld [vmem:[#allocation166_spill] sm:$0xff]  ;;  %v2264_v7 = vmul.f32 %v2136_v44, %v2136_v44  ;;  %v6597_v44 = vld [vmem:[#allocation151_spill] sm:$0xff] }
 0x306   : > { %v2260_v33 = vmul.f32 %v2132_v36, %v2132_v36  ;;  %vm6581_vm8 = vcmp.lt.s32.totalorder %v6580_v30, %v3720_v53  ;;  %v2014_v36 = vsub.f32 %v6586_v54, %v5127_v23 }
 0x307   : > { %v2380_v55 = vadd.f32 %v2379_v40, %v2253_v48  ;;  %v2007_v48 = vsub.f32 %v4043_v31, %v5127_v23  ;;  %v6572_v40 = vld [vmem:[#allocation162_spill] sm:$0xff]  ;;  %v2137_v2 = vsel %vm6581_vm8, %v2009_v62, 0.0 }
 0x308   : > { %vm6573_vm4 = vcmp.lt.s32.totalorder %v6572_v40, %v3720_v53  ;;  %v2265_v14 = vmul.f32 %v2137_v2, %v2137_v2  ;;  %v6589_v40 = vld [vmem:[#allocation137_spill] sm:$0xff] }
 0x309   : > { %v2381_v4 = vadd.f32 %v2380_v55, %v2254_v11  ;;  %v2133_v59 = vsel %vm6573_vm4, %v2005_v60, 0.0  ;;  %v2134_v11 = vsel %vm6575_vm5, %v2006_v46, 0.0  ;;  %v2135_v31 = vsel %vm6577_vm6, %v2007_v48, 0.0  ;;  %v6582_v60 = vld [vmem:[#allocation167_spill] sm:$0xff] }
 0x30a   : > { %v2261_v55 = vmul.f32 %v2133_v59, %v2133_v59  ;;  %v2263_v56 = vmul.f32 %v2135_v31, %v2135_v31  ;;  %vm6583_vm9 = vcmp.lt.s32.totalorder %v6582_v60, %v3720_v53  ;;  %v2015_v59 = vsub.f32 %v6589_v40, %v5127_v23 }
 0x30b   : > { %v2382_v0 = vadd.f32 %v2381_v4, %v2255_v52  ;;  %v2262_v52 = vmul.f32 %v2134_v11, %v2134_v11  ;;  %v2138_v29 = vsel %vm6583_vm9, %v2010_v19, 0.0  ;;  %v2016_v11 = vsub.f32 %v6592_v1, %v5127_v23  ;;  %v6612_v1 = vld [vmem:[#allocation181_spill] sm:$0xff] }
 0x30c   : > { %v2266_v41 = vmul.f32 %v2138_v29, %v2138_v29  ;;  %v2017_v31 = vsub.f32 %v4493_v38, %v5127_v23  ;;  %vm6613_vm4 = vcmp.lt.s32.totalorder %v6612_v1, %v3720_v53 }
 0x30d   : > { %v2383_v63 = vadd.f32 %v2382_v0, %v2256_v18  ;;  %v2011_v0 = vsub.f32 %v4230_v39, %v5127_v23 }
 0x30f   : > { %v2384_v20 = vadd.f32 %v2383_v63, %v2257_v15  ;;  %v2012_v63 = vsub.f32 %v4274_v58, %v5127_v23 }
 0x311   : > { %v2385_v49 = vadd.f32 %v2384_v20, %v2258_v24  ;;  %v2013_v24 = vsub.f32 %v4321_v12, %v5127_v23  ;;  %v6584_v20 = vld [vmem:[#allocation168_spill] sm:$0xff] }
 0x312   : > { %vm6585_vm10 = vcmp.lt.s32.totalorder %v6584_v20, %v3720_v53 }
 0x313   : > { %v2386_v57 = vadd.f32 %v2385_v49, %v2259_v61  ;;  %v2139_v39 = vsel %vm6585_vm10, %v2011_v0, 0.0  ;;  %v6587_v61 = vld [vmem:[#allocation170_spill] sm:$0xff] }
 0x314   : > { %vm6588_vm11 = vcmp.lt.s32.totalorder %v6587_v61, %v3720_v53  ;;  %v2267_v49 = vmul.f32 %v2139_v39, %v2139_v39 }
 0x315   : > { %v2387_v32 = vadd.f32 %v2386_v57, %v2260_v33  ;;  %v2140_v58 = vsel %vm6588_vm11, %v2012_v63, 0.0  ;;  %v6590_v33 = vld [vmem:[#allocation171_spill] sm:$0xff]  ;;  %v6601_v63 = vld [vmem:[#allocation176_spill] sm:$0xff] }
 0x316   : > { %vm6591_vm12 = vcmp.lt.s32.totalorder %v6590_v33, %v3720_v53  ;;  %v2268_v57 = vmul.f32 %v2140_v58, %v2140_v58  ;;  %vm6602_vm0 = vcmp.lt.s32.totalorder %v6601_v63, %v3720_v53  ;;  %v6621_v63 = vld [vmem:[#allocation186_spill] sm:$0xff] }
 0x317   : > { %v2388_v4 = vadd.f32 %v2387_v32, %v2261_v55  ;;  %v2141_v12 = vsel %vm6591_vm12, %v2013_v24, 0.0  ;;  %v6593_v55 = vld [vmem:[#allocation172_spill] sm:$0xff]  ;;  %v2145_v38 = vsel %vm6602_vm0, %v2017_v31, 0.0  ;;  %v6604_v24 = vld [vmem:[#allocation177_spill] sm:$0xff]  ;;  %vm6622_vm8 = vcmp.lt.s32.totalorder %v6621_v63, %v3720_v53  ;;  %v6642_v63 = vld [vmem:[#allocation195_spill] sm:$0xff] }
 0x318   : > { %vm6594_vm13 = vcmp.lt.s32.totalorder %v6593_v55, %v3720_v53  ;;  %v2269_v62 = vmul.f32 %v2141_v12, %v2141_v12  ;;  %vm6605_vm1 = vcmp.lt.s32.totalorder %v6604_v24, %v3720_v53  ;;  %v2273_v39 = vmul.f32 %v2145_v38, %v2145_v38 }
 0x319   : > { %v2389_v18 = vadd.f32 %v2388_v4, %v2262_v52  ;;  %v2142_v32 = vsel %vm6594_vm13, %v2014_v36, 0.0  ;;  %v6595_v52 = vld [vmem:[#allocation173_spill] sm:$0xff]  ;;  %v6607_v36 = vld [vmem:[#allocation178_spill] sm:$0xff] }
 0x31a   : > { %vm6596_vm14 = vcmp.lt.s32.totalorder %v6595_v52, %v3720_v53  ;;  %v2270_v19 = vmul.f32 %v2142_v32, %v2142_v32  ;;  %vm6608_vm2 = vcmp.lt.s32.totalorder %v6607_v36, %v3720_v53  ;;  %v6627_v36 = vld [vmem:[#allocation91_spill] sm:$0xff] }
 0x31b   : > { %v2390_v15 = vadd.f32 %v2389_v18, %v2263_v56  ;;  %v2143_v4 = vsel %vm6596_vm14, %v2015_v59, 0.0  ;;  %v2018_v56 = vsub.f32 %v6597_v44, %v5127_v23  ;;  %v6598_v18 = vld [vmem:[#allocation175_spill] sm:$0xff]  ;;  %v6610_v59 = vld [vmem:[#allocation180_spill] sm:$0xff] }
 0x31c   : > { %vm6599_vm15 = vcmp.lt.s32.totalorder %v6598_v18, %v3720_v53  ;;  %v2271_v30 = vmul.f32 %v2143_v4, %v2143_v4  ;;  %vm6611_vm3 = vcmp.lt.s32.totalorder %v6610_v59, %v3720_v53  ;;  %v6617_v44 = vld [vmem:[#allocation183_spill] sm:$0xff]  ;;  %v6630_v59 = vld [vmem:[#allocation189_spill] sm:$0xff] }
 0x31d   : > { %v2391_v16 = vadd.f32 %v2390_v15, %v2264_v7  ;;  %v2144_v0 = vsel %vm6599_vm15, %v2016_v11, 0.0  ;;  %v6600_v7 = vld [vmem:[#allocation156_spill] sm:$0xff]  ;;  %v2146_v20 = vsel %vm6605_vm1, %v2018_v56, 0.0  ;;  %vm6618_vm6 = vcmp.lt.s32.totalorder %v6617_v44, %v3720_v53 }
 0x31e   : > { %v2019_v15 = vsub.f32 %v6600_v7, %v5127_v23  ;;  %v2272_v60 = vmul.f32 %v2144_v0, %v2144_v0  ;;  %v2274_v58 = vmul.f32 %v2146_v20, %v2146_v20  ;;  %v2026_v0 = vsub.f32 %v3788_v43, %v5127_v23 }
 0x31f   : > { %v2392_v46 = vadd.f32 %v2391_v16, %v2265_v14  ;;  %v6603_v14 = vld [vmem:[#allocation160_spill] sm:$0xff]  ;;  %vm6631_vm12 = vcmp.lt.s32.totalorder %v6630_v59, %v3720_v53  ;;  %vm6641_vm1 = vcmp.lt.s32.totalorder %v4925_v47, %v3720_v53 }
 0x320   : > { %v2020_v16 = vsub.f32 %v6603_v14, %v5127_v23  ;;  %v2147_v61 = vsel %vm6608_vm2, %v2019_v15, 0.0  ;;  %v2027_v15 = vsub.f32 %v3843_v6, %v5127_v23  ;;  %v2028_v14 = vsub.f32 %v3890_v9, %v5127_v23 }
 0x321   : > { %v2393_v48 = vadd.f32 %v2392_v46, %v2266_v41  ;;  %v6606_v46 = vld [vmem:[#allocation41_spill] sm:$0xff]  ;;  %v2275_v12 = vmul.f32 %v2147_v61, %v2147_v61  ;;  %v2030_v61 = vsub.f32 %v6627_v36, %v5127_v23  ;;  %vm6643_vm2 = vcmp.lt.s32.totalorder %v6642_v63, %v3720_v53 }
 0x322   : > { %v2021_v54 = vsub.f32 %v6606_v46, %v5127_v23  ;;  %v2148_v33 = vsel %vm6611_vm3, %v2020_v16, 0.0  ;;  %v6623_v16 = vld [vmem:[#allocation187_spill] sm:$0xff]  ;;  %v2041_v36 = vsub.f32 %v4495_v17, %v5127_v23 }
 0x323   : > { %v2394_v34 = vadd.f32 %v2393_v48, %v2267_v49  ;;  %v6609_v48 = vld [vmem:[#allocation44_spill] sm:$0xff]  ;;  %v2276_v55 = vmul.f32 %v2148_v33, %v2148_v33  ;;  %vm6624_vm9 = vcmp.lt.s32.totalorder %v6623_v16, %v3720_v53 }
 0x324   : > { %v2022_v40 = vsub.f32 %v6609_v48, %v5127_v23  ;;  %v2149_v11 = vsel %vm6613_vm4, %v2021_v54, 0.0  ;;  %v2154_v43 = vsel %vm6624_vm9, %v2026_v0, 0.0 }
 0x325   : > { %v2395_v13 = vadd.f32 %v2394_v34, %v2268_v57  ;;  %v2023_v34 = vsub.f32 %v6328_v28, %v5127_v23  ;;  %v2277_v52 = vmul.f32 %v2149_v11, %v2149_v11  ;;  %v2282_v46 = vmul.f32 %v2154_v43, %v2154_v43 }
 0x326   : > { %v2039_v43 = vsub.f32 %v4409_v35, %v5127_v23 }
 0x327   : > { %v2396_v27 = vadd.f32 %v2395_v13, %v2269_v62  ;;  %v2024_v62 = vsub.f32 %v6330_v50, %v5127_v23  ;;  %v6614_v13 = vld [vmem:[#allocation182_spill] sm:$0xff]  ;;  %v2151_v28 = vsel %vm6618_vm6, %v2023_v34, 0.0 }
 0x328   : > { %vm6615_vm5 = vcmp.lt.s32.totalorder %v6614_v13, %v3720_v53  ;;  %v6632_v34 = vld [vmem:[#allocation190_spill] sm:$0xff]  ;;  %v6635_v13 = vld [vmem:[#allocation191_spill] sm:$0xff] }
 0x329   : > { %v2397_v2 = vadd.f32 %v2396_v27, %v2270_v19  ;;  %v2150_v31 = vsel %vm6615_vm5, %v2022_v40, 0.0  ;;  %v6616_v19 = vld [vmem:[#allocation59_spill] sm:$0xff]  ;;  %v2031_v40 = vsub.f32 %v4045_v25, %v5127_v23  ;;  %vm6633_vm13 = vcmp.lt.s32.totalorder %v6632_v34, %v3720_v53 }
 0x32a   : > { %v2025_v27 = vsub.f32 %v6616_v19, %v5127_v23  ;;  %v2278_v56 = vmul.f32 %v2150_v31, %v2150_v31  ;;  %v2158_v1 = vsel %vm6633_vm13, %v2030_v61, 0.0  ;;  %vm6636_vm14 = vcmp.lt.s32.totalorder %v6635_v13, %v3720_v53  ;;  %v6637_v19 = vld [vmem:[#allocation193_spill] sm:$0xff]  ;;  %v6650_v61 = vld [vmem:[#allocation200_spill] sm:$0xff] }
 0x32b   : > { %v2398_v29 = vadd.f32 %v2397_v2, %v2271_v30  ;;  %v6619_v30 = vld [vmem:[#allocation185_spill] sm:$0xff]  ;;  %v2279_v2 = vmul.f32 %v2151_v28, %v2151_v28  ;;  %v2159_v25 = vsel %vm6636_vm14, %v2031_v40, 0.0  ;;  %v2286_v31 = vmul.f32 %v2158_v1, %v2158_v1  ;;  %v6656_v1 = vld [vmem:[#allocation203_spill] sm:$0xff]  ;;  %v6659_v13 = vld [vmem:[#allocation204_spill] sm:$0xff] }
 0x32c   : > { %vm6620_vm7 = vcmp.lt.s32.totalorder %v6619_v30, %v3720_v53  ;;  %v2153_v38 = vsel %vm6622_vm8, %v2025_v27, 0.0  ;;  %vm6638_vm15 = vcmp.lt.s32.totalorder %v6637_v19, %v3720_v53  ;;  %v2287_v27 = vmul.f32 %v2159_v25, %v2159_v25  ;;  %v6662_v19 = vld [vmem:[#allocation205_spill] sm:$0xff] }
 0x32d   : > { %v2399_v41 = vadd.f32 %v2398_v29, %v2272_v60  ;;  %v2152_v50 = vsel %vm6620_vm7, %v2024_v62, 0.0  ;;  %v2281_v24 = vmul.f32 %v2153_v38, %v2153_v38  ;;  %v2035_v28 = vsub.f32 %v4232_v45, %v5127_v23 }
 0x32e   : > { %v2280_v60 = vmul.f32 %v2152_v50, %v2152_v50  ;;  %v2036_v50 = vsub.f32 %v4276_v26, %v5127_v23  ;;  %vm6651_vm6 = vcmp.lt.s32.totalorder %v6650_v61, %v3720_v53  ;;  %v2044_v34 = vsub.f32 %v4623_v21, %v5127_v23 }
 0x32f   : > { %v2400_v49 = vadd.f32 %v2399_v41, %v2273_v39  ;;  %v2029_v39 = vsub.f32 %v3944_v51, %v5127_v23  ;;  %v6625_v41 = vld [vmem:[#allocation48_spill] sm:$0xff]  ;;  %v2163_v45 = vsel %vm6643_vm2, %v2035_v28, 0.0  ;;  %v2167_v35 = vsel %vm6651_vm6, %v2039_v43, 0.0  ;;  %v6674_v43 = vld [vmem:[#allocation209_spill] sm:$0xff] }
 0x330   : > { %vm6626_vm10 = vcmp.lt.s32.totalorder %v6625_v41, %v3720_v53  ;;  %v2291_v47 = vmul.f32 %v2163_v45, %v2163_v45  ;;  %v2040_v41 = vsub.f32 %v4451_v5, %v5127_v23  ;;  %v2295_v40 = vmul.f32 %v2167_v35, %v2167_v35  ;;  %v6670_v45 = vld [vmem:[#allocation184_spill] sm:$0xff]  ;;  %v6680_v35 = vld [vmem:[#allocation211_spill] sm:$0xff] }
 0x331   : > { %v2401_v57 = vadd.f32 %v2400_v49, %v2274_v58  ;;  %v2155_v6 = vsel %vm6626_vm10, %v2027_v15, 0.0  ;;  %v6628_v58 = vld [vmem:[#allocation188_spill] sm:$0xff]  ;;  %v2157_v51 = vsel %vm6631_vm12, %v2029_v39, 0.0  ;;  %v2037_v15 = vsub.f32 %v4323_v3, %v5127_v23 }
 0x332   : > { %vm6629_vm11 = vcmp.lt.s32.totalorder %v6628_v58, %v3720_v53  ;;  %v2283_v49 = vmul.f32 %v2155_v6, %v2155_v6  ;;  %v2285_v11 = vmul.f32 %v2157_v51, %v2157_v51  ;;  %v6648_v6 = vld [vmem:[#allocation199_spill] sm:$0xff]  ;;  %v2043_v51 = vsub.f32 %v4581_v42, %v5127_v23 }
 0x333   : > { %v2402_v32 = vadd.f32 %v2401_v57, %v2275_v12  ;;  %v2156_v9 = vsel %vm6629_vm11, %v2028_v14, 0.0  ;;  %v2032_v57 = vsub.f32 %v4089_v22, %v5127_v23  ;;  %v6644_v14 = vld [vmem:[#allocation197_spill] sm:$0xff]  ;;  %vm6649_vm5 = vcmp.lt.s32.totalorder %v6648_v6, %v3720_v53  ;;  %v6677_v6 = vld [vmem:[#allocation210_spill] sm:$0xff] }
 0x334   : > { %v2284_v33 = vmul.f32 %v2156_v9, %v2156_v9  ;;  %vm6645_vm3 = vcmp.lt.s32.totalorder %v6644_v14, %v3720_v53  ;;  %vm6657_vm9 = vcmp.lt.s32.totalorder %v6656_v1, %v3720_v53  ;;  %vm6660_vm10 = vcmp.lt.s32.totalorder %v6659_v13, %v3720_v53 }
 0x335   : > { %v2403_v4 = vadd.f32 %v2402_v32, %v2276_v55  ;;  %v6634_v32 = vld [vmem:[#allocation108_spill] sm:$0xff]  ;;  %v2160_v22 = vsel %vm6638_vm15, %v2032_v57, 0.0  ;;  %v2164_v26 = vsel %vm6645_vm3, %v2036_v50, 0.0  ;;  %v2171_v42 = vsel %vm6660_vm10, %v2043_v51, 0.0  ;;  %v6667_v50 = vld [vmem:[#allocation179_spill] sm:$0xff]  ;;  %v6684_v51 = vld [vmem:[#allocation213_spill] sm:$0xff] }
 0x336   : > { %v2033_v62 = vsub.f32 %v6634_v32, %v5127_v23  ;;  %v2288_v0 = vmul.f32 %v2160_v22, %v2160_v22  ;;  %v6658_v32 = vld [vmem:[#allocation164_spill] sm:$0xff]  ;;  %vm6663_vm11 = vcmp.lt.s32.totalorder %v6662_v19, %v3720_v53  ;;  %v2299_v22 = vmul.f32 %v2171_v42, %v2171_v42 }
 0x337   : > { %v2404_v18 = vadd.f32 %v2403_v4, %v2277_v52  ;;  %v2034_v4 = vsub.f32 %v4182_v10, %v5127_v23  ;;  %v2172_v21 = vsel %vm6663_vm11, %v2044_v34, 0.0  ;;  %vm6675_vm15 = vcmp.lt.s32.totalorder %v6674_v43, %v3720_v53 }
 0x338   : > { %vm6685_vm3 = vcmp.lt.s32.totalorder %v6684_v51, %v3720_v53 }
 0x339   : > { %v2405_v7 = vadd.f32 %v2404_v18, %v2278_v56  ;;  %v6639_v56 = vld [vmem:[#allocation194_spill] sm:$0xff]  ;;  %v2162_v10 = vsel %vm6641_vm1, %v2034_v4, 0.0  ;;  %vm6681_vm1 = vcmp.lt.s32.totalorder %v6680_v35, %v3720_v53 }
 0x33a   : > { %vm6640_vm0 = vcmp.lt.s32.totalorder %v6639_v56, %v3720_v53  ;;  %v2290_v38 = vmul.f32 %v2162_v10, %v2162_v10  ;;  %v6665_v56 = vld [vmem:[#allocation206_spill] sm:$0xff]  ;;  %v2048_v10 = vsub.f32 %v6667_v50, %v5127_v23 }
 0x33b   : > { %v2406_v29 = vadd.f32 %v2405_v7, %v2279_v2  ;;  %v2161_v18 = vsel %vm6640_vm0, %v2033_v62, 0.0  ;;  %v2045_v62 = vsub.f32 %v6658_v32, %v5127_v23  ;;  %vm6666_vm12 = vcmp.lt.s32.totalorder %v6665_v56, %v3720_v53 }
 0x33c   : > { %v2289_v2 = vmul.f32 %v2161_v18, %v2161_v18  ;;  %vm6678_vm0 = vcmp.lt.s32.totalorder %v6677_v6, %v3720_v53 }
 0x33d   : > { %v2407_v20 = vadd.f32 %v2406_v29, %v2280_v60  ;;  %v2038_v29 = vsub.f32 %v4365_v37, %v5127_v23  ;;  %v2173_v18 = vsel %vm6666_vm12, %v2045_v62, 0.0 }
 0x33f   : > { %v2408_v54 = vadd.f32 %v2407_v20, %v2281_v24  ;;  %v6646_v24 = vld [vmem:[#allocation198_spill] sm:$0xff]  ;;  %v2292_v20 = vmul.f32 %v2164_v26, %v2164_v26  ;;  %v2166_v37 = vsel %vm6649_vm5, %v2038_v29, 0.0 }
 0x340   : > { %vm6647_vm4 = vcmp.lt.s32.totalorder %v6646_v24, %v3720_v53  ;;  %v2294_v58 = vmul.f32 %v2166_v37, %v2166_v37  ;;  %v2176_v24 = vsel %vm6675_vm15, %v2048_v10, 0.0 }
 0x341   : > { %v2409_v48 = vadd.f32 %v2408_v54, %v2282_v46  ;;  %v2165_v3 = vsel %vm6647_vm4, %v2037_v15, 0.0  ;;  %v2301_v15 = vmul.f32 %v2173_v18, %v2173_v18 }
 0x342   : > { %v2293_v46 = vmul.f32 %v2165_v3, %v2165_v3 }
 0x343   : > { %v2410_v12 = vadd.f32 %v2409_v48, %v2283_v49  ;;  %v2042_v49 = vsub.f32 %v4537_v8, %v5127_v23  ;;  %v6652_v48 = vld [vmem:[#allocation201_spill] sm:$0xff] }
 0x344   : > { %vm6653_vm7 = vcmp.lt.s32.totalorder %v6652_v48, %v3720_v53  ;;  %v6682_v48 = vld [vmem:[#allocation212_spill] sm:$0xff] }
 0x345   : > { %v2411_v55 = vadd.f32 %v2410_v12, %v2284_v33  ;;  %v2168_v5 = vsel %vm6653_vm7, %v2040_v41, 0.0  ;;  %v6654_v33 = vld [vmem:[#allocation202_spill] sm:$0xff]  ;;  %v2170_v8 = vsel %vm6657_vm9, %v2042_v49, 0.0  ;;  %vm6683_vm2 = vcmp.lt.s32.totalorder %v6682_v48, %v3720_v53 }
 0x346   : > { %vm6655_vm8 = vcmp.lt.s32.totalorder %v6654_v33, %v3720_v53  ;;  %v2296_v12 = vmul.f32 %v2168_v5, %v2168_v5  ;;  %v2298_v25 = vmul.f32 %v2170_v8, %v2170_v8 }
 0x347   : > { %v2412_v52 = vadd.f32 %v2411_v55, %v2285_v11  ;;  %v2169_v17 = vsel %vm6655_vm8, %v2041_v36, 0.0  ;;  %v6679_v36 = vld [vmem:[#allocation196_spill] sm:$0xff] }
 0x348   : > { %v2297_v11 = vmul.f32 %v2169_v17, %v2169_v17  ;;  %v2052_v61 = vsub.f32 %v6679_v36, %v5127_v23 }
 0x349   : > { %v2413_v44 = vadd.f32 %v2412_v52, %v2286_v31  ;;  %v6661_v52 = vld [vmem:[#allocation169_spill] sm:$0xff] }
 0x34a   : > { %v2046_v4 = vsub.f32 %v6661_v52, %v5127_v23  ;;  %v2180_v33 = vsel %vm6685_vm3, %v2052_v61, 0.0 }
 0x34b   : > { %v2414_v30 = vadd.f32 %v2413_v44, %v2287_v27  ;;  %v6664_v44 = vld [vmem:[#allocation174_spill] sm:$0xff] }
 0x34c   : > { %v2047_v28 = vsub.f32 %v6664_v44, %v5127_v23 }
 0x34d   : > { %v2415_v7 = vadd.f32 %v2414_v30, %v2288_v0  ;;  %v2300_v0 = vmul.f32 %v2172_v21, %v2172_v21 }
 0x34f   : > { %v2416_v60 = vadd.f32 %v2415_v7, %v2289_v2  ;;  %v6668_v2 = vld [vmem:[#allocation207_spill] sm:$0xff] }
 0x350   : > { %vm6669_vm13 = vcmp.lt.s32.totalorder %v6668_v2, %v3720_v53 }
 0x351   : > { %v2417_v16 = vadd.f32 %v2416_v60, %v2290_v38  ;;  %v2174_v7 = vsel %vm6669_vm13, %v2046_v4, 0.0  ;;  %v2049_v38 = vsub.f32 %v6670_v45, %v5127_v23  ;;  %v6671_v60 = vld [vmem:[#allocation208_spill] sm:$0xff] }
 0x352   : > { %vm6672_vm14 = vcmp.lt.s32.totalorder %v6671_v60, %v3720_v53  ;;  %v2302_v14 = vmul.f32 %v2174_v7, %v2174_v7 }
 0x353   : > { %v2418_v39 = vadd.f32 %v2417_v16, %v2291_v47  ;;  %v2175_v29 = vsel %vm6672_vm14, %v2047_v28, 0.0  ;;  %v6673_v47 = vld [vmem:[#allocation52_spill] sm:$0xff]  ;;  %v2177_v37 = vsel %vm6678_vm0, %v2049_v38, 0.0 }
 0x354   : > { %v2050_v16 = vsub.f32 %v6673_v47, %v5127_v23  ;;  %v2303_v3 = vmul.f32 %v2175_v29, %v2175_v29 }
 0x355   : > { %v2419_v54 = vadd.f32 %v2418_v39, %v2292_v20  ;;  %v6676_v39 = vld [vmem:[#allocation192_spill] sm:$0xff] }
 0x356   : > { %v2051_v41 = vsub.f32 %v6676_v39, %v5127_v23  ;;  %v2308_v23 = vmul.f32 %v2180_v33, %v2180_v33 }
 0x357   : > { %v2420_v9 = vadd.f32 %v2419_v54, %v2293_v46  ;;  %v2304_v46 = vmul.f32 %v2176_v24, %v2176_v24 }
 0x358   : > { %v2179_v5 = vsel %vm6683_vm2, %v2051_v41, 0.0 }
 0x359   : > { %v2421_v59 = vadd.f32 %v2420_v9, %v2294_v58  ;;  %v2178_v58 = vsel %vm6681_vm1, %v2050_v16, 0.0  ;;  %v2305_v9 = vmul.f32 %v2177_v37, %v2177_v37  ;;  %v2307_v17 = vmul.f32 %v2179_v5, %v2179_v5 }
 0x35b   : > { %v2422_v57 = vadd.f32 %v2421_v59, %v2295_v40  ;;  %v2306_v40 = vmul.f32 %v2178_v58, %v2178_v58 }
 0x35d   : > { %v2423_v55 = vadd.f32 %v2422_v57, %v2296_v12 }
 0x35f   : > { %v2424_v31 = vadd.f32 %v2423_v55, %v2297_v11 }
 0x361   : > { %v2425_v27 = vadd.f32 %v2424_v31, %v2298_v25 }
 0x363   : > { %v2426_v30 = vadd.f32 %v2425_v27, %v2299_v22 }
 0x365   : > { %v2427_v63 = vadd.f32 %v2426_v30, %v2300_v0 }
 0x367   : > { %v2428_v26 = vadd.f32 %v2427_v63, %v2301_v15 }
 0x369   : > { %v2429_v20 = vadd.f32 %v2428_v26, %v2302_v14 }
 0x36b   : > { %v2430_v54 = vadd.f32 %v2429_v20, %v2303_v3 }
 0x36d   : > { %v2431_v49 = vadd.f32 %v2430_v54, %v2304_v46 }
 0x36f   : > { %v2432_v59 = vadd.f32 %v2431_v49, %v2305_v9 }
 0x371   : > { %v2433_v12 = vadd.f32 %v2432_v59, %v2306_v40 }
 0x373   : > { %v2434_v57 = vadd.f32 %v2433_v12, %v2307_v17 }
 0x375   : > { %v2435_v34 = vadd.f32 %v2434_v57, %v2308_v23 }
 0x377   : > { %v2436_v1 = vrot.slane %v2435_v34, 4 }
 0x379   : > { %v2437_v8 = vadd.f32 %v2436_v1, %v2435_v34 }
 0x37b   : > { %v2438_v11 = vrot.slane %v2437_v8, 2 }
 0x37d   : > { %v2439_v55 = vadd.f32 %v2438_v11, %v2437_v8 }
 0x37f   : > { %v2440_v32 = vrot.slane %v2439_v55, 1 }
 0x381   : > { %v2441_v62 = vadd.f32 %v2440_v32, %v2439_v55 }
 0x383   : > { %2443 = vst [vmem:[%s221_s27] sm:$0xff] %v2441_v62 }
 0x384 PF: > { %s15_s15 = sadd.s32 1, %s3366_s15  }
 0x385   : > { %p12_p7 = scmp.ge.s32.totalorder %s15_s15, 4  }
 0x387   :  { %14 = sbr.rel (!%p12_p7) target bundleno = 1 (0x1), region = 82 }

// kernel: upsample_block_forward.5
= control target key start
LH: loop header
LB: loop body
LE: loop exit
PB: predicated region body
PF: predicated region fallthrough
CT: control target
= control target key end

     0   :  { %s1377_s12 = smov 0   ;;  %s1998_s0 = inlined_call_operand.vmem [shape: bf16[2048,128], index: 0, kind: input, shape index: {}]   ;;  %s1999_s1 = inlined_call_operand.vmem [shape: f32[1,128], index: 1, kind: input, shape index: {}]   ;;  %s2000_s2 = inlined_call_operand.vmem [shape: f32[1,128], index: 2, kind: input, shape index: {}]   ;;  %s2001_s3 = inlined_call_operand.vmem [shape: f32[2048,8], index: 3, kind: output, shape index: {}]  }
   0x1 LB: > { %s1007_s13 = sadd.s32 4294967295, %s1355_s12   ;;  %p1011_p0 = scmp.ge.s32.totalorder %s1355_s12, 1  ;;  %s1355_s12 = sphi %s1377_s12, %s13_s12  }
   0x2   : > { %p138_p1 = scmp.lt.s32.totalorder %s1355_s12, 3 }
   0x4   : > { %p139_p2 = pnand %p1011_p0, %p138_p1 }
   0x5   : > { %s1012_s14 = sshll.u32 (!%p139_p2), %s1007_s13, 7 }
   0x6   : > { %142 = sbr.rel (%p139_p2) target bundleno = 151 (0x97), region = 32  ;;  %p163_p3 = scmp.lt.s32.totalorder (!%p139_p2), %s1012_s14, 255 }
   0xb   : > { %s2003_s14 = smov (!%p163_p3, %s1012_s14), 255  ;;  %v1396_v0 = vld [vmem:[%s1999_s1] ss:$0 sm:$0xff]  ;;  %vm822_vm0 = vcmask 64512  }
   0xc   : > { %s1013_s15 = sshll.u32 %s2003_s14, 2  ;;  %v1404_v5 = vld [vmem:[%s2000_s2] ss:$0 sm:$0xff]  ;;  %s1015_s23 = sshll.u32 %s2003_s14, 3 }
   0xd   : > { %s1391_s18 = scalar_lea.vmem %s1998_s0, %s1013_s15  ;;  %s1423_s26 = scalar_lea.vmem %s2001_s3, %s1015_s23 }
   0xe   : > { %v1019_v1 = vld [vmem:[%s1391_s18] sm:$0xff]   ;;  %v1274_v2 = vld [vmem:[%s1391_s18 + $0x8] sm:$0xff]   ;;  %v1275_v3 = vld [vmem:[%s1391_s18 + $0x10] sm:$0xff]  }
   0xf   : > { %v1020_v4 = vunpack.c.l.bf16 %v1019_v1  ;;  %v1021_v6 = vunpack.c.h.bf16 %v1019_v1  ;;  %v1024_v7 = vunpack.c.l.bf16 %v1274_v2  ;;  %v1025_v8 = vunpack.c.h.bf16 %v1274_v2  ;;  %v1276_v9 = vld [vmem:[%s1391_s18 + $0x18] sm:$0xff]   ;;  %v1277_v30 = vld [vmem:[%s1391_s18 + $0x20] sm:$0xff]   ;;  %v1278_v31 = vld [vmem:[%s1391_s18 + $0x28] sm:$0xff]  }
  0x10   : > { %v1028_v10 = vunpack.c.l.bf16 %v1275_v3  ;;  %v1029_v11 = vunpack.c.h.bf16 %v1275_v3  ;;  %v1032_v12 = vunpack.c.l.bf16 %v1276_v9  ;;  %v1033_v13 = vunpack.c.h.bf16 %v1276_v9  ;;  %v1279_v36 = vld [vmem:[%s1391_s18 + $0x30] sm:$0xff]   ;;  %v1280_v37 = vld [vmem:[%s1391_s18 + $0x38] sm:$0xff]   ;;  %v1281_v3 = vld [vmem:[%s1391_s18 + $0x40] sm:$0xff]  }
  0x11   : > { %v434_v14 = vmul.f32 %v1396_v0, %v1020_v4  ;;  %v435_v15 = vmul.f32 %v1396_v0, %v1021_v6  ;;  %v436_v16 = vmul.f32 %v1396_v0, %v1024_v7  ;;  %v437_v17 = vmul.f32 %v1396_v0, %v1025_v8  ;;  %v1282_v4 = vld [vmem:[%s1391_s18 + $0x48] sm:$0xff]   ;;  %v1283_v6 = vld [vmem:[%s1391_s18 + $0x50] sm:$0xff]  }
  0x12   : > { %v438_v18 = vmul.f32 %v1396_v0, %v1028_v10  ;;  %v439_v19 = vmul.f32 %v1396_v0, %v1029_v11  ;;  %v440_v20 = vmul.f32 %v1396_v0, %v1032_v12  ;;  %v441_v21 = vmul.f32 %v1396_v0, %v1033_v13  ;;  %v1284_v11 = vld [vmem:[%s1391_s18 + $0x58] sm:$0xff]  }
  0x13   : > { %v566_v22 = vadd.f32 %v1404_v5, %v434_v14  ;;  %v567_v23 = vadd.f32 %v1404_v5, %v435_v15  ;;  %v568_v24 = vadd.f32 %v1404_v5, %v436_v16  ;;  %v569_v25 = vadd.f32 %v1404_v5, %v437_v17 }
  0x14   : > { %v570_v26 = vadd.f32 %v1404_v5, %v438_v18  ;;  %v571_v27 = vadd.f32 %v1404_v5, %v439_v19  ;;  %v572_v28 = vadd.f32 %v1404_v5, %v440_v20  ;;  %v573_v29 = vadd.f32 %v1404_v5, %v441_v21 }
  0x15   : > { %v694_v32 = vmax.f32 %v566_v22, 0.0  ;;  %v695_v33 = vmax.f32 %v567_v23, 0.0  ;;  %v696_v34 = vmax.f32 %v568_v24, 0.0  ;;  %v697_v35 = vmax.f32 %v569_v25, 0.0 }
  0x16   : > { %v698_v38 = vmax.f32 %v570_v26, 0.0  ;;  %v699_v39 = vmax.f32 %v571_v27, 0.0  ;;  %v700_v40 = vmax.f32 %v572_v28, 0.0  ;;  %v701_v41 = vmax.f32 %v573_v29, 0.0 }
  0x17   : > { %823 = vst.msk [vmem:[%s1423_s26] sm:$0xff] %vm822_vm0, %v694_v32  ;;  %v1036_v42 = vunpack.c.l.bf16 %v1277_v30  ;;  %v1037_v43 = vunpack.c.h.bf16 %v1277_v30  ;;  %v1040_v44 = vunpack.c.l.bf16 %v1278_v31  ;;  %v1041_v45 = vunpack.c.h.bf16 %v1278_v31 }
  0x18   : > { %824 = vst.msk [vmem:[%s1423_s26 + $0x8] sm:$0xff] %vm822_vm0, %v695_v33  ;;  %v1044_v46 = vunpack.c.l.bf16 %v1279_v36  ;;  %v1045_v47 = vunpack.c.h.bf16 %v1279_v36  ;;  %v1048_v48 = vunpack.c.l.bf16 %v1280_v37  ;;  %v1049_v49 = vunpack.c.h.bf16 %v1280_v37 }
  0x19   : > { %825 = vst.msk [vmem:[%s1423_s26 + $0x10] sm:$0xff] %vm822_vm0, %v696_v34  ;;  %v442_v50 = vmul.f32 %v1396_v0, %v1036_v42  ;;  %v443_v51 = vmul.f32 %v1396_v0, %v1037_v43  ;;  %v444_v52 = vmul.f32 %v1396_v0, %v1040_v44  ;;  %v445_v53 = vmul.f32 %v1396_v0, %v1041_v45  ;;  %v1287_v42 = vld [vmem:[%s1391_s18 + $0x70] sm:$0xff]  }
  0x1a   : > { %826 = vst.msk [vmem:[%s1423_s26 + $0x18] sm:$0xff] %vm822_vm0, %v697_v35  ;;  %v446_v54 = vmul.f32 %v1396_v0, %v1044_v46  ;;  %v447_v55 = vmul.f32 %v1396_v0, %v1045_v47  ;;  %v448_v56 = vmul.f32 %v1396_v0, %v1048_v48  ;;  %v449_v57 = vmul.f32 %v1396_v0, %v1049_v49  ;;  %v1288_v47 = vld [vmem:[%s1391_s18 + $0x78] sm:$0xff]  }
  0x1b   : > { %827 = vst.msk [vmem:[%s1423_s26 + $0x20] sm:$0xff] %vm822_vm0, %v698_v38  ;;  %v574_v58 = vadd.f32 %v1404_v5, %v442_v50  ;;  %v575_v59 = vadd.f32 %v1404_v5, %v443_v51  ;;  %v576_v60 = vadd.f32 %v1404_v5, %v444_v52  ;;  %v577_v61 = vadd.f32 %v1404_v5, %v445_v53 }
  0x1c   : > { %828 = vst.msk [vmem:[%s1423_s26 + $0x28] sm:$0xff] %vm822_vm0, %v699_v39  ;;  %v578_v62 = vadd.f32 %v1404_v5, %v446_v54  ;;  %v579_v63 = vadd.f32 %v1404_v5, %v447_v55  ;;  %v580_v1 = vadd.f32 %v1404_v5, %v448_v56  ;;  %v581_v2 = vadd.f32 %v1404_v5, %v449_v57 }
  0x1d   : > { %829 = vst.msk [vmem:[%s1423_s26 + $0x30] sm:$0xff] %vm822_vm0, %v700_v40  ;;  %v702_v7 = vmax.f32 %v574_v58, 0.0  ;;  %v703_v8 = vmax.f32 %v575_v59, 0.0  ;;  %v704_v9 = vmax.f32 %v576_v60, 0.0  ;;  %v705_v10 = vmax.f32 %v577_v61, 0.0  ;;  %v1285_v40 = vld [vmem:[%s1391_s18 + $0x60] sm:$0xff]  }
  0x1e   : > { %830 = vst.msk [vmem:[%s1423_s26 + $0x38] sm:$0xff] %vm822_vm0, %v701_v41  ;;  %v706_v12 = vmax.f32 %v578_v62, 0.0  ;;  %v707_v13 = vmax.f32 %v579_v63, 0.0  ;;  %v708_v14 = vmax.f32 %v580_v1, 0.0  ;;  %v709_v15 = vmax.f32 %v581_v2, 0.0  ;;  %v1286_v41 = vld [vmem:[%s1391_s18 + $0x68] sm:$0xff]  }
  0x1f   : > { %831 = vst.msk [vmem:[%s1423_s26 + $0x40] sm:$0xff] %vm822_vm0, %v702_v7  ;;  %v1052_v16 = vunpack.c.l.bf16 %v1281_v3  ;;  %v1053_v17 = vunpack.c.h.bf16 %v1281_v3  ;;  %v1056_v18 = vunpack.c.l.bf16 %v1282_v4  ;;  %v1057_v19 = vunpack.c.h.bf16 %v1282_v4 }
  0x20   : > { %832 = vst.msk [vmem:[%s1423_s26 + $0x48] sm:$0xff] %vm822_vm0, %v703_v8  ;;  %v1060_v20 = vunpack.c.l.bf16 %v1283_v6  ;;  %v1061_v21 = vunpack.c.h.bf16 %v1283_v6  ;;  %v1064_v22 = vunpack.c.l.bf16 %v1284_v11  ;;  %v1065_v23 = vunpack.c.h.bf16 %v1284_v11 }
  0x21   : > { %833 = vst.msk [vmem:[%s1423_s26 + $0x50] sm:$0xff] %vm822_vm0, %v704_v9  ;;  %v450_v24 = vmul.f32 %v1396_v0, %v1052_v16  ;;  %v451_v25 = vmul.f32 %v1396_v0, %v1053_v17  ;;  %v452_v26 = vmul.f32 %v1396_v0, %v1056_v18  ;;  %v453_v27 = vmul.f32 %v1396_v0, %v1057_v19  ;;  %v1291_v16 = vld [vmem:[%s1391_s18 + $0x90] sm:$0xff]  }
  0x22   : > { %834 = vst.msk [vmem:[%s1423_s26 + $0x58] sm:$0xff] %vm822_vm0, %v705_v10  ;;  %v454_v28 = vmul.f32 %v1396_v0, %v1060_v20  ;;  %v455_v29 = vmul.f32 %v1396_v0, %v1061_v21  ;;  %v456_v30 = vmul.f32 %v1396_v0, %v1064_v22  ;;  %v457_v31 = vmul.f32 %v1396_v0, %v1065_v23  ;;  %v1292_v21 = vld [vmem:[%s1391_s18 + $0x98] sm:$0xff]  }
  0x23   : > { %835 = vst.msk [vmem:[%s1423_s26 + $0x60] sm:$0xff] %vm822_vm0, %v706_v12  ;;  %v582_v32 = vadd.f32 %v1404_v5, %v450_v24  ;;  %v583_v33 = vadd.f32 %v1404_v5, %v451_v25  ;;  %v584_v34 = vadd.f32 %v1404_v5, %v452_v26  ;;  %v585_v35 = vadd.f32 %v1404_v5, %v453_v27 }
  0x24   : > { %836 = vst.msk [vmem:[%s1423_s26 + $0x68] sm:$0xff] %vm822_vm0, %v707_v13  ;;  %v586_v36 = vadd.f32 %v1404_v5, %v454_v28  ;;  %v587_v37 = vadd.f32 %v1404_v5, %v455_v29  ;;  %v588_v38 = vadd.f32 %v1404_v5, %v456_v30  ;;  %v589_v39 = vadd.f32 %v1404_v5, %v457_v31 }
  0x25   : > { %837 = vst.msk [vmem:[%s1423_s26 + $0x70] sm:$0xff] %vm822_vm0, %v708_v14  ;;  %v710_v43 = vmax.f32 %v582_v32, 0.0  ;;  %v711_v44 = vmax.f32 %v583_v33, 0.0  ;;  %v712_v45 = vmax.f32 %v584_v34, 0.0  ;;  %v713_v46 = vmax.f32 %v585_v35, 0.0  ;;  %v1289_v14 = vld [vmem:[%s1391_s18 + $0x80] sm:$0xff]  }
  0x26   : > { %838 = vst.msk [vmem:[%s1423_s26 + $0x78] sm:$0xff] %vm822_vm0, %v709_v15  ;;  %v714_v48 = vmax.f32 %v586_v36, 0.0  ;;  %v715_v49 = vmax.f32 %v587_v37, 0.0  ;;  %v716_v50 = vmax.f32 %v588_v38, 0.0  ;;  %v717_v51 = vmax.f32 %v589_v39, 0.0  ;;  %v1290_v15 = vld [vmem:[%s1391_s18 + $0x88] sm:$0xff]  }
  0x27   : > { %839 = vst.msk [vmem:[%s1423_s26 + $0x80] sm:$0xff] %vm822_vm0, %v710_v43  ;;  %v1068_v52 = vunpack.c.l.bf16 %v1285_v40  ;;  %v1069_v53 = vunpack.c.h.bf16 %v1285_v40  ;;  %v1072_v54 = vunpack.c.l.bf16 %v1286_v41  ;;  %v1073_v55 = vunpack.c.h.bf16 %v1286_v41 }
  0x28   : > { %840 = vst.msk [vmem:[%s1423_s26 + $0x88] sm:$0xff] %vm822_vm0, %v711_v44  ;;  %v1076_v56 = vunpack.c.l.bf16 %v1287_v42  ;;  %v1077_v57 = vunpack.c.h.bf16 %v1287_v42  ;;  %v1080_v58 = vunpack.c.l.bf16 %v1288_v47  ;;  %v1081_v59 = vunpack.c.h.bf16 %v1288_v47 }
  0x29   : > { %841 = vst.msk [vmem:[%s1423_s26 + $0x90] sm:$0xff] %vm822_vm0, %v712_v45  ;;  %v458_v60 = vmul.f32 %v1396_v0, %v1068_v52  ;;  %v459_v61 = vmul.f32 %v1396_v0, %v1069_v53  ;;  %v460_v62 = vmul.f32 %v1396_v0, %v1072_v54  ;;  %v461_v63 = vmul.f32 %v1396_v0, %v1073_v55  ;;  %v1295_v52 = vld [vmem:[%s1391_s18 + $0xb0] sm:$0xff]  }
  0x2a   : > { %842 = vst.msk [vmem:[%s1423_s26 + $0x98] sm:$0xff] %vm822_vm0, %v713_v46  ;;  %v462_v1 = vmul.f32 %v1396_v0, %v1076_v56  ;;  %v463_v2 = vmul.f32 %v1396_v0, %v1077_v57  ;;  %v464_v3 = vmul.f32 %v1396_v0, %v1080_v58  ;;  %v465_v4 = vmul.f32 %v1396_v0, %v1081_v59  ;;  %v1296_v57 = vld [vmem:[%s1391_s18 + $0xb8] sm:$0xff]  }
  0x2b   : > { %843 = vst.msk [vmem:[%s1423_s26 + $0xa0] sm:$0xff] %vm822_vm0, %v714_v48  ;;  %v590_v6 = vadd.f32 %v1404_v5, %v458_v60  ;;  %v591_v7 = vadd.f32 %v1404_v5, %v459_v61  ;;  %v592_v8 = vadd.f32 %v1404_v5, %v460_v62  ;;  %v593_v9 = vadd.f32 %v1404_v5, %v461_v63 }
  0x2c   : > { %844 = vst.msk [vmem:[%s1423_s26 + $0xa8] sm:$0xff] %vm822_vm0, %v715_v49  ;;  %v594_v10 = vadd.f32 %v1404_v5, %v462_v1  ;;  %v595_v11 = vadd.f32 %v1404_v5, %v463_v2  ;;  %v596_v12 = vadd.f32 %v1404_v5, %v464_v3  ;;  %v597_v13 = vadd.f32 %v1404_v5, %v465_v4 }
  0x2d   : > { %845 = vst.msk [vmem:[%s1423_s26 + $0xb0] sm:$0xff] %vm822_vm0, %v716_v50  ;;  %v718_v17 = vmax.f32 %v590_v6, 0.0  ;;  %v719_v18 = vmax.f32 %v591_v7, 0.0  ;;  %v720_v19 = vmax.f32 %v592_v8, 0.0  ;;  %v721_v20 = vmax.f32 %v593_v9, 0.0  ;;  %v1293_v50 = vld [vmem:[%s1391_s18 + $0xa0] sm:$0xff]  }
  0x2e   : > { %846 = vst.msk [vmem:[%s1423_s26 + $0xb8] sm:$0xff] %vm822_vm0, %v717_v51  ;;  %v722_v22 = vmax.f32 %v594_v10, 0.0  ;;  %v723_v23 = vmax.f32 %v595_v11, 0.0  ;;  %v724_v24 = vmax.f32 %v596_v12, 0.0  ;;  %v725_v25 = vmax.f32 %v597_v13, 0.0  ;;  %v1294_v51 = vld [vmem:[%s1391_s18 + $0xa8] sm:$0xff]  }
  0x2f   : > { %847 = vst.msk [vmem:[%s1423_s26 + $0xc0] sm:$0xff] %vm822_vm0, %v718_v17  ;;  %v1084_v26 = vunpack.c.l.bf16 %v1289_v14  ;;  %v1085_v27 = vunpack.c.h.bf16 %v1289_v14  ;;  %v1088_v28 = vunpack.c.l.bf16 %v1290_v15  ;;  %v1089_v29 = vunpack.c.h.bf16 %v1290_v15 }
  0x30   : > { %848 = vst.msk [vmem:[%s1423_s26 + $0xc8] sm:$0xff] %vm822_vm0, %v719_v18  ;;  %v1092_v30 = vunpack.c.l.bf16 %v1291_v16  ;;  %v1093_v31 = vunpack.c.h.bf16 %v1291_v16  ;;  %v1096_v32 = vunpack.c.l.bf16 %v1292_v21  ;;  %v1097_v33 = vunpack.c.h.bf16 %v1292_v21 }
  0x31   : > { %849 = vst.msk [vmem:[%s1423_s26 + $0xd0] sm:$0xff] %vm822_vm0, %v720_v19  ;;  %v466_v34 = vmul.f32 %v1396_v0, %v1084_v26  ;;  %v467_v35 = vmul.f32 %v1396_v0, %v1085_v27  ;;  %v468_v36 = vmul.f32 %v1396_v0, %v1088_v28  ;;  %v469_v37 = vmul.f32 %v1396_v0, %v1089_v29  ;;  %v1299_v26 = vld [vmem:[%s1391_s18 + $0xd0] sm:$0xff]  }
  0x32   : > { %850 = vst.msk [vmem:[%s1423_s26 + $0xd8] sm:$0xff] %vm822_vm0, %v721_v20  ;;  %v470_v38 = vmul.f32 %v1396_v0, %v1092_v30  ;;  %v471_v39 = vmul.f32 %v1396_v0, %v1093_v31  ;;  %v472_v40 = vmul.f32 %v1396_v0, %v1096_v32  ;;  %v473_v41 = vmul.f32 %v1396_v0, %v1097_v33  ;;  %v1300_v31 = vld [vmem:[%s1391_s18 + $0xd8] sm:$0xff]  }
  0x33   : > { %851 = vst.msk [vmem:[%s1423_s26 + $0xe0] sm:$0xff] %vm822_vm0, %v722_v22  ;;  %v598_v42 = vadd.f32 %v1404_v5, %v466_v34  ;;  %v599_v43 = vadd.f32 %v1404_v5, %v467_v35  ;;  %v600_v44 = vadd.f32 %v1404_v5, %v468_v36  ;;  %v601_v45 = vadd.f32 %v1404_v5, %v469_v37 }
  0x34   : > { %852 = vst.msk [vmem:[%s1423_s26 + $0xe8] sm:$0xff] %vm822_vm0, %v723_v23  ;;  %v602_v46 = vadd.f32 %v1404_v5, %v470_v38  ;;  %v603_v47 = vadd.f32 %v1404_v5, %v471_v39  ;;  %v604_v48 = vadd.f32 %v1404_v5, %v472_v40  ;;  %v605_v49 = vadd.f32 %v1404_v5, %v473_v41 }
  0x35   : > { %853 = vst.msk [vmem:[%s1423_s26 + $0xf0] sm:$0xff] %vm822_vm0, %v724_v24  ;;  %v726_v53 = vmax.f32 %v598_v42, 0.0  ;;  %v727_v54 = vmax.f32 %v599_v43, 0.0  ;;  %v728_v55 = vmax.f32 %v600_v44, 0.0  ;;  %v729_v56 = vmax.f32 %v601_v45, 0.0  ;;  %v1297_v24 = vld [vmem:[%s1391_s18 + $0xc0] sm:$0xff]  }
  0x36   : > { %854 = vst.msk [vmem:[%s1423_s26 + $0xf8] sm:$0xff] %vm822_vm0, %v725_v25  ;;  %v730_v58 = vmax.f32 %v602_v46, 0.0  ;;  %v731_v59 = vmax.f32 %v603_v47, 0.0  ;;  %v732_v60 = vmax.f32 %v604_v48, 0.0  ;;  %v733_v61 = vmax.f32 %v605_v49, 0.0  ;;  %v1298_v25 = vld [vmem:[%s1391_s18 + $0xc8] sm:$0xff]  }
  0x37   : > { %855 = vst.msk [vmem:[%s1423_s26 + $0x100] sm:$0xff] %vm822_vm0, %v726_v53  ;;  %v1100_v62 = vunpack.c.l.bf16 %v1293_v50  ;;  %v1101_v63 = vunpack.c.h.bf16 %v1293_v50  ;;  %v1104_v1 = vunpack.c.l.bf16 %v1294_v51  ;;  %v1105_v2 = vunpack.c.h.bf16 %v1294_v51 }
  0x38   : > { %856 = vst.msk [vmem:[%s1423_s26 + $0x108] sm:$0xff] %vm822_vm0, %v727_v54  ;;  %v1108_v3 = vunpack.c.l.bf16 %v1295_v52  ;;  %v1109_v4 = vunpack.c.h.bf16 %v1295_v52  ;;  %v1112_v6 = vunpack.c.l.bf16 %v1296_v57  ;;  %v1113_v7 = vunpack.c.h.bf16 %v1296_v57 }
  0x39   : > { %857 = vst.msk [vmem:[%s1423_s26 + $0x110] sm:$0xff] %vm822_vm0, %v728_v55  ;;  %v474_v8 = vmul.f32 %v1396_v0, %v1100_v62  ;;  %v475_v9 = vmul.f32 %v1396_v0, %v1101_v63  ;;  %v476_v10 = vmul.f32 %v1396_v0, %v1104_v1  ;;  %v477_v11 = vmul.f32 %v1396_v0, %v1105_v2  ;;  %v1303_v62 = vld [vmem:[%s1391_s18 + $0xf0] sm:$0xff]  }
  0x3a   : > { %858 = vst.msk [vmem:[%s1423_s26 + $0x118] sm:$0xff] %vm822_vm0, %v729_v56  ;;  %v478_v12 = vmul.f32 %v1396_v0, %v1108_v3  ;;  %v479_v13 = vmul.f32 %v1396_v0, %v1109_v4  ;;  %v480_v14 = vmul.f32 %v1396_v0, %v1112_v6  ;;  %v481_v15 = vmul.f32 %v1396_v0, %v1113_v7  ;;  %v1304_v4 = vld [vmem:[%s1391_s18 + $0xf8] sm:$0xff]  }
  0x3b   : > { %859 = vst.msk [vmem:[%s1423_s26 + $0x120] sm:$0xff] %vm822_vm0, %v730_v58  ;;  %v606_v16 = vadd.f32 %v1404_v5, %v474_v8  ;;  %v607_v17 = vadd.f32 %v1404_v5, %v475_v9  ;;  %v608_v18 = vadd.f32 %v1404_v5, %v476_v10  ;;  %v609_v19 = vadd.f32 %v1404_v5, %v477_v11 }
  0x3c   : > { %860 = vst.msk [vmem:[%s1423_s26 + $0x128] sm:$0xff] %vm822_vm0, %v731_v59  ;;  %v610_v20 = vadd.f32 %v1404_v5, %v478_v12  ;;  %v611_v21 = vadd.f32 %v1404_v5, %v479_v13  ;;  %v612_v22 = vadd.f32 %v1404_v5, %v480_v14  ;;  %v613_v23 = vadd.f32 %v1404_v5, %v481_v15 }
  0x3d   : > { %861 = vst.msk [vmem:[%s1423_s26 + $0x130] sm:$0xff] %vm822_vm0, %v732_v60  ;;  %v734_v27 = vmax.f32 %v606_v16, 0.0  ;;  %v735_v28 = vmax.f32 %v607_v17, 0.0  ;;  %v736_v29 = vmax.f32 %v608_v18, 0.0  ;;  %v737_v30 = vmax.f32 %v609_v19, 0.0  ;;  %v1301_v60 = vld [vmem:[%s1391_s18 + $0xe0] sm:$0xff]  }
  0x3e   : > { %862 = vst.msk [vmem:[%s1423_s26 + $0x138] sm:$0xff] %vm822_vm0, %v733_v61  ;;  %v738_v32 = vmax.f32 %v610_v20, 0.0  ;;  %v739_v33 = vmax.f32 %v611_v21, 0.0  ;;  %v740_v34 = vmax.f32 %v612_v22, 0.0  ;;  %v741_v35 = vmax.f32 %v613_v23, 0.0  ;;  %v1302_v61 = vld [vmem:[%s1391_s18 + $0xe8] sm:$0xff]  }
  0x3f   : > { %863 = vst.msk [vmem:[%s1423_s26 + $0x140] sm:$0xff] %vm822_vm0, %v734_v27  ;;  %v1116_v36 = vunpack.c.l.bf16 %v1297_v24  ;;  %v1117_v37 = vunpack.c.h.bf16 %v1297_v24  ;;  %v1120_v38 = vunpack.c.l.bf16 %v1298_v25  ;;  %v1121_v39 = vunpack.c.h.bf16 %v1298_v25 }
  0x40   : > { %864 = vst.msk [vmem:[%s1423_s26 + $0x148] sm:$0xff] %vm822_vm0, %v735_v28  ;;  %v1124_v40 = vunpack.c.l.bf16 %v1299_v26  ;;  %v1125_v41 = vunpack.c.h.bf16 %v1299_v26  ;;  %v1128_v42 = vunpack.c.l.bf16 %v1300_v31  ;;  %v1129_v43 = vunpack.c.h.bf16 %v1300_v31 }
  0x41   : > { %865 = vst.msk [vmem:[%s1423_s26 + $0x150] sm:$0xff] %vm822_vm0, %v736_v29  ;;  %v482_v44 = vmul.f32 %v1396_v0, %v1116_v36  ;;  %v483_v45 = vmul.f32 %v1396_v0, %v1117_v37  ;;  %v484_v46 = vmul.f32 %v1396_v0, %v1120_v38  ;;  %v485_v47 = vmul.f32 %v1396_v0, %v1121_v39  ;;  %v1307_v36 = vld [vmem:[%s1391_s18 + $0x110] sm:$0xff]  }
  0x42   : > { %866 = vst.msk [vmem:[%s1423_s26 + $0x158] sm:$0xff] %vm822_vm0, %v737_v30  ;;  %v486_v48 = vmul.f32 %v1396_v0, %v1124_v40  ;;  %v487_v49 = vmul.f32 %v1396_v0, %v1125_v41  ;;  %v488_v50 = vmul.f32 %v1396_v0, %v1128_v42  ;;  %v489_v51 = vmul.f32 %v1396_v0, %v1129_v43  ;;  %v1308_v41 = vld [vmem:[%s1391_s18 + $0x118] sm:$0xff]  }
  0x43   : > { %867 = vst.msk [vmem:[%s1423_s26 + $0x160] sm:$0xff] %vm822_vm0, %v738_v32  ;;  %v614_v52 = vadd.f32 %v1404_v5, %v482_v44  ;;  %v615_v53 = vadd.f32 %v1404_v5, %v483_v45  ;;  %v616_v54 = vadd.f32 %v1404_v5, %v484_v46  ;;  %v617_v55 = vadd.f32 %v1404_v5, %v485_v47 }
  0x44   : > { %868 = vst.msk [vmem:[%s1423_s26 + $0x168] sm:$0xff] %vm822_vm0, %v739_v33  ;;  %v618_v56 = vadd.f32 %v1404_v5, %v486_v48  ;;  %v619_v57 = vadd.f32 %v1404_v5, %v487_v49  ;;  %v620_v58 = vadd.f32 %v1404_v5, %v488_v50  ;;  %v621_v59 = vadd.f32 %v1404_v5, %v489_v51 }
  0x45   : > { %869 = vst.msk [vmem:[%s1423_s26 + $0x170] sm:$0xff] %vm822_vm0, %v740_v34  ;;  %v742_v63 = vmax.f32 %v614_v52, 0.0  ;;  %v743_v1 = vmax.f32 %v615_v53, 0.0  ;;  %v744_v2 = vmax.f32 %v616_v54, 0.0  ;;  %v745_v3 = vmax.f32 %v617_v55, 0.0  ;;  %v1305_v34 = vld [vmem:[%s1391_s18 + $0x100] sm:$0xff]  }
  0x46   : > { %870 = vst.msk [vmem:[%s1423_s26 + $0x178] sm:$0xff] %vm822_vm0, %v741_v35  ;;  %v746_v6 = vmax.f32 %v618_v56, 0.0  ;;  %v747_v7 = vmax.f32 %v619_v57, 0.0  ;;  %v748_v8 = vmax.f32 %v620_v58, 0.0  ;;  %v749_v9 = vmax.f32 %v621_v59, 0.0  ;;  %v1306_v35 = vld [vmem:[%s1391_s18 + $0x108] sm:$0xff]  }
  0x47   : > { %871 = vst.msk [vmem:[%s1423_s26 + $0x180] sm:$0xff] %vm822_vm0, %v742_v63  ;;  %v1132_v10 = vunpack.c.l.bf16 %v1301_v60  ;;  %v1133_v11 = vunpack.c.h.bf16 %v1301_v60  ;;  %v1136_v12 = vunpack.c.l.bf16 %v1302_v61  ;;  %v1137_v13 = vunpack.c.h.bf16 %v1302_v61 }
  0x48   : > { %872 = vst.msk [vmem:[%s1423_s26 + $0x188] sm:$0xff] %vm822_vm0, %v743_v1  ;;  %v1140_v14 = vunpack.c.l.bf16 %v1303_v62  ;;  %v1141_v15 = vunpack.c.h.bf16 %v1303_v62  ;;  %v1144_v16 = vunpack.c.l.bf16 %v1304_v4  ;;  %v1145_v17 = vunpack.c.h.bf16 %v1304_v4 }
  0x49   : > { %873 = vst.msk [vmem:[%s1423_s26 + $0x190] sm:$0xff] %vm822_vm0, %v744_v2  ;;  %v490_v18 = vmul.f32 %v1396_v0, %v1132_v10  ;;  %v491_v19 = vmul.f32 %v1396_v0, %v1133_v11  ;;  %v492_v20 = vmul.f32 %v1396_v0, %v1136_v12  ;;  %v493_v21 = vmul.f32 %v1396_v0, %v1137_v13  ;;  %v1311_v10 = vld [vmem:[%s1391_s18 + $0x130] sm:$0xff]  }
  0x4a   : > { %874 = vst.msk [vmem:[%s1423_s26 + $0x198] sm:$0xff] %vm822_vm0, %v745_v3  ;;  %v494_v22 = vmul.f32 %v1396_v0, %v1140_v14  ;;  %v495_v23 = vmul.f32 %v1396_v0, %v1141_v15  ;;  %v496_v24 = vmul.f32 %v1396_v0, %v1144_v16  ;;  %v497_v25 = vmul.f32 %v1396_v0, %v1145_v17  ;;  %v1312_v15 = vld [vmem:[%s1391_s18 + $0x138] sm:$0xff]  }
  0x4b   : > { %875 = vst.msk [vmem:[%s1423_s26 + $0x1a0] sm:$0xff] %vm822_vm0, %v746_v6  ;;  %v622_v26 = vadd.f32 %v1404_v5, %v490_v18  ;;  %v623_v27 = vadd.f32 %v1404_v5, %v491_v19  ;;  %v624_v28 = vadd.f32 %v1404_v5, %v492_v20  ;;  %v625_v29 = vadd.f32 %v1404_v5, %v493_v21 }
  0x4c   : > { %876 = vst.msk [vmem:[%s1423_s26 + $0x1a8] sm:$0xff] %vm822_vm0, %v747_v7  ;;  %v626_v30 = vadd.f32 %v1404_v5, %v494_v22  ;;  %v627_v31 = vadd.f32 %v1404_v5, %v495_v23  ;;  %v628_v32 = vadd.f32 %v1404_v5, %v496_v24  ;;  %v629_v33 = vadd.f32 %v1404_v5, %v497_v25 }
  0x4d   : > { %877 = vst.msk [vmem:[%s1423_s26 + $0x1b0] sm:$0xff] %vm822_vm0, %v748_v8  ;;  %v750_v37 = vmax.f32 %v622_v26, 0.0  ;;  %v751_v38 = vmax.f32 %v623_v27, 0.0  ;;  %v752_v39 = vmax.f32 %v624_v28, 0.0  ;;  %v753_v40 = vmax.f32 %v625_v29, 0.0  ;;  %v1309_v8 = vld [vmem:[%s1391_s18 + $0x120] sm:$0xff]  }
  0x4e   : > { %878 = vst.msk [vmem:[%s1423_s26 + $0x1b8] sm:$0xff] %vm822_vm0, %v749_v9  ;;  %v754_v42 = vmax.f32 %v626_v30, 0.0  ;;  %v755_v43 = vmax.f32 %v627_v31, 0.0  ;;  %v756_v44 = vmax.f32 %v628_v32, 0.0  ;;  %v757_v45 = vmax.f32 %v629_v33, 0.0  ;;  %v1310_v9 = vld [vmem:[%s1391_s18 + $0x128] sm:$0xff]  }
  0x4f   : > { %879 = vst.msk [vmem:[%s1423_s26 + $0x1c0] sm:$0xff] %vm822_vm0, %v750_v37  ;;  %v1148_v46 = vunpack.c.l.bf16 %v1305_v34  ;;  %v1149_v47 = vunpack.c.h.bf16 %v1305_v34  ;;  %v1152_v48 = vunpack.c.l.bf16 %v1306_v35  ;;  %v1153_v49 = vunpack.c.h.bf16 %v1306_v35 }
  0x50   : > { %880 = vst.msk [vmem:[%s1423_s26 + $0x1c8] sm:$0xff] %vm822_vm0, %v751_v38  ;;  %v1156_v50 = vunpack.c.l.bf16 %v1307_v36  ;;  %v1157_v51 = vunpack.c.h.bf16 %v1307_v36  ;;  %v1160_v52 = vunpack.c.l.bf16 %v1308_v41  ;;  %v1161_v53 = vunpack.c.h.bf16 %v1308_v41 }
  0x51   : > { %881 = vst.msk [vmem:[%s1423_s26 + $0x1d0] sm:$0xff] %vm822_vm0, %v752_v39  ;;  %v498_v54 = vmul.f32 %v1396_v0, %v1148_v46  ;;  %v499_v55 = vmul.f32 %v1396_v0, %v1149_v47  ;;  %v500_v56 = vmul.f32 %v1396_v0, %v1152_v48  ;;  %v501_v57 = vmul.f32 %v1396_v0, %v1153_v49  ;;  %v1315_v46 = vld [vmem:[%s1391_s18 + $0x150] sm:$0xff]  }
  0x52   : > { %882 = vst.msk [vmem:[%s1423_s26 + $0x1d8] sm:$0xff] %vm822_vm0, %v753_v40  ;;  %v502_v58 = vmul.f32 %v1396_v0, %v1156_v50  ;;  %v503_v59 = vmul.f32 %v1396_v0, %v1157_v51  ;;  %v504_v60 = vmul.f32 %v1396_v0, %v1160_v52  ;;  %v505_v61 = vmul.f32 %v1396_v0, %v1161_v53  ;;  %v1316_v51 = vld [vmem:[%s1391_s18 + $0x158] sm:$0xff]  }
  0x53   : > { %883 = vst.msk [vmem:[%s1423_s26 + $0x1e0] sm:$0xff] %vm822_vm0, %v754_v42  ;;  %v630_v62 = vadd.f32 %v1404_v5, %v498_v54  ;;  %v631_v63 = vadd.f32 %v1404_v5, %v499_v55  ;;  %v632_v1 = vadd.f32 %v1404_v5, %v500_v56  ;;  %v633_v2 = vadd.f32 %v1404_v5, %v501_v57 }
  0x54   : > { %884 = vst.msk [vmem:[%s1423_s26 + $0x1e8] sm:$0xff] %vm822_vm0, %v755_v43  ;;  %v634_v3 = vadd.f32 %v1404_v5, %v502_v58  ;;  %v635_v4 = vadd.f32 %v1404_v5, %v503_v59  ;;  %v636_v6 = vadd.f32 %v1404_v5, %v504_v60  ;;  %v637_v7 = vadd.f32 %v1404_v5, %v505_v61 }
  0x55   : > { %885 = vst.msk [vmem:[%s1423_s26 + $0x1f0] sm:$0xff] %vm822_vm0, %v756_v44  ;;  %v758_v11 = vmax.f32 %v630_v62, 0.0  ;;  %v759_v12 = vmax.f32 %v631_v63, 0.0  ;;  %v760_v13 = vmax.f32 %v632_v1, 0.0  ;;  %v761_v14 = vmax.f32 %v633_v2, 0.0  ;;  %v1313_v44 = vld [vmem:[%s1391_s18 + $0x140] sm:$0xff]  }
  0x56   : > { %886 = vst.msk [vmem:[%s1423_s26 + $0x1f8] sm:$0xff] %vm822_vm0, %v757_v45  ;;  %v762_v16 = vmax.f32 %v634_v3, 0.0  ;;  %v763_v17 = vmax.f32 %v635_v4, 0.0  ;;  %v764_v18 = vmax.f32 %v636_v6, 0.0  ;;  %v765_v19 = vmax.f32 %v637_v7, 0.0  ;;  %v1314_v45 = vld [vmem:[%s1391_s18 + $0x148] sm:$0xff]  }
  0x57   : > { %887 = vst.msk [vmem:[%s1423_s26 + $0x200] sm:$0xff] %vm822_vm0, %v758_v11  ;;  %v1164_v20 = vunpack.c.l.bf16 %v1309_v8  ;;  %v1165_v21 = vunpack.c.h.bf16 %v1309_v8  ;;  %v1168_v22 = vunpack.c.l.bf16 %v1310_v9  ;;  %v1169_v23 = vunpack.c.h.bf16 %v1310_v9 }
  0x58   : > { %888 = vst.msk [vmem:[%s1423_s26 + $0x208] sm:$0xff] %vm822_vm0, %v759_v12  ;;  %v1172_v24 = vunpack.c.l.bf16 %v1311_v10  ;;  %v1173_v25 = vunpack.c.h.bf16 %v1311_v10  ;;  %v1176_v26 = vunpack.c.l.bf16 %v1312_v15  ;;  %v1177_v27 = vunpack.c.h.bf16 %v1312_v15 }
  0x59   : > { %889 = vst.msk [vmem:[%s1423_s26 + $0x210] sm:$0xff] %vm822_vm0, %v760_v13  ;;  %v506_v28 = vmul.f32 %v1396_v0, %v1164_v20  ;;  %v507_v29 = vmul.f32 %v1396_v0, %v1165_v21  ;;  %v508_v30 = vmul.f32 %v1396_v0, %v1168_v22  ;;  %v509_v31 = vmul.f32 %v1396_v0, %v1169_v23  ;;  %v1319_v20 = vld [vmem:[%s1391_s18 + $0x170] sm:$0xff]  }
  0x5a   : > { %890 = vst.msk [vmem:[%s1423_s26 + $0x218] sm:$0xff] %vm822_vm0, %v761_v14  ;;  %v510_v32 = vmul.f32 %v1396_v0, %v1172_v24  ;;  %v511_v33 = vmul.f32 %v1396_v0, %v1173_v25  ;;  %v512_v34 = vmul.f32 %v1396_v0, %v1176_v26  ;;  %v513_v35 = vmul.f32 %v1396_v0, %v1177_v27  ;;  %v1320_v25 = vld [vmem:[%s1391_s18 + $0x178] sm:$0xff]  }
  0x5b   : > { %891 = vst.msk [vmem:[%s1423_s26 + $0x220] sm:$0xff] %vm822_vm0, %v762_v16  ;;  %v638_v36 = vadd.f32 %v1404_v5, %v506_v28  ;;  %v639_v37 = vadd.f32 %v1404_v5, %v507_v29  ;;  %v640_v38 = vadd.f32 %v1404_v5, %v508_v30  ;;  %v641_v39 = vadd.f32 %v1404_v5, %v509_v31 }
  0x5c   : > { %892 = vst.msk [vmem:[%s1423_s26 + $0x228] sm:$0xff] %vm822_vm0, %v763_v17  ;;  %v642_v40 = vadd.f32 %v1404_v5, %v510_v32  ;;  %v643_v41 = vadd.f32 %v1404_v5, %v511_v33  ;;  %v644_v42 = vadd.f32 %v1404_v5, %v512_v34  ;;  %v645_v43 = vadd.f32 %v1404_v5, %v513_v35 }
  0x5d   : > { %893 = vst.msk [vmem:[%s1423_s26 + $0x230] sm:$0xff] %vm822_vm0, %v764_v18  ;;  %v766_v47 = vmax.f32 %v638_v36, 0.0  ;;  %v767_v48 = vmax.f32 %v639_v37, 0.0  ;;  %v768_v49 = vmax.f32 %v640_v38, 0.0  ;;  %v769_v50 = vmax.f32 %v641_v39, 0.0  ;;  %v1317_v18 = vld [vmem:[%s1391_s18 + $0x160] sm:$0xff]  }
  0x5e   : > { %894 = vst.msk [vmem:[%s1423_s26 + $0x238] sm:$0xff] %vm822_vm0, %v765_v19  ;;  %v770_v52 = vmax.f32 %v642_v40, 0.0  ;;  %v771_v53 = vmax.f32 %v643_v41, 0.0  ;;  %v772_v54 = vmax.f32 %v644_v42, 0.0  ;;  %v773_v55 = vmax.f32 %v645_v43, 0.0  ;;  %v1318_v19 = vld [vmem:[%s1391_s18 + $0x168] sm:$0xff]  }
  0x5f   : > { %895 = vst.msk [vmem:[%s1423_s26 + $0x240] sm:$0xff] %vm822_vm0, %v766_v47  ;;  %v1180_v56 = vunpack.c.l.bf16 %v1313_v44  ;;  %v1181_v57 = vunpack.c.h.bf16 %v1313_v44  ;;  %v1184_v58 = vunpack.c.l.bf16 %v1314_v45  ;;  %v1185_v59 = vunpack.c.h.bf16 %v1314_v45 }
  0x60   : > { %896 = vst.msk [vmem:[%s1423_s26 + $0x248] sm:$0xff] %vm822_vm0, %v767_v48  ;;  %v1188_v60 = vunpack.c.l.bf16 %v1315_v46  ;;  %v1189_v61 = vunpack.c.h.bf16 %v1315_v46  ;;  %v1192_v62 = vunpack.c.l.bf16 %v1316_v51  ;;  %v1193_v63 = vunpack.c.h.bf16 %v1316_v51 }
  0x61   : > { %897 = vst.msk [vmem:[%s1423_s26 + $0x250] sm:$0xff] %vm822_vm0, %v768_v49  ;;  %v514_v1 = vmul.f32 %v1396_v0, %v1180_v56  ;;  %v515_v2 = vmul.f32 %v1396_v0, %v1181_v57  ;;  %v516_v3 = vmul.f32 %v1396_v0, %v1184_v58  ;;  %v517_v4 = vmul.f32 %v1396_v0, %v1185_v59 }
  0x62   : > { %898 = vst.msk [vmem:[%s1423_s26 + $0x258] sm:$0xff] %vm822_vm0, %v769_v50  ;;  %v518_v6 = vmul.f32 %v1396_v0, %v1188_v60  ;;  %v519_v7 = vmul.f32 %v1396_v0, %v1189_v61  ;;  %v520_v8 = vmul.f32 %v1396_v0, %v1192_v62  ;;  %v521_v9 = vmul.f32 %v1396_v0, %v1193_v63  ;;  %v1324_v60 = vld [vmem:[%s1391_s18 + $0x198] sm:$0xff]  }
  0x63   : > { %899 = vst.msk [vmem:[%s1423_s26 + $0x260] sm:$0xff] %vm822_vm0, %v770_v52  ;;  %v646_v10 = vadd.f32 %v1404_v5, %v514_v1  ;;  %v647_v11 = vadd.f32 %v1404_v5, %v515_v2  ;;  %v648_v12 = vadd.f32 %v1404_v5, %v516_v3  ;;  %v649_v13 = vadd.f32 %v1404_v5, %v517_v4 }
  0x64   : > { %900 = vst.msk [vmem:[%s1423_s26 + $0x268] sm:$0xff] %vm822_vm0, %v771_v53  ;;  %v650_v14 = vadd.f32 %v1404_v5, %v518_v6  ;;  %v651_v15 = vadd.f32 %v1404_v5, %v519_v7  ;;  %v652_v16 = vadd.f32 %v1404_v5, %v520_v8  ;;  %v653_v17 = vadd.f32 %v1404_v5, %v521_v9  ;;  %v1321_v53 = vld [vmem:[%s1391_s18 + $0x180] sm:$0xff]  }
  0x65   : > { %901 = vst.msk [vmem:[%s1423_s26 + $0x270] sm:$0xff] %vm822_vm0, %v772_v54  ;;  %v774_v21 = vmax.f32 %v646_v10, 0.0  ;;  %v775_v22 = vmax.f32 %v647_v11, 0.0  ;;  %v776_v23 = vmax.f32 %v648_v12, 0.0  ;;  %v777_v24 = vmax.f32 %v649_v13, 0.0  ;;  %v1322_v54 = vld [vmem:[%s1391_s18 + $0x188] sm:$0xff]  }
  0x66   : > { %902 = vst.msk [vmem:[%s1423_s26 + $0x278] sm:$0xff] %vm822_vm0, %v773_v55  ;;  %v778_v26 = vmax.f32 %v650_v14, 0.0  ;;  %v779_v27 = vmax.f32 %v651_v15, 0.0  ;;  %v780_v28 = vmax.f32 %v652_v16, 0.0  ;;  %v781_v29 = vmax.f32 %v653_v17, 0.0  ;;  %v1323_v55 = vld [vmem:[%s1391_s18 + $0x190] sm:$0xff]  }
  0x67   : > { %903 = vst.msk [vmem:[%s1423_s26 + $0x280] sm:$0xff] %vm822_vm0, %v774_v21  ;;  %v1196_v30 = vunpack.c.l.bf16 %v1317_v18  ;;  %v1197_v31 = vunpack.c.h.bf16 %v1317_v18  ;;  %v1200_v32 = vunpack.c.l.bf16 %v1318_v19  ;;  %v1201_v33 = vunpack.c.h.bf16 %v1318_v19  ;;  %v1838_v10 = vld [vmem:[%s1999_s1] ss:$0 sm:$0xff] }
  0x68   : > { %904 = vst.msk [vmem:[%s1423_s26 + $0x288] sm:$0xff] %vm822_vm0, %v775_v22  ;;  %v1204_v34 = vunpack.c.l.bf16 %v1319_v20  ;;  %v1205_v35 = vunpack.c.h.bf16 %v1319_v20  ;;  %v1208_v36 = vunpack.c.l.bf16 %v1320_v25  ;;  %v1209_v37 = vunpack.c.h.bf16 %v1320_v25  ;;  %v1855_v19 = vld [vmem:[%s2000_s2] ss:$0 sm:$0xff] }
  0x69   : > { %905 = vst.msk [vmem:[%s1423_s26 + $0x290] sm:$0xff] %vm822_vm0, %v776_v23  ;;  %v522_v38 = vmul.f32 %v1396_v0, %v1196_v30  ;;  %v523_v39 = vmul.f32 %v1396_v0, %v1197_v31  ;;  %v524_v40 = vmul.f32 %v1396_v0, %v1200_v32  ;;  %v525_v41 = vmul.f32 %v1396_v0, %v1201_v33  ;;  %v1327_v30 = vld [vmem:[%s1391_s18 + $0x1b0] sm:$0xff]  }
  0x6a   : > { %906 = vst.msk [vmem:[%s1423_s26 + $0x298] sm:$0xff] %vm822_vm0, %v777_v24  ;;  %v526_v42 = vmul.f32 %v1396_v0, %v1204_v34  ;;  %v527_v43 = vmul.f32 %v1396_v0, %v1205_v35  ;;  %v528_v44 = vmul.f32 %v1396_v0, %v1208_v36  ;;  %v529_v45 = vmul.f32 %v1396_v0, %v1209_v37  ;;  %v1328_v35 = vld [vmem:[%s1391_s18 + $0x1b8] sm:$0xff]  }
  0x6b   : > { %907 = vst.msk [vmem:[%s1423_s26 + $0x2a0] sm:$0xff] %vm822_vm0, %v778_v26  ;;  %v654_v46 = vadd.f32 %v1404_v5, %v522_v38  ;;  %v655_v47 = vadd.f32 %v1404_v5, %v523_v39  ;;  %v656_v48 = vadd.f32 %v1404_v5, %v524_v40  ;;  %v657_v49 = vadd.f32 %v1404_v5, %v525_v41 }
  0x6c   : > { %908 = vst.msk [vmem:[%s1423_s26 + $0x2a8] sm:$0xff] %vm822_vm0, %v779_v27  ;;  %v658_v50 = vadd.f32 %v1404_v5, %v526_v42  ;;  %v659_v51 = vadd.f32 %v1404_v5, %v527_v43  ;;  %v660_v0 = vadd.f32 %v1404_v5, %v528_v44  ;;  %v661_v52 = vadd.f32 %v1404_v5, %v529_v45 }
  0x6d   : > { %909 = vst.msk [vmem:[%s1423_s26 + $0x2b0] sm:$0xff] %vm822_vm0, %v780_v28  ;;  %v782_v56 = vmax.f32 %v654_v46, 0.0  ;;  %v783_v57 = vmax.f32 %v655_v47, 0.0  ;;  %v784_v58 = vmax.f32 %v656_v48, 0.0  ;;  %v785_v59 = vmax.f32 %v657_v49, 0.0  ;;  %v1325_v28 = vld [vmem:[%s1391_s18 + $0x1a0] sm:$0xff]  }
  0x6e   : > { %910 = vst.msk [vmem:[%s1423_s26 + $0x2b8] sm:$0xff] %vm822_vm0, %v781_v29  ;;  %v786_v61 = vmax.f32 %v658_v50, 0.0  ;;  %v787_v62 = vmax.f32 %v659_v51, 0.0  ;;  %v788_v63 = vmax.f32 %v660_v0, 0.0  ;;  %v789_v1 = vmax.f32 %v661_v52, 0.0  ;;  %v1326_v29 = vld [vmem:[%s1391_s18 + $0x1a8] sm:$0xff]  }
  0x6f   : > { %911 = vst.msk [vmem:[%s1423_s26 + $0x2c0] sm:$0xff] %vm822_vm0, %v782_v56  ;;  %v1212_v5 = vunpack.c.l.bf16 %v1321_v53  ;;  %v1213_v2 = vunpack.c.h.bf16 %v1321_v53  ;;  %v1216_v3 = vunpack.c.l.bf16 %v1322_v54  ;;  %v1217_v4 = vunpack.c.h.bf16 %v1322_v54 }
  0x70   : > { %912 = vst.msk [vmem:[%s1423_s26 + $0x2c8] sm:$0xff] %vm822_vm0, %v783_v57  ;;  %v1220_v6 = vunpack.c.l.bf16 %v1323_v55  ;;  %v1221_v7 = vunpack.c.h.bf16 %v1323_v55  ;;  %v1224_v8 = vunpack.c.l.bf16 %v1324_v60  ;;  %v1225_v9 = vunpack.c.h.bf16 %v1324_v60 }
  0x71   : > { %913 = vst.msk [vmem:[%s1423_s26 + $0x2d0] sm:$0xff] %vm822_vm0, %v784_v58  ;;  %v530_v11 = vmul.f32 %v1838_v10, %v1212_v5  ;;  %v531_v12 = vmul.f32 %v1838_v10, %v1213_v2  ;;  %v532_v13 = vmul.f32 %v1838_v10, %v1216_v3  ;;  %v533_v14 = vmul.f32 %v1838_v10, %v1217_v4  ;;  %v1331_v5 = vld [vmem:[%s1391_s18 + $0x1d0] sm:$0xff]  }
  0x72   : > { %914 = vst.msk [vmem:[%s1423_s26 + $0x2d8] sm:$0xff] %vm822_vm0, %v785_v59  ;;  %v534_v15 = vmul.f32 %v1838_v10, %v1220_v6  ;;  %v535_v16 = vmul.f32 %v1838_v10, %v1221_v7  ;;  %v536_v17 = vmul.f32 %v1838_v10, %v1224_v8  ;;  %v537_v18 = vmul.f32 %v1838_v10, %v1225_v9  ;;  %v1332_v7 = vld [vmem:[%s1391_s18 + $0x1d8] sm:$0xff]  }
  0x73   : > { %915 = vst.msk [vmem:[%s1423_s26 + $0x2e0] sm:$0xff] %vm822_vm0, %v786_v61  ;;  %v662_v20 = vadd.f32 %v1855_v19, %v530_v11  ;;  %v663_v21 = vadd.f32 %v1855_v19, %v531_v12  ;;  %v664_v22 = vadd.f32 %v1855_v19, %v532_v13  ;;  %v665_v23 = vadd.f32 %v1855_v19, %v533_v14 }
  0x74   : > { %916 = vst.msk [vmem:[%s1423_s26 + $0x2e8] sm:$0xff] %vm822_vm0, %v787_v62  ;;  %v666_v24 = vadd.f32 %v1855_v19, %v534_v15  ;;  %v667_v25 = vadd.f32 %v1855_v19, %v535_v16  ;;  %v668_v26 = vadd.f32 %v1855_v19, %v536_v17  ;;  %v669_v27 = vadd.f32 %v1855_v19, %v537_v18 }
  0x75   : > { %917 = vst.msk [vmem:[%s1423_s26 + $0x2f0] sm:$0xff] %vm822_vm0, %v788_v63  ;;  %v790_v31 = vmax.f32 %v662_v20, 0.0  ;;  %v791_v32 = vmax.f32 %v663_v21, 0.0  ;;  %v792_v33 = vmax.f32 %v664_v22, 0.0  ;;  %v793_v34 = vmax.f32 %v665_v23, 0.0  ;;  %v1329_v63 = vld [vmem:[%s1391_s18 + $0x1c0] sm:$0xff]  }
  0x76   : > { %918 = vst.msk [vmem:[%s1423_s26 + $0x2f8] sm:$0xff] %vm822_vm0, %v789_v1  ;;  %v794_v36 = vmax.f32 %v666_v24, 0.0  ;;  %v795_v37 = vmax.f32 %v667_v25, 0.0  ;;  %v796_v38 = vmax.f32 %v668_v26, 0.0  ;;  %v797_v39 = vmax.f32 %v669_v27, 0.0  ;;  %v1330_v1 = vld [vmem:[%s1391_s18 + $0x1c8] sm:$0xff]  }
  0x77   : > { %919 = vst.msk [vmem:[%s1423_s26 + $0x300] sm:$0xff] %vm822_vm0, %v790_v31  ;;  %v1228_v40 = vunpack.c.l.bf16 %v1325_v28  ;;  %v1229_v41 = vunpack.c.h.bf16 %v1325_v28  ;;  %v1232_v42 = vunpack.c.l.bf16 %v1326_v29  ;;  %v1233_v43 = vunpack.c.h.bf16 %v1326_v29 }
  0x78   : > { %920 = vst.msk [vmem:[%s1423_s26 + $0x308] sm:$0xff] %vm822_vm0, %v791_v32  ;;  %v1236_v44 = vunpack.c.l.bf16 %v1327_v30  ;;  %v1237_v45 = vunpack.c.h.bf16 %v1327_v30  ;;  %v1240_v46 = vunpack.c.l.bf16 %v1328_v35  ;;  %v1241_v47 = vunpack.c.h.bf16 %v1328_v35 }
  0x79   : > { %921 = vst.msk [vmem:[%s1423_s26 + $0x310] sm:$0xff] %vm822_vm0, %v792_v33  ;;  %v538_v48 = vmul.f32 %v1838_v10, %v1228_v40  ;;  %v539_v49 = vmul.f32 %v1838_v10, %v1229_v41  ;;  %v540_v50 = vmul.f32 %v1838_v10, %v1232_v42  ;;  %v541_v51 = vmul.f32 %v1838_v10, %v1233_v43  ;;  %v1335_v40 = vld [vmem:[%s1391_s18 + $0x1f0] sm:$0xff]  }
  0x7a   : > { %922 = vst.msk [vmem:[%s1423_s26 + $0x318] sm:$0xff] %vm822_vm0, %v793_v34  ;;  %v542_v0 = vmul.f32 %v1838_v10, %v1236_v44  ;;  %v543_v52 = vmul.f32 %v1838_v10, %v1237_v45  ;;  %v544_v53 = vmul.f32 %v1838_v10, %v1240_v46  ;;  %v545_v54 = vmul.f32 %v1838_v10, %v1241_v47  ;;  %v1336_v45 = vld [vmem:[%s1391_s18 + $0x1f8] sm:$0xff]  }
  0x7b   : > { %923 = vst.msk [vmem:[%s1423_s26 + $0x320] sm:$0xff] %vm822_vm0, %v794_v36  ;;  %v670_v55 = vadd.f32 %v1855_v19, %v538_v48  ;;  %v671_v56 = vadd.f32 %v1855_v19, %v539_v49  ;;  %v672_v57 = vadd.f32 %v1855_v19, %v540_v50  ;;  %v673_v58 = vadd.f32 %v1855_v19, %v541_v51 }
  0x7c   : > { %924 = vst.msk [vmem:[%s1423_s26 + $0x328] sm:$0xff] %vm822_vm0, %v795_v37  ;;  %v674_v59 = vadd.f32 %v1855_v19, %v542_v0  ;;  %v675_v60 = vadd.f32 %v1855_v19, %v543_v52  ;;  %v676_v61 = vadd.f32 %v1855_v19, %v544_v53  ;;  %v677_v62 = vadd.f32 %v1855_v19, %v545_v54 }
  0x7d   : > { %925 = vst.msk [vmem:[%s1423_s26 + $0x330] sm:$0xff] %vm822_vm0, %v796_v38  ;;  %v798_v2 = vmax.f32 %v670_v55, 0.0  ;;  %v799_v3 = vmax.f32 %v671_v56, 0.0  ;;  %v800_v4 = vmax.f32 %v672_v57, 0.0  ;;  %v801_v6 = vmax.f32 %v673_v58, 0.0  ;;  %v1333_v38 = vld [vmem:[%s1391_s18 + $0x1e0] sm:$0xff]  }
  0x7e   : > { %926 = vst.msk [vmem:[%s1423_s26 + $0x338] sm:$0xff] %vm822_vm0, %v797_v39  ;;  %v802_v8 = vmax.f32 %v674_v59, 0.0  ;;  %v803_v9 = vmax.f32 %v675_v60, 0.0  ;;  %v804_v11 = vmax.f32 %v676_v61, 0.0  ;;  %v805_v12 = vmax.f32 %v677_v62, 0.0  ;;  %v1334_v39 = vld [vmem:[%s1391_s18 + $0x1e8] sm:$0xff]  }
  0x7f   : > { %927 = vst.msk [vmem:[%s1423_s26 + $0x340] sm:$0xff] %vm822_vm0, %v798_v2  ;;  %v1244_v13 = vunpack.c.l.bf16 %v1329_v63  ;;  %v1245_v14 = vunpack.c.h.bf16 %v1329_v63  ;;  %v1248_v15 = vunpack.c.l.bf16 %v1330_v1  ;;  %v1249_v16 = vunpack.c.h.bf16 %v1330_v1 }
  0x80   : > { %928 = vst.msk [vmem:[%s1423_s26 + $0x348] sm:$0xff] %vm822_vm0, %v799_v3  ;;  %v1252_v17 = vunpack.c.l.bf16 %v1331_v5  ;;  %v1253_v18 = vunpack.c.h.bf16 %v1331_v5  ;;  %v1256_v20 = vunpack.c.l.bf16 %v1332_v7  ;;  %v1257_v21 = vunpack.c.h.bf16 %v1332_v7 }
  0x81   : > { %929 = vst.msk [vmem:[%s1423_s26 + $0x350] sm:$0xff] %vm822_vm0, %v800_v4  ;;  %v546_v22 = vmul.f32 %v1838_v10, %v1244_v13  ;;  %v547_v23 = vmul.f32 %v1838_v10, %v1245_v14  ;;  %v548_v24 = vmul.f32 %v1838_v10, %v1248_v15  ;;  %v549_v25 = vmul.f32 %v1838_v10, %v1249_v16 }
  0x82   : > { %930 = vst.msk [vmem:[%s1423_s26 + $0x358] sm:$0xff] %vm822_vm0, %v801_v6  ;;  %v550_v26 = vmul.f32 %v1838_v10, %v1252_v17  ;;  %v551_v27 = vmul.f32 %v1838_v10, %v1253_v18  ;;  %v552_v28 = vmul.f32 %v1838_v10, %v1256_v20  ;;  %v553_v29 = vmul.f32 %v1838_v10, %v1257_v21 }
  0x83   : > { %931 = vst.msk [vmem:[%s1423_s26 + $0x360] sm:$0xff] %vm822_vm0, %v802_v8  ;;  %v678_v30 = vadd.f32 %v1855_v19, %v546_v22  ;;  %v679_v31 = vadd.f32 %v1855_v19, %v547_v23  ;;  %v680_v32 = vadd.f32 %v1855_v19, %v548_v24  ;;  %v681_v33 = vadd.f32 %v1855_v19, %v549_v25 }
  0x84   : > { %932 = vst.msk [vmem:[%s1423_s26 + $0x368] sm:$0xff] %vm822_vm0, %v803_v9  ;;  %v682_v34 = vadd.f32 %v1855_v19, %v550_v26  ;;  %v683_v35 = vadd.f32 %v1855_v19, %v551_v27  ;;  %v684_v36 = vadd.f32 %v1855_v19, %v552_v28  ;;  %v685_v37 = vadd.f32 %v1855_v19, %v553_v29 }
  0x85   : > { %933 = vst.msk [vmem:[%s1423_s26 + $0x370] sm:$0xff] %vm822_vm0, %v804_v11  ;;  %v806_v41 = vmax.f32 %v678_v30, 0.0  ;;  %v807_v42 = vmax.f32 %v679_v31, 0.0  ;;  %v808_v43 = vmax.f32 %v680_v32, 0.0  ;;  %v809_v44 = vmax.f32 %v681_v33, 0.0 }
  0x86   : > { %934 = vst.msk [vmem:[%s1423_s26 + $0x378] sm:$0xff] %vm822_vm0, %v805_v12  ;;  %v810_v46 = vmax.f32 %v682_v34, 0.0  ;;  %v811_v47 = vmax.f32 %v683_v35, 0.0  ;;  %v812_v48 = vmax.f32 %v684_v36, 0.0  ;;  %v813_v49 = vmax.f32 %v685_v37, 0.0 }
  0x87   : > { %935 = vst.msk [vmem:[%s1423_s26 + $0x380] sm:$0xff] %vm822_vm0, %v806_v41  ;;  %v1260_v50 = vunpack.c.l.bf16 %v1333_v38  ;;  %v1261_v51 = vunpack.c.h.bf16 %v1333_v38  ;;  %v1264_v0 = vunpack.c.l.bf16 %v1334_v39  ;;  %v1265_v52 = vunpack.c.h.bf16 %v1334_v39 }
  0x88   : > { %936 = vst.msk [vmem:[%s1423_s26 + $0x388] sm:$0xff] %vm822_vm0, %v807_v42  ;;  %v1268_v53 = vunpack.c.l.bf16 %v1335_v40  ;;  %v1269_v54 = vunpack.c.h.bf16 %v1335_v40  ;;  %v1272_v55 = vunpack.c.l.bf16 %v1336_v45  ;;  %v1273_v56 = vunpack.c.h.bf16 %v1336_v45 }
  0x89   : > { %937 = vst.msk [vmem:[%s1423_s26 + $0x390] sm:$0xff] %vm822_vm0, %v808_v43  ;;  %v554_v57 = vmul.f32 %v1838_v10, %v1260_v50  ;;  %v555_v58 = vmul.f32 %v1838_v10, %v1261_v51  ;;  %v556_v59 = vmul.f32 %v1838_v10, %v1264_v0  ;;  %v557_v60 = vmul.f32 %v1838_v10, %v1265_v52 }
  0x8a   : > { %938 = vst.msk [vmem:[%s1423_s26 + $0x398] sm:$0xff] %vm822_vm0, %v809_v44  ;;  %v558_v61 = vmul.f32 %v1838_v10, %v1268_v53  ;;  %v559_v62 = vmul.f32 %v1838_v10, %v1269_v54  ;;  %v560_v63 = vmul.f32 %v1838_v10, %v1272_v55  ;;  %v561_v1 = vmul.f32 %v1838_v10, %v1273_v56 }
  0x8b   : > { %939 = vst.msk [vmem:[%s1423_s26 + $0x3a0] sm:$0xff] %vm822_vm0, %v810_v46  ;;  %v686_v5 = vadd.f32 %v1855_v19, %v554_v57  ;;  %v687_v2 = vadd.f32 %v1855_v19, %v555_v58  ;;  %v688_v3 = vadd.f32 %v1855_v19, %v556_v59  ;;  %v689_v4 = vadd.f32 %v1855_v19, %v557_v60 }
  0x8c   : > { %940 = vst.msk [vmem:[%s1423_s26 + $0x3a8] sm:$0xff] %vm822_vm0, %v811_v47  ;;  %v690_v6 = vadd.f32 %v1855_v19, %v558_v61  ;;  %v691_v10 = vadd.f32 %v1855_v19, %v559_v62  ;;  %v692_v11 = vadd.f32 %v1855_v19, %v560_v63  ;;  %v693_v13 = vadd.f32 %v1855_v19, %v561_v1 }
  0x8d   : > { %941 = vst.msk [vmem:[%s1423_s26 + $0x3b0] sm:$0xff] %vm822_vm0, %v812_v48  ;;  %v814_v7 = vmax.f32 %v686_v5, 0.0  ;;  %v815_v8 = vmax.f32 %v687_v2, 0.0  ;;  %v816_v9 = vmax.f32 %v688_v3, 0.0  ;;  %v817_v12 = vmax.f32 %v689_v4, 0.0 }
  0x8e   : > { %942 = vst.msk [vmem:[%s1423_s26 + $0x3b8] sm:$0xff] %vm822_vm0, %v813_v49  ;;  %v818_v14 = vmax.f32 %v690_v6, 0.0  ;;  %v819_v15 = vmax.f32 %v691_v10, 0.0  ;;  %v820_v16 = vmax.f32 %v692_v11, 0.0  ;;  %v821_v17 = vmax.f32 %v693_v13, 0.0 }
  0x8f   : > { %943 = vst.msk [vmem:[%s1423_s26 + $0x3c0] sm:$0xff] %vm822_vm0, %v814_v7 }
  0x90   : > { %944 = vst.msk [vmem:[%s1423_s26 + $0x3c8] sm:$0xff] %vm822_vm0, %v815_v8 }
  0x91   : > { %945 = vst.msk [vmem:[%s1423_s26 + $0x3d0] sm:$0xff] %vm822_vm0, %v816_v9 }
  0x92   : > { %946 = vst.msk [vmem:[%s1423_s26 + $0x3d8] sm:$0xff] %vm822_vm0, %v817_v12 }
  0x93   : > { %947 = vst.msk [vmem:[%s1423_s26 + $0x3e0] sm:$0xff] %vm822_vm0, %v818_v14 }
  0x94   : > { %948 = vst.msk [vmem:[%s1423_s26 + $0x3e8] sm:$0xff] %vm822_vm0, %v819_v15 }
  0x95   : > { %949 = vst.msk [vmem:[%s1423_s26 + $0x3f0] sm:$0xff] %vm822_vm0, %v820_v16 }
  0x96   : > { %950 = vst.msk [vmem:[%s1423_s26 + $0x3f8] sm:$0xff] %vm822_vm0, %v821_v17 }
  0x97 PF: > { %s13_s12 = sadd.s32 1, %s1355_s12  }
  0x98   : > { %p10_p4 = scmp.ge.s32.totalorder %s13_s12, 4  }
  0x9a   :  { %12 = sbr.rel (!%p10_p4) target bundleno = 1 (0x1), region = 62 }

</bundles_post_ra>
